<compile_context>
chip_gen: v7x
topology: tpu7x:2x2x1
jax: 0.10.0
libtpu: 0.0.40
codegen_flags: <defaults>
</compile_context>

<pallas_src>
from collections import namedtuple

import jax
import jax.numpy as jnp
import numpy as np
from jax import lax
from jax.experimental import pallas as pl
from jax.experimental.pallas import tpu as pltpu

K = 4          # ConvTranspose3d kernel size (4, 4, 4), stride 2, padding 1
BN_EPS = 1e-5
_HI = jax.lax.Precision.HIGHEST

# Static per-stage metadata (sz = cubic input size of the stage, cout = out
# channels, nlanes = 8*sz*cout matmul output lanes, wp_next = padded lane
# width of the next stage's activation buffer (None for the last stage),
# boff = offset of this stage's bias inside the concatenated bias vector).
Stage = namedtuple("Stage", ["sz", "cout", "nlanes", "wp_next", "boff"])


# ----------------------------------------------------------------------------
# In-kernel helpers
# ----------------------------------------------------------------------------
def _interleave(a, b, axis):
    """out[..., 2i, ...] = a[..., i, ...]; out[..., 2i+1, ...] = b[..., i, ...]."""
    ae = jnp.expand_dims(a, axis + 1)
    be = jnp.expand_dims(b, axis + 1)
    shp = list(a.shape)
    shp[axis] *= 2
    return jnp.concatenate([ae, be], axis=axis + 1).reshape(shp)


def _band_deconv(xp, w_ref, sz):
    """Polyphase ConvTranspose3d(k=4, s=2, p=1) with the width axis folded
    into the matmul.

    xp:     (1, sz+2, sz+2, 128) padded activation, lanes = (width, cin).
    w_ref:  (9*128, 8*sz*cout) width-band weight, K blocks ordered (jd, jh),
            columns ordered (pd, ph, ow, pw, co); BN scale already folded in.
    Returns (sz*sz, 8*sz*cout) f32.
    """
    kb = xp.shape[-1]
    rows = sz * sz
    acc = None
    for j in range(9):
        jd, jh = j // 3, j % 3
        lhs = xp[:, jd:jd + sz, jh:jh + sz, :].reshape(rows, kb)
        p = jnp.dot(lhs, w_ref[j * kb:(j + 1) * kb, :],
                    preferred_element_type=jnp.float32)
        acc = p if acc is None else acc + p
    return acc


def _pad_activation(y, w_in, cout, wp_next):
    """Turn a stage output y (1, d, h, 8*w_in*cout) with lanes (pd, ph, ow,
    pw, co) into the next stage's zero-padded activation
    (1, 2d+2, 2h+2, wp_next*cout) with lanes (padded width, channel).

    Depth/height parities are interleaved with leading-dim concats; the width
    parity interleave is an identity of the lane order; the zero border is
    added with cheap concats (one value, no scatter stores)."""
    nb, d, h, _ = y.shape
    cw = 2 * w_in * cout                                   # lanes per (pd, ph)
    ch = [[y[..., (2 * pd + ph) * cw:(2 * pd + ph + 1) * cw] for ph in (0, 1)]
          for pd in (0, 1)]
    dd = [_interleave(ch[0][ph], ch[1][ph], axis=1) for ph in (0, 1)]
    v = _interleave(dd[0], dd[1], axis=2)                  # (1, 2d, 2h, 2w*cout)
    # width zero border (left: 1 voxel, right: pad up to wp_next positions)
    zl = jnp.zeros(v.shape[:3] + (cout,), v.dtype)
    zr = jnp.zeros(v.shape[:3] + ((wp_next - 2 * w_in - 1) * cout,), v.dtype)
    v = jnp.concatenate([zl, v, zr], axis=-1)              # (1, 2d, 2h, 128)
    # depth / height zero border
    zd = jnp.zeros((nb, 1, 2 * h, v.shape[-1]), v.dtype)
    v = jnp.concatenate([zd, v, zd], axis=1)               # (1, 2d+2, 2h, 128)
    zh = jnp.zeros((nb, 2 * d + 2, 1, v.shape[-1]), v.dtype)
    return jnp.concatenate([zh, v, zh], axis=2)            # (1, 2d+2, 2h+2, 128)


# ----------------------------------------------------------------------------
# Fused generator kernel: Linear + 4 deconv/BN/ReLU blocks + Sigmoid
# ----------------------------------------------------------------------------
def _make_generator_kernel(stages):
    s1, s2, s3, s4 = stages

    def kernel(z_ref, w1_ref, w2_ref, w3_ref, w4_ref, b_ref, out_ref):
        # ---- Stage 1: Linear + deconv block 1 (1^3 -> 2^3), fully folded ---
        y = jnp.dot(z_ref[0], w1_ref[...], preferred_element_type=jnp.float32)
        y = jnp.maximum(y + b_ref[:, s1.boff:s1.boff + s1.nlanes], 0.0)
        xp = _pad_activation(y.reshape(1, s1.sz, s1.sz, s1.nlanes),
                             s1.sz, s1.cout, s1.wp_next)

        # ---- Stages 2..4 (2^3 -> 4^3 -> 8^3 -> 16^3) ------------------------
        for st, w_ref in ((s2, w2_ref), (s3, w3_ref), (s4, w4_ref)):
            y = _band_deconv(xp, w_ref, st.sz)
            y = jnp.maximum(y + b_ref[:, st.boff:st.boff + st.nlanes], 0.0)
            if st.wp_next is None:
                # Final block: Sigmoid, lane-dense (64-lane) store.
                out_ref[...] = jax.nn.sigmoid(y).reshape(out_ref.shape)
            else:
                xp = _pad_activation(y.reshape(1, st.sz, st.sz, st.nlanes),
                                     st.sz, st.cout, st.wp_next)

    return kernel


def make_generator_forward(packed):
    """Build the jitted fused forward; returns fn(z) -> NCDHW volume."""
    stages = packed["stages"]
    kernel = _make_generator_kernel(stages)
    weights = packed["weights"]
    bias = packed["bias"]
    co = packed["out_channels"]
    last = stages[-1]
    rows = last.sz * last.sz

    @jax.jit
    def forward(z, w1, w2, w3, w4, b_all):
        nb, nz = z.shape
        z3 = z.reshape(nb, 1, nz)
        out_flat = pl.pallas_call(
            kernel,
            grid=(nb,),
            in_specs=[
                pl.BlockSpec((1, 1, nz), lambda b: (b, 0, 0)),
                pl.BlockSpec(w1.shape, lambda b: (0, 0)),
                pl.BlockSpec(w2.shape, lambda b: (0, 0)),
                pl.BlockSpec(w3.shape, lambda b: (0, 0)),
                pl.BlockSpec(w4.shape, lambda b: (0, 0)),
                pl.BlockSpec(b_all.shape, lambda b: (0, 0)),
            ],
            out_specs=pl.BlockSpec((1, rows, last.nlanes), lambda b: (b, 0, 0)),
            out_shape=jax.ShapeDtypeStruct((nb, rows, last.nlanes), jnp.float32),
            compiler_params=pltpu.CompilerParams(
                dimension_semantics=("parallel",)),
        )(z3, w1, w2, w3, w4, b_all)

        # De-interleave the polyphase lanes into NCDHW outside the kernel
        # (pure XLA layout glue on a ~32 KiB tensor).
        sz = last.sz
        y = out_flat.reshape(nb, sz, sz, 2, 2, sz, 2, co)
        y = y.transpose(0, 7, 1, 3, 2, 4, 5, 6)
        return y.reshape(nb, co, 2 * sz, 2 * sz, 2 * sz)

    def apply(z):
        return forward(z, weights[0], weights[1], weights[2], weights[3], bias)

    return apply


# ----------------------------------------------------------------------------
# Parameter init (deterministic, synthetic), packing, and pure-XLA reference
# ----------------------------------------------------------------------------
def init_params(key, *, in_channels=32, out_dim=16, out_channels=1,
                noise_dim=16):
    in_dim = out_dim // 16
    conv_out = [in_channels // 2 ** i for i in range(3)] + [out_channels]
    conv_in = [in_channels] + conv_out[:-1]

    keys = jax.random.split(key, 2 + 4 * len(conv_out))
    lin_out = in_channels * in_dim ** 3
    lin_w = 0.05 * jax.random.normal(keys[0], (noise_dim, lin_out), jnp.float32)
    lin_b = 0.05 * jax.random.normal(keys[1], (lin_out,), jnp.float32)

    convs = []
    for i, (ci, co) in enumerate(zip(conv_in, conv_out)):
        kw_, kg, kb, km = keys[2 + 4 * i: 6 + 4 * i]
        # PyTorch ConvTranspose3d weight layout: (Cin, Cout, kD, kH, kW)
        w = jax.random.normal(kw_, (ci, co, K, K, K), jnp.float32) * (0.5 / ci ** 0.5)
        gamma = 1.0 + 0.1 * jax.random.normal(kg, (co,), jnp.float32)
        beta = 0.1 * jax.random.normal(kb, (co,), jnp.float32)
        rmean = 0.1 * jax.random.normal(km, (co,), jnp.float32)
        rvar = jnp.ones((co,), jnp.float32)
        scale = gamma / jnp.sqrt(rvar + BN_EPS)   # folded BN (inference mode)
        bias = beta - rmean * scale
        convs.append(dict(w=w, scale=scale, bias=bias))

    return dict(lin_w=lin_w, lin_b=lin_b, in_channels=in_channels,
                in_dim=in_dim, convs=convs)


def _band_weight(w, w_in, wp):
    """Width-band polyphase weight for ConvTranspose3d(k=4, s=2, p=1).

    w: PyTorch-layout weight (cin, cout, 4, 4, 4).  Returns
    (9*wp*cin, 8*w_in*cout); K rows ordered (jd, jh, wp, ci) to match the
    (jd, jh)-shifted, width-folded im2col views; columns ordered
    (pd, ph, ow, pw, co).  Output parity p uses tap offsets j in {p, p+1}
    with kernel index 3 + p - 2*j along each spatial dim."""
    cin, cout = int(w.shape[0]), int(w.shape[1])
    wk = np.zeros((3, 3, wp, cin, 2, 2, w_in, 2, cout), np.float32)
    for pd in (0, 1):
        for jd in (pd, pd + 1):
            kd = 3 + pd - 2 * jd
            for ph in (0, 1):
                for jh in (ph, ph + 1):
                    kh = 3 + ph - 2 * jh
                    for pw in (0, 1):
                        for jw in (pw, pw + 1):
                            kw = 3 + pw - 2 * jw
                            for ow in range(w_in):
                                wk[jd, jh, ow + jw, :, pd, ph, ow, pw, :] = \
                                    w[:, :, kd, kh, kw]
    return wk.reshape(9 * wp * cin, 8 * w_in * cout)


def pack_params(params):
    """Repack PyTorch-layout weights into the fused-kernel form: BN scale
    folded into the weight columns, the Linear layer folded into stage 1,
    biases concatenated into a single lane vector."""
    assert params["in_dim"] == 1, "fused kernel specialises the 1^3 projection"
    convs = params["convs"]
    lin_w = np.asarray(params["lin_w"], np.float32)
    lin_b = np.asarray(params["lin_b"], np.float32)

    weights, biases, stages = [], [], []
    boff = 0
    sz = params["in_dim"]
    for i, layer in enumerate(convs):
        w = np.asarray(layer["w"], np.float32)              # (cin, cout, 4,4,4)
        cin, cout = int(w.shape[0]), int(w.shape[1])
        scale = np.asarray(layer["scale"], np.float32)
        bbias = np.asarray(layer["bias"], np.float32)
        nlanes = 8 * sz * cout
        last = (i == len(convs) - 1)
        if last:
            wp_next = None
        else:
            wp_next = 128 // cout                           # 128-lane activations
            assert 128 % cout == 0 and wp_next >= 2 * sz + 2

        if i == 0:
            # Only the centre 2x2x2 taps touch the single projected voxel, so
            # Linear + deconv-1 + BN scale collapse into one (noise, 8*cout)
            # matmul; lane order (pd, ph, pw, co).
            w1p = w[:, :, 1:3, 1:3, 1:3].transpose(0, 2, 3, 4, 1).reshape(cin, 8 * cout)
            s_col = np.tile(scale, 8)
            wk = (lin_w @ w1p) * s_col[None, :]
            bk = (lin_b @ w1p) * s_col + np.tile(bbias, 8)
        else:
            wp_in = stages[i - 1].wp_next                    # padded input width
            s_col = np.tile(scale, 8 * sz)
            wk = _band_weight(w, sz, wp_in) * s_col[None, :]
            bk = np.tile(bbias, 8 * sz)

        weights.append(jnp.asarray(wk, jnp.float32))
        biases.append(bk.astype(np.float32))
        stages.append(Stage(sz=sz, cout=cout, nlanes=nlanes,
                            wp_next=wp_next, boff=boff))
        boff += nlanes
        sz *= 2

    bias_all = jnp.asarray(np.concatenate(biases)[None, :], jnp.float32)
    return dict(weights=weights, bias=bias_all, stages=tuple(stages),
                out_channels=int(convs[-1]["w"].shape[1]))


def reference_forward(z, params):
    """Plain-XLA reference: zero-upsampled transposed conv + folded BN + ReLU."""
    h = jnp.dot(z, params["lin_w"], precision=_HI) + params["lin_b"]
    nb = z.shape[0]
    c0, d0 = params["in_channels"], params["in_dim"]
    x = h.reshape(nb, c0, d0, d0, d0).transpose(0, 2, 3, 4, 1)   # NDHWC
    n = len(params["convs"])
    for i, layer in enumerate(params["convs"]):
        w = layer["w"]                                           # (Cin,Cout,4,4,4)
        wf = jnp.flip(w, axis=(2, 3, 4)).transpose(2, 3, 4, 0, 1)  # DHWIO
        xp = lax.pad(x, jnp.float32(0.0),
                     [(0, 0, 0), (2, 2, 1), (2, 2, 1), (2, 2, 1), (0, 0, 0)])
        y = lax.conv_general_dilated(
            xp, wf, window_strides=(1, 1, 1), padding="VALID",
            dimension_numbers=("NDHWC", "DHWIO", "NDHWC"), precision=_HI)
        y = y * layer["scale"] + layer["bias"]
        y = jnp.maximum(y, 0.0)
        if i == n - 1:
            y = jax.nn.sigmoid(y)
        x = y
    return x.transpose(0, 4, 1, 2, 3)                            # NCDHW


# ----------------------------------------------------------------------------
if __name__ == "__main__":
    # Small config consistent with the module: out_dim=16 -> in_dim=1,
    # channels 32 -> 32 -> 16 -> 8 -> 1, spatial 1 -> 2 -> 4 -> 8 -> 16.
    B, NOISE_DIM, IN_CH, OUT_DIM, OUT_CH = 2, 16, 32, 16, 1

    key = jax.random.PRNGKey(0)
    pkey, zkey = jax.random.split(key)
    params = init_params(pkey, in_channels=IN_CH, out_dim=OUT_DIM,
                         out_channels=OUT_CH, noise_dim=NOISE_DIM)
    packed = pack_params(params)
    forward = make_generator_forward(packed)

    z = jax.random.normal(zkey, (B, NOISE_DIM), jnp.float32)
    out = jax.block_until_ready(forward(z))

    assert out.shape == (B, OUT_CH, OUT_DIM, OUT_DIM, OUT_DIM), out.shape
    assert bool(jnp.all(jnp.isfinite(out)))
    assert bool(jnp.all(out >= 0.0)) and bool(jnp.all(out <= 1.0))

    # Cross-check the fused polyphase kernel against a plain-XLA reference of
    # the same module semantics (tolerances cover MXU f32 pass differences).
    ref = jax.block_until_ready(reference_forward(z, params))
    max_err = float(jnp.max(jnp.abs(out - ref)))
    mean_err = float(jnp.mean(jnp.abs(out - ref)))
    assert max_err < 2e-2 and mean_err < 2e-3, (max_err, mean_err)

    print("KERNEL_OK")
</pallas_src>

<mosaic_0001>
module attributes {stable_mosaic.version = 11 : i64} {
  func.func @kernel(%arg0: i32, %arg1: memref<1x1x16xf32, #tpu.memory_space<vmem>>, %arg2: memref<16x256xf32, #tpu.memory_space<vmem>>, %arg3: memref<1152x256xf32, #tpu.memory_space<vmem>>, %arg4: memref<1152x256xf32, #tpu.memory_space<vmem>>, %arg5: memref<1152x64xf32, #tpu.memory_space<vmem>>, %arg6: memref<1x832xf32, #tpu.memory_space<vmem>>, %arg7: memref<1x64x64xf32, #tpu.memory_space<vmem>>) attributes {dimension_semantics = [#tpu.dimension_semantics<parallel>], iteration_bounds = array<i64: 2>, scalar_prefetch = 0 : i64, scratch_operands = 0 : i64, tpu.core_type = #tpu.core_type<tc>, window_params = [{transform_indices = @transform_0, window_bounds = array<i64: 1, 1, 16>}, {pipeline_mode = #tpu.pipeline_mode<synchronous>, transform_indices = @transform_1, window_bounds = array<i64: 16, 256>}, {pipeline_mode = #tpu.pipeline_mode<synchronous>, transform_indices = @transform_2, window_bounds = array<i64: 1152, 256>}, {pipeline_mode = #tpu.pipeline_mode<synchronous>, transform_indices = @transform_3, window_bounds = array<i64: 1152, 256>}, {pipeline_mode = #tpu.pipeline_mode<synchronous>, transform_indices = @transform_4, window_bounds = array<i64: 1152, 64>}, {pipeline_mode = #tpu.pipeline_mode<synchronous>, transform_indices = @transform_5, window_bounds = array<i64: 1, 832>}, {transform_indices = @transform_6, window_bounds = array<i64: 1, 64, 64>}]} {
    %c0 = arith.constant 0 : index
    %c0_0 = arith.constant 0 : index
    %c0_1 = arith.constant 0 : index
    %0 = vector.load %arg1[%c0, %c0_0, %c0_1] : memref<1x1x16xf32, #tpu.memory_space<vmem>>, vector<1x1x16xf32>
    %1 = vector.shape_cast %0 : vector<1x1x16xf32> to vector<1x16xf32>
    %c0_2 = arith.constant 0 : index
    %c0_3 = arith.constant 0 : index
    %2 = vector.load %arg2[%c0_2, %c0_3] : memref<16x256xf32, #tpu.memory_space<vmem>>, vector<16x256xf32>
    %cst = arith.constant dense<0.000000e+00> : vector<1x256xf32>
    %3 = tpu.matmul %1, %2, %cst {dimension_numbers = #tpu.dot_dimension_numbers<[1], [0], [0], [1], [0, 0, 1, 1], [], []>} : vector<1x16xf32>, vector<16x256xf32>, vector<1x256xf32> -> vector<1x256xf32>
    %c0_4 = arith.constant 0 : index
    %c0_5 = arith.constant 0 : index
    %4 = vector.load %arg6[%c0_4, %c0_5] : memref<1x832xf32, #tpu.memory_space<vmem>>, vector<1x256xf32>
    %5 = arith.addf %3, %4 : vector<1x256xf32>
    %cst_6 = arith.constant 0.000000e+00 : f32
    %6 = vector.broadcast %cst_6 : f32 to vector<1x256xf32>
    %7 = arith.maximumf %5, %6 : vector<1x256xf32>
    %8 = vector.shape_cast %7 : vector<1x256xf32> to vector<1x1x1x256xf32>
    %9 = vector.extract_strided_slice %8 {offsets = [0, 0, 0, 0], sizes = [1, 1, 1, 64], strides = [1, 1, 1, 1]} : vector<1x1x1x256xf32> to vector<1x1x1x64xf32>
    %10 = vector.extract_strided_slice %8 {offsets = [0, 0, 0, 64], sizes = [1, 1, 1, 64], strides = [1, 1, 1, 1]} : vector<1x1x1x256xf32> to vector<1x1x1x64xf32>
    %11 = vector.extract_strided_slice %8 {offsets = [0, 0, 0, 128], sizes = [1, 1, 1, 64], strides = [1, 1, 1, 1]} : vector<1x1x1x256xf32> to vector<1x1x1x64xf32>
    %12 = vector.extract_strided_slice %8 {offsets = [0, 0, 0, 192], sizes = [1, 1, 1, 64], strides = [1, 1, 1, 1]} : vector<1x1x1x256xf32> to vector<1x1x1x64xf32>
    %13 = vector.shape_cast %9 : vector<1x1x1x64xf32> to vector<1x1x1x1x64xf32>
    %14 = vector.shape_cast %11 : vector<1x1x1x64xf32> to vector<1x1x1x1x64xf32>
    %15 = tpu.concatenate %13, %14 in 2 : vector<1x1x1x1x64xf32>, vector<1x1x1x1x64xf32> -> vector<1x1x2x1x64xf32>
    %16 = vector.shape_cast %15 : vector<1x1x2x1x64xf32> to vector<1x2x1x64xf32>
    %17 = vector.shape_cast %10 : vector<1x1x1x64xf32> to vector<1x1x1x1x64xf32>
    %18 = vector.shape_cast %12 : vector<1x1x1x64xf32> to vector<1x1x1x1x64xf32>
    %19 = tpu.concatenate %17, %18 in 2 : vector<1x1x1x1x64xf32>, vector<1x1x1x1x64xf32> -> vector<1x1x2x1x64xf32>
    %20 = vector.shape_cast %19 : vector<1x1x2x1x64xf32> to vector<1x2x1x64xf32>
    %21 = vector.shape_cast %16 : vector<1x2x1x64xf32> to vector<1x2x1x1x64xf32>
    %22 = vector.shape_cast %20 : vector<1x2x1x64xf32> to vector<1x2x1x1x64xf32>
    %23 = tpu.concatenate %21, %22 in 3 : vector<1x2x1x1x64xf32>, vector<1x2x1x1x64xf32> -> vector<1x2x1x2x64xf32>
    %24 = vector.shape_cast %23 : vector<1x2x1x2x64xf32> to vector<1x2x2x64xf32>
    %cst_7 = arith.constant 0.000000e+00 : f32
    %25 = vector.broadcast %cst_7 : f32 to vector<1x2x2x32xf32>
    %cst_8 = arith.constant 0.000000e+00 : f32
    %26 = vector.broadcast %cst_8 : f32 to vector<1x2x2x32xf32>
    %27 = tpu.concatenate %25, %24, %26 in 3 : vector<1x2x2x32xf32>, vector<1x2x2x64xf32>, vector<1x2x2x32xf32> -> vector<1x2x2x128xf32>
    %cst_9 = arith.constant 0.000000e+00 : f32
    %28 = vector.broadcast %cst_9 : f32 to vector<1x1x2x128xf32>
    %29 = tpu.concatenate %28, %27, %28 in 1 : vector<1x1x2x128xf32>, vector<1x2x2x128xf32>, vector<1x1x2x128xf32> -> vector<1x4x2x128xf32>
    %cst_10 = arith.constant 0.000000e+00 : f32
    %30 = vector.broadcast %cst_10 : f32 to vector<1x4x1x128xf32>
    %31 = tpu.concatenate %30, %29, %30 in 2 : vector<1x4x1x128xf32>, vector<1x4x2x128xf32>, vector<1x4x1x128xf32> -> vector<1x4x4x128xf32>
    %32 = vector.extract_strided_slice %31 {offsets = [0, 0, 0, 0], sizes = [1, 2, 2, 128], strides = [1, 1, 1, 1]} : vector<1x4x4x128xf32> to vector<1x2x2x128xf32>
    %33 = vector.shape_cast %32 : vector<1x2x2x128xf32> to vector<4x128xf32>
    %c0_11 = arith.constant 0 : index
    %c0_12 = arith.constant 0 : index
    %34 = vector.load %arg3[%c0_11, %c0_12] : memref<1152x256xf32, #tpu.memory_space<vmem>>, vector<128x256xf32>
    %cst_13 = arith.constant dense<0.000000e+00> : vector<4x256xf32>
    %35 = tpu.matmul %33, %34, %cst_13 {dimension_numbers = #tpu.dot_dimension_numbers<[1], [0], [0], [1], [0, 0, 1, 1], [], []>} : vector<4x128xf32>, vector<128x256xf32>, vector<4x256xf32> -> vector<4x256xf32>
    %36 = vector.extract_strided_slice %31 {offsets = [0, 0, 1, 0], sizes = [1, 2, 2, 128], strides = [1, 1, 1, 1]} : vector<1x4x4x128xf32> to vector<1x2x2x128xf32>
    %37 = vector.shape_cast %36 : vector<1x2x2x128xf32> to vector<4x128xf32>
    %c128 = arith.constant 128 : index
    %c0_14 = arith.constant 0 : index
    %38 = vector.load %arg3[%c128, %c0_14] : memref<1152x256xf32, #tpu.memory_space<vmem>>, vector<128x256xf32>
    %cst_15 = arith.constant dense<0.000000e+00> : vector<4x256xf32>
    %39 = tpu.matmul %37, %38, %cst_15 {dimension_numbers = #tpu.dot_dimension_numbers<[1], [0], [0], [1], [0, 0, 1, 1], [], []>} : vector<4x128xf32>, vector<128x256xf32>, vector<4x256xf32> -> vector<4x256xf32>
    %40 = arith.addf %35, %39 : vector<4x256xf32>
    %41 = vector.extract_strided_slice %31 {offsets = [0, 0, 2, 0], sizes = [1, 2, 2, 128], strides = [1, 1, 1, 1]} : vector<1x4x4x128xf32> to vector<1x2x2x128xf32>
    %42 = vector.shape_cast %41 : vector<1x2x2x128xf32> to vector<4x128xf32>
    %c256 = arith.constant 256 : index
    %c0_16 = arith.constant 0 : index
    %43 = vector.load %arg3[%c256, %c0_16] : memref<1152x256xf32, #tpu.memory_space<vmem>>, vector<128x256xf32>
    %cst_17 = arith.constant dense<0.000000e+00> : vector<4x256xf32>
    %44 = tpu.matmul %42, %43, %cst_17 {dimension_numbers = #tpu.dot_dimension_numbers<[1], [0], [0], [1], [0, 0, 1, 1], [], []>} : vector<4x128xf32>, vector<128x256xf32>, vector<4x256xf32> -> vector<4x256xf32>
    %45 = arith.addf %40, %44 : vector<4x256xf32>
    %46 = vector.extract_strided_slice %31 {offsets = [0, 1, 0, 0], sizes = [1, 2, 2, 128], strides = [1, 1, 1, 1]} : vector<1x4x4x128xf32> to vector<1x2x2x128xf32>
    %47 = vector.shape_cast %46 : vector<1x2x2x128xf32> to vector<4x128xf32>
    %c384 = arith.constant 384 : index
    %c0_18 = arith.constant 0 : index
    %48 = vector.load %arg3[%c384, %c0_18] : memref<1152x256xf32, #tpu.memory_space<vmem>>, vector<128x256xf32>
    %cst_19 = arith.constant dense<0.000000e+00> : vector<4x256xf32>
    %49 = tpu.matmul %47, %48, %cst_19 {dimension_numbers = #tpu.dot_dimension_numbers<[1], [0], [0], [1], [0, 0, 1, 1], [], []>} : vector<4x128xf32>, vector<128x256xf32>, vector<4x256xf32> -> vector<4x256xf32>
    %50 = arith.addf %45, %49 : vector<4x256xf32>
    %51 = vector.extract_strided_slice %31 {offsets = [0, 1, 1, 0], sizes = [1, 2, 2, 128], strides = [1, 1, 1, 1]} : vector<1x4x4x128xf32> to vector<1x2x2x128xf32>
    %52 = vector.shape_cast %51 : vector<1x2x2x128xf32> to vector<4x128xf32>
    %c512 = arith.constant 512 : index
    %c0_20 = arith.constant 0 : index
    %53 = vector.load %arg3[%c512, %c0_20] : memref<1152x256xf32, #tpu.memory_space<vmem>>, vector<128x256xf32>
    %cst_21 = arith.constant dense<0.000000e+00> : vector<4x256xf32>
    %54 = tpu.matmul %52, %53, %cst_21 {dimension_numbers = #tpu.dot_dimension_numbers<[1], [0], [0], [1], [0, 0, 1, 1], [], []>} : vector<4x128xf32>, vector<128x256xf32>, vector<4x256xf32> -> vector<4x256xf32>
    %55 = arith.addf %50, %54 : vector<4x256xf32>
    %56 = vector.extract_strided_slice %31 {offsets = [0, 1, 2, 0], sizes = [1, 2, 2, 128], strides = [1, 1, 1, 1]} : vector<1x4x4x128xf32> to vector<1x2x2x128xf32>
    %57 = vector.shape_cast %56 : vector<1x2x2x128xf32> to vector<4x128xf32>
    %c640 = arith.constant 640 : index
    %c0_22 = arith.constant 0 : index
    %58 = vector.load %arg3[%c640, %c0_22] : memref<1152x256xf32, #tpu.memory_space<vmem>>, vector<128x256xf32>
    %cst_23 = arith.constant dense<0.000000e+00> : vector<4x256xf32>
    %59 = tpu.matmul %57, %58, %cst_23 {dimension_numbers = #tpu.dot_dimension_numbers<[1], [0], [0], [1], [0, 0, 1, 1], [], []>} : vector<4x128xf32>, vector<128x256xf32>, vector<4x256xf32> -> vector<4x256xf32>
    %60 = arith.addf %55, %59 : vector<4x256xf32>
    %61 = vector.extract_strided_slice %31 {offsets = [0, 2, 0, 0], sizes = [1, 2, 2, 128], strides = [1, 1, 1, 1]} : vector<1x4x4x128xf32> to vector<1x2x2x128xf32>
    %62 = vector.shape_cast %61 : vector<1x2x2x128xf32> to vector<4x128xf32>
    %c768 = arith.constant 768 : index
    %c0_24 = arith.constant 0 : index
    %63 = vector.load %arg3[%c768, %c0_24] : memref<1152x256xf32, #tpu.memory_space<vmem>>, vector<128x256xf32>
    %cst_25 = arith.constant dense<0.000000e+00> : vector<4x256xf32>
    %64 = tpu.matmul %62, %63, %cst_25 {dimension_numbers = #tpu.dot_dimension_numbers<[1], [0], [0], [1], [0, 0, 1, 1], [], []>} : vector<4x128xf32>, vector<128x256xf32>, vector<4x256xf32> -> vector<4x256xf32>
    %65 = arith.addf %60, %64 : vector<4x256xf32>
    %66 = vector.extract_strided_slice %31 {offsets = [0, 2, 1, 0], sizes = [1, 2, 2, 128], strides = [1, 1, 1, 1]} : vector<1x4x4x128xf32> to vector<1x2x2x128xf32>
    %67 = vector.shape_cast %66 : vector<1x2x2x128xf32> to vector<4x128xf32>
    %c896 = arith.constant 896 : index
    %c0_26 = arith.constant 0 : index
    %68 = vector.load %arg3[%c896, %c0_26] : memref<1152x256xf32, #tpu.memory_space<vmem>>, vector<128x256xf32>
    %cst_27 = arith.constant dense<0.000000e+00> : vector<4x256xf32>
    %69 = tpu.matmul %67, %68, %cst_27 {dimension_numbers = #tpu.dot_dimension_numbers<[1], [0], [0], [1], [0, 0, 1, 1], [], []>} : vector<4x128xf32>, vector<128x256xf32>, vector<4x256xf32> -> vector<4x256xf32>
    %70 = arith.addf %65, %69 : vector<4x256xf32>
    %71 = vector.extract_strided_slice %31 {offsets = [0, 2, 2, 0], sizes = [1, 2, 2, 128], strides = [1, 1, 1, 1]} : vector<1x4x4x128xf32> to vector<1x2x2x128xf32>
    %72 = vector.shape_cast %71 : vector<1x2x2x128xf32> to vector<4x128xf32>
    %c1024 = arith.constant 1024 : index
    %c0_28 = arith.constant 0 : index
    %73 = vector.load %arg3[%c1024, %c0_28] : memref<1152x256xf32, #tpu.memory_space<vmem>>, vector<128x256xf32>
    %cst_29 = arith.constant dense<0.000000e+00> : vector<4x256xf32>
    %74 = tpu.matmul %72, %73, %cst_29 {dimension_numbers = #tpu.dot_dimension_numbers<[1], [0], [0], [1], [0, 0, 1, 1], [], []>} : vector<4x128xf32>, vector<128x256xf32>, vector<4x256xf32> -> vector<4x256xf32>
    %75 = arith.addf %70, %74 : vector<4x256xf32>
    %c0_30 = arith.constant 0 : index
    %c256_31 = arith.constant 256 : index
    %76 = vector.load %arg6[%c0_30, %c256_31] : memref<1x832xf32, #tpu.memory_space<vmem>>, vector<1x256xf32>
    %77 = vector.broadcast %76 : vector<1x256xf32> to vector<4x256xf32>
    %78 = arith.addf %75, %77 : vector<4x256xf32>
    %cst_32 = arith.constant 0.000000e+00 : f32
    %79 = vector.broadcast %cst_32 : f32 to vector<4x256xf32>
    %80 = arith.maximumf %78, %79 : vector<4x256xf32>
    %81 = vector.shape_cast %80 : vector<4x256xf32> to vector<1x2x2x256xf32>
    %82 = vector.extract_strided_slice %81 {offsets = [0, 0, 0, 0], sizes = [1, 2, 2, 64], strides = [1, 1, 1, 1]} : vector<1x2x2x256xf32> to vector<1x2x2x64xf32>
    %83 = vector.extract_strided_slice %81 {offsets = [0, 0, 0, 64], sizes = [1, 2, 2, 64], strides = [1, 1, 1, 1]} : vector<1x2x2x256xf32> to vector<1x2x2x64xf32>
    %84 = vector.extract_strided_slice %81 {offsets = [0, 0, 0, 128], sizes = [1, 2, 2, 64], strides = [1, 1, 1, 1]} : vector<1x2x2x256xf32> to vector<1x2x2x64xf32>
    %85 = vector.extract_strided_slice %81 {offsets = [0, 0, 0, 192], sizes = [1, 2, 2, 64], strides = [1, 1, 1, 1]} : vector<1x2x2x256xf32> to vector<1x2x2x64xf32>
    %86 = vector.shape_cast %82 : vector<1x2x2x64xf32> to vector<1x2x1x2x64xf32>
    %87 = vector.shape_cast %84 : vector<1x2x2x64xf32> to vector<1x2x1x2x64xf32>
    %88 = tpu.concatenate %86, %87 in 2 : vector<1x2x1x2x64xf32>, vector<1x2x1x2x64xf32> -> vector<1x2x2x2x64xf32>
    %89 = vector.shape_cast %88 : vector<1x2x2x2x64xf32> to vector<1x4x2x64xf32>
    %90 = vector.shape_cast %83 : vector<1x2x2x64xf32> to vector<1x2x1x2x64xf32>
    %91 = vector.shape_cast %85 : vector<1x2x2x64xf32> to vector<1x2x1x2x64xf32>
    %92 = tpu.concatenate %90, %91 in 2 : vector<1x2x1x2x64xf32>, vector<1x2x1x2x64xf32> -> vector<1x2x2x2x64xf32>
    %93 = vector.shape_cast %92 : vector<1x2x2x2x64xf32> to vector<1x4x2x64xf32>
    %94 = vector.shape_cast %89 : vector<1x4x2x64xf32> to vector<1x4x2x1x64xf32>
    %95 = vector.shape_cast %93 : vector<1x4x2x64xf32> to vector<1x4x2x1x64xf32>
    %96 = tpu.concatenate %94, %95 in 3 : vector<1x4x2x1x64xf32>, vector<1x4x2x1x64xf32> -> vector<1x4x2x2x64xf32>
    %97 = vector.shape_cast %96 : vector<1x4x2x2x64xf32> to vector<1x4x4x64xf32>
    %cst_33 = arith.constant 0.000000e+00 : f32
    %98 = vector.broadcast %cst_33 : f32 to vector<1x4x4x16xf32>
    %cst_34 = arith.constant 0.000000e+00 : f32
    %99 = vector.broadcast %cst_34 : f32 to vector<1x4x4x48xf32>
    %100 = tpu.concatenate %98, %97, %99 in 3 : vector<1x4x4x16xf32>, vector<1x4x4x64xf32>, vector<1x4x4x48xf32> -> vector<1x4x4x128xf32>
    %cst_35 = arith.constant 0.000000e+00 : f32
    %101 = vector.broadcast %cst_35 : f32 to vector<1x1x4x128xf32>
    %102 = tpu.concatenate %101, %100, %101 in 1 : vector<1x1x4x128xf32>, vector<1x4x4x128xf32>, vector<1x1x4x128xf32> -> vector<1x6x4x128xf32>
    %cst_36 = arith.constant 0.000000e+00 : f32
    %103 = vector.broadcast %cst_36 : f32 to vector<1x6x1x128xf32>
    %104 = tpu.concatenate %103, %102, %103 in 2 : vector<1x6x1x128xf32>, vector<1x6x4x128xf32>, vector<1x6x1x128xf32> -> vector<1x6x6x128xf32>
    %105 = vector.extract_strided_slice %104 {offsets = [0, 0, 0, 0], sizes = [1, 4, 4, 128], strides = [1, 1, 1, 1]} : vector<1x6x6x128xf32> to vector<1x4x4x128xf32>
    %106 = vector.shape_cast %105 : vector<1x4x4x128xf32> to vector<16x128xf32>
    %c0_37 = arith.constant 0 : index
    %c0_38 = arith.constant 0 : index
    %107 = vector.load %arg4[%c0_37, %c0_38] : memref<1152x256xf32, #tpu.memory_space<vmem>>, vector<128x256xf32>
    %cst_39 = arith.constant dense<0.000000e+00> : vector<16x256xf32>
    %108 = tpu.matmul %106, %107, %cst_39 {dimension_numbers = #tpu.dot_dimension_numbers<[1], [0], [0], [1], [0, 0, 1, 1], [], []>} : vector<16x128xf32>, vector<128x256xf32>, vector<16x256xf32> -> vector<16x256xf32>
    %109 = vector.extract_strided_slice %104 {offsets = [0, 0, 1, 0], sizes = [1, 4, 4, 128], strides = [1, 1, 1, 1]} : vector<1x6x6x128xf32> to vector<1x4x4x128xf32>
    %110 = vector.shape_cast %109 : vector<1x4x4x128xf32> to vector<16x128xf32>
    %c128_40 = arith.constant 128 : index
    %c0_41 = arith.constant 0 : index
    %111 = vector.load %arg4[%c128_40, %c0_41] : memref<1152x256xf32, #tpu.memory_space<vmem>>, vector<128x256xf32>
    %cst_42 = arith.constant dense<0.000000e+00> : vector<16x256xf32>
    %112 = tpu.matmul %110, %111, %cst_42 {dimension_numbers = #tpu.dot_dimension_numbers<[1], [0], [0], [1], [0, 0, 1, 1], [], []>} : vector<16x128xf32>, vector<128x256xf32>, vector<16x256xf32> -> vector<16x256xf32>
    %113 = arith.addf %108, %112 : vector<16x256xf32>
    %114 = vector.extract_strided_slice %104 {offsets = [0, 0, 2, 0], sizes = [1, 4, 4, 128], strides = [1, 1, 1, 1]} : vector<1x6x6x128xf32> to vector<1x4x4x128xf32>
    %115 = vector.shape_cast %114 : vector<1x4x4x128xf32> to vector<16x128xf32>
    %c256_43 = arith.constant 256 : index
    %c0_44 = arith.constant 0 : index
    %116 = vector.load %arg4[%c256_43, %c0_44] : memref<1152x256xf32, #tpu.memory_space<vmem>>, vector<128x256xf32>
    %cst_45 = arith.constant dense<0.000000e+00> : vector<16x256xf32>
    %117 = tpu.matmul %115, %116, %cst_45 {dimension_numbers = #tpu.dot_dimension_numbers<[1], [0], [0], [1], [0, 0, 1, 1], [], []>} : vector<16x128xf32>, vector<128x256xf32>, vector<16x256xf32> -> vector<16x256xf32>
    %118 = arith.addf %113, %117 : vector<16x256xf32>
    %119 = vector.extract_strided_slice %104 {offsets = [0, 1, 0, 0], sizes = [1, 4, 4, 128], strides = [1, 1, 1, 1]} : vector<1x6x6x128xf32> to vector<1x4x4x128xf32>
    %120 = vector.shape_cast %119 : vector<1x4x4x128xf32> to vector<16x128xf32>
    %c384_46 = arith.constant 384 : index
    %c0_47 = arith.constant 0 : index
    %121 = vector.load %arg4[%c384_46, %c0_47] : memref<1152x256xf32, #tpu.memory_space<vmem>>, vector<128x256xf32>
    %cst_48 = arith.constant dense<0.000000e+00> : vector<16x256xf32>
    %122 = tpu.matmul %120, %121, %cst_48 {dimension_numbers = #tpu.dot_dimension_numbers<[1], [0], [0], [1], [0, 0, 1, 1], [], []>} : vector<16x128xf32>, vector<128x256xf32>, vector<16x256xf32> -> vector<16x256xf32>
    %123 = arith.addf %118, %122 : vector<16x256xf32>
    %124 = vector.extract_strided_slice %104 {offsets = [0, 1, 1, 0], sizes = [1, 4, 4, 128], strides = [1, 1, 1, 1]} : vector<1x6x6x128xf32> to vector<1x4x4x128xf32>
    %125 = vector.shape_cast %124 : vector<1x4x4x128xf32> to vector<16x128xf32>
    %c512_49 = arith.constant 512 : index
    %c0_50 = arith.constant 0 : index
    %126 = vector.load %arg4[%c512_49, %c0_50] : memref<1152x256xf32, #tpu.memory_space<vmem>>, vector<128x256xf32>
    %cst_51 = arith.constant dense<0.000000e+00> : vector<16x256xf32>
    %127 = tpu.matmul %125, %126, %cst_51 {dimension_numbers = #tpu.dot_dimension_numbers<[1], [0], [0], [1], [0, 0, 1, 1], [], []>} : vector<16x128xf32>, vector<128x256xf32>, vector<16x256xf32> -> vector<16x256xf32>
    %128 = arith.addf %123, %127 : vector<16x256xf32>
    %129 = vector.extract_strided_slice %104 {offsets = [0, 1, 2, 0], sizes = [1, 4, 4, 128], strides = [1, 1, 1, 1]} : vector<1x6x6x128xf32> to vector<1x4x4x128xf32>
    %130 = vector.shape_cast %129 : vector<1x4x4x128xf32> to vector<16x128xf32>
    %c640_52 = arith.constant 640 : index
    %c0_53 = arith.constant 0 : index
    %131 = vector.load %arg4[%c640_52, %c0_53] : memref<1152x256xf32, #tpu.memory_space<vmem>>, vector<128x256xf32>
    %cst_54 = arith.constant dense<0.000000e+00> : vector<16x256xf32>
    %132 = tpu.matmul %130, %131, %cst_54 {dimension_numbers = #tpu.dot_dimension_numbers<[1], [0], [0], [1], [0, 0, 1, 1], [], []>} : vector<16x128xf32>, vector<128x256xf32>, vector<16x256xf32> -> vector<16x256xf32>
    %133 = arith.addf %128, %132 : vector<16x256xf32>
    %134 = vector.extract_strided_slice %104 {offsets = [0, 2, 0, 0], sizes = [1, 4, 4, 128], strides = [1, 1, 1, 1]} : vector<1x6x6x128xf32> to vector<1x4x4x128xf32>
    %135 = vector.shape_cast %134 : vector<1x4x4x128xf32> to vector<16x128xf32>
    %c768_55 = arith.constant 768 : index
    %c0_56 = arith.constant 0 : index
    %136 = vector.load %arg4[%c768_55, %c0_56] : memref<1152x256xf32, #tpu.memory_space<vmem>>, vector<128x256xf32>
    %cst_57 = arith.constant dense<0.000000e+00> : vector<16x256xf32>
    %137 = tpu.matmul %135, %136, %cst_57 {dimension_numbers = #tpu.dot_dimension_numbers<[1], [0], [0], [1], [0, 0, 1, 1], [], []>} : vector<16x128xf32>, vector<128x256xf32>, vector<16x256xf32> -> vector<16x256xf32>
    %138 = arith.addf %133, %137 : vector<16x256xf32>
    %139 = vector.extract_strided_slice %104 {offsets = [0, 2, 1, 0], sizes = [1, 4, 4, 128], strides = [1, 1, 1, 1]} : vector<1x6x6x128xf32> to vector<1x4x4x128xf32>
    %140 = vector.shape_cast %139 : vector<1x4x4x128xf32> to vector<16x128xf32>
    %c896_58 = arith.constant 896 : index
    %c0_59 = arith.constant 0 : index
    %141 = vector.load %arg4[%c896_58, %c0_59] : memref<1152x256xf32, #tpu.memory_space<vmem>>, vector<128x256xf32>
    %cst_60 = arith.constant dense<0.000000e+00> : vector<16x256xf32>
    %142 = tpu.matmul %140, %141, %cst_60 {dimension_numbers = #tpu.dot_dimension_numbers<[1], [0], [0], [1], [0, 0, 1, 1], [], []>} : vector<16x128xf32>, vector<128x256xf32>, vector<16x256xf32> -> vector<16x256xf32>
    %143 = arith.addf %138, %142 : vector<16x256xf32>
    %144 = vector.extract_strided_slice %104 {offsets = [0, 2, 2, 0], sizes = [1, 4, 4, 128], strides = [1, 1, 1, 1]} : vector<1x6x6x128xf32> to vector<1x4x4x128xf32>
    %145 = vector.shape_cast %144 : vector<1x4x4x128xf32> to vector<16x128xf32>
    %c1024_61 = arith.constant 1024 : index
    %c0_62 = arith.constant 0 : index
    %146 = vector.load %arg4[%c1024_61, %c0_62] : memref<1152x256xf32, #tpu.memory_space<vmem>>, vector<128x256xf32>
    %cst_63 = arith.constant dense<0.000000e+00> : vector<16x256xf32>
    %147 = tpu.matmul %145, %146, %cst_63 {dimension_numbers = #tpu.dot_dimension_numbers<[1], [0], [0], [1], [0, 0, 1, 1], [], []>} : vector<16x128xf32>, vector<128x256xf32>, vector<16x256xf32> -> vector<16x256xf32>
    %148 = arith.addf %143, %147 : vector<16x256xf32>
    %c0_64 = arith.constant 0 : index
    %c512_65 = arith.constant 512 : index
    %149 = vector.load %arg6[%c0_64, %c512_65] : memref<1x832xf32, #tpu.memory_space<vmem>>, vector<1x256xf32>
    %150 = vector.broadcast %149 : vector<1x256xf32> to vector<16x256xf32>
    %151 = arith.addf %148, %150 : vector<16x256xf32>
    %cst_66 = arith.constant 0.000000e+00 : f32
    %152 = vector.broadcast %cst_66 : f32 to vector<16x256xf32>
    %153 = arith.maximumf %151, %152 : vector<16x256xf32>
    %154 = vector.shape_cast %153 : vector<16x256xf32> to vector<1x4x4x256xf32>
    %155 = vector.extract_strided_slice %154 {offsets = [0, 0, 0, 0], sizes = [1, 4, 4, 64], strides = [1, 1, 1, 1]} : vector<1x4x4x256xf32> to vector<1x4x4x64xf32>
    %156 = vector.extract_strided_slice %154 {offsets = [0, 0, 0, 64], sizes = [1, 4, 4, 64], strides = [1, 1, 1, 1]} : vector<1x4x4x256xf32> to vector<1x4x4x64xf32>
    %157 = vector.extract_strided_slice %154 {offsets = [0, 0, 0, 128], sizes = [1, 4, 4, 64], strides = [1, 1, 1, 1]} : vector<1x4x4x256xf32> to vector<1x4x4x64xf32>
    %158 = vector.extract_strided_slice %154 {offsets = [0, 0, 0, 192], sizes = [1, 4, 4, 64], strides = [1, 1, 1, 1]} : vector<1x4x4x256xf32> to vector<1x4x4x64xf32>
    %159 = vector.shape_cast %155 : vector<1x4x4x64xf32> to vector<1x4x1x4x64xf32>
    %160 = vector.shape_cast %157 : vector<1x4x4x64xf32> to vector<1x4x1x4x64xf32>
    %161 = tpu.concatenate %159, %160 in 2 : vector<1x4x1x4x64xf32>, vector<1x4x1x4x64xf32> -> vector<1x4x2x4x64xf32>
    %162 = vector.shape_cast %161 : vector<1x4x2x4x64xf32> to vector<1x8x4x64xf32>
    %163 = vector.shape_cast %156 : vector<1x4x4x64xf32> to vector<1x4x1x4x64xf32>
    %164 = vector.shape_cast %158 : vector<1x4x4x64xf32> to vector<1x4x1x4x64xf32>
    %165 = tpu.concatenate %163, %164 in 2 : vector<1x4x1x4x64xf32>, vector<1x4x1x4x64xf32> -> vector<1x4x2x4x64xf32>
    %166 = vector.shape_cast %165 : vector<1x4x2x4x64xf32> to vector<1x8x4x64xf32>
    %167 = vector.shape_cast %162 : vector<1x8x4x64xf32> to vector<1x8x4x1x64xf32>
    %168 = vector.shape_cast %166 : vector<1x8x4x64xf32> to vector<1x8x4x1x64xf32>
    %169 = tpu.concatenate %167, %168 in 3 : vector<1x8x4x1x64xf32>, vector<1x8x4x1x64xf32> -> vector<1x8x4x2x64xf32>
    %170 = vector.shape_cast %169 : vector<1x8x4x2x64xf32> to vector<1x8x8x64xf32>
    %cst_67 = arith.constant 0.000000e+00 : f32
    %171 = vector.broadcast %cst_67 : f32 to vector<1x8x8x8xf32>
    %cst_68 = arith.constant 0.000000e+00 : f32
    %172 = vector.broadcast %cst_68 : f32 to vector<1x8x8x56xf32>
    %173 = tpu.concatenate %171, %170, %172 in 3 : vector<1x8x8x8xf32>, vector<1x8x8x64xf32>, vector<1x8x8x56xf32> -> vector<1x8x8x128xf32>
    %cst_69 = arith.constant 0.000000e+00 : f32
    %174 = vector.broadcast %cst_69 : f32 to vector<1x1x8x128xf32>
    %175 = tpu.concatenate %174, %173, %174 in 1 : vector<1x1x8x128xf32>, vector<1x8x8x128xf32>, vector<1x1x8x128xf32> -> vector<1x10x8x128xf32>
    %cst_70 = arith.constant 0.000000e+00 : f32
    %176 = vector.broadcast %cst_70 : f32 to vector<1x10x1x128xf32>
    %177 = tpu.concatenate %176, %175, %176 in 2 : vector<1x10x1x128xf32>, vector<1x10x8x128xf32>, vector<1x10x1x128xf32> -> vector<1x10x10x128xf32>
    %178 = vector.extract_strided_slice %177 {offsets = [0, 0, 0, 0], sizes = [1, 8, 8, 128], strides = [1, 1, 1, 1]} : vector<1x10x10x128xf32> to vector<1x8x8x128xf32>
    %179 = vector.shape_cast %178 : vector<1x8x8x128xf32> to vector<64x128xf32>
    %c0_71 = arith.constant 0 : index
    %c0_72 = arith.constant 0 : index
    %180 = vector.load %arg5[%c0_71, %c0_72] : memref<1152x64xf32, #tpu.memory_space<vmem>>, vector<128x64xf32>
    %cst_73 = arith.constant dense<0.000000e+00> : vector<64x64xf32>
    %181 = tpu.matmul %179, %180, %cst_73 {dimension_numbers = #tpu.dot_dimension_numbers<[1], [0], [0], [1], [0, 0, 1, 1], [], []>} : vector<64x128xf32>, vector<128x64xf32>, vector<64x64xf32> -> vector<64x64xf32>
    %182 = vector.extract_strided_slice %177 {offsets = [0, 0, 1, 0], sizes = [1, 8, 8, 128], strides = [1, 1, 1, 1]} : vector<1x10x10x128xf32> to vector<1x8x8x128xf32>
    %183 = vector.shape_cast %182 : vector<1x8x8x128xf32> to vector<64x128xf32>
    %c128_74 = arith.constant 128 : index
    %c0_75 = arith.constant 0 : index
    %184 = vector.load %arg5[%c128_74, %c0_75] : memref<1152x64xf32, #tpu.memory_space<vmem>>, vector<128x64xf32>
    %cst_76 = arith.constant dense<0.000000e+00> : vector<64x64xf32>
    %185 = tpu.matmul %183, %184, %cst_76 {dimension_numbers = #tpu.dot_dimension_numbers<[1], [0], [0], [1], [0, 0, 1, 1], [], []>} : vector<64x128xf32>, vector<128x64xf32>, vector<64x64xf32> -> vector<64x64xf32>
    %186 = arith.addf %181, %185 : vector<64x64xf32>
    %187 = vector.extract_strided_slice %177 {offsets = [0, 0, 2, 0], sizes = [1, 8, 8, 128], strides = [1, 1, 1, 1]} : vector<1x10x10x128xf32> to vector<1x8x8x128xf32>
    %188 = vector.shape_cast %187 : vector<1x8x8x128xf32> to vector<64x128xf32>
    %c256_77 = arith.constant 256 : index
    %c0_78 = arith.constant 0 : index
    %189 = vector.load %arg5[%c256_77, %c0_78] : memref<1152x64xf32, #tpu.memory_space<vmem>>, vector<128x64xf32>
    %cst_79 = arith.constant dense<0.000000e+00> : vector<64x64xf32>
    %190 = tpu.matmul %188, %189, %cst_79 {dimension_numbers = #tpu.dot_dimension_numbers<[1], [0], [0], [1], [0, 0, 1, 1], [], []>} : vector<64x128xf32>, vector<128x64xf32>, vector<64x64xf32> -> vector<64x64xf32>
    %191 = arith.addf %186, %190 : vector<64x64xf32>
    %192 = vector.extract_strided_slice %177 {offsets = [0, 1, 0, 0], sizes = [1, 8, 8, 128], strides = [1, 1, 1, 1]} : vector<1x10x10x128xf32> to vector<1x8x8x128xf32>
    %193 = vector.shape_cast %192 : vector<1x8x8x128xf32> to vector<64x128xf32>
    %c384_80 = arith.constant 384 : index
    %c0_81 = arith.constant 0 : index
    %194 = vector.load %arg5[%c384_80, %c0_81] : memref<1152x64xf32, #tpu.memory_space<vmem>>, vector<128x64xf32>
    %cst_82 = arith.constant dense<0.000000e+00> : vector<64x64xf32>
    %195 = tpu.matmul %193, %194, %cst_82 {dimension_numbers = #tpu.dot_dimension_numbers<[1], [0], [0], [1], [0, 0, 1, 1], [], []>} : vector<64x128xf32>, vector<128x64xf32>, vector<64x64xf32> -> vector<64x64xf32>
    %196 = arith.addf %191, %195 : vector<64x64xf32>
    %197 = vector.extract_strided_slice %177 {offsets = [0, 1, 1, 0], sizes = [1, 8, 8, 128], strides = [1, 1, 1, 1]} : vector<1x10x10x128xf32> to vector<1x8x8x128xf32>
    %198 = vector.shape_cast %197 : vector<1x8x8x128xf32> to vector<64x128xf32>
    %c512_83 = arith.constant 512 : index
    %c0_84 = arith.constant 0 : index
    %199 = vector.load %arg5[%c512_83, %c0_84] : memref<1152x64xf32, #tpu.memory_space<vmem>>, vector<128x64xf32>
    %cst_85 = arith.constant dense<0.000000e+00> : vector<64x64xf32>
    %200 = tpu.matmul %198, %199, %cst_85 {dimension_numbers = #tpu.dot_dimension_numbers<[1], [0], [0], [1], [0, 0, 1, 1], [], []>} : vector<64x128xf32>, vector<128x64xf32>, vector<64x64xf32> -> vector<64x64xf32>
    %201 = arith.addf %196, %200 : vector<64x64xf32>
    %202 = vector.extract_strided_slice %177 {offsets = [0, 1, 2, 0], sizes = [1, 8, 8, 128], strides = [1, 1, 1, 1]} : vector<1x10x10x128xf32> to vector<1x8x8x128xf32>
    %203 = vector.shape_cast %202 : vector<1x8x8x128xf32> to vector<64x128xf32>
    %c640_86 = arith.constant 640 : index
    %c0_87 = arith.constant 0 : index
    %204 = vector.load %arg5[%c640_86, %c0_87] : memref<1152x64xf32, #tpu.memory_space<vmem>>, vector<128x64xf32>
    %cst_88 = arith.constant dense<0.000000e+00> : vector<64x64xf32>
    %205 = tpu.matmul %203, %204, %cst_88 {dimension_numbers = #tpu.dot_dimension_numbers<[1], [0], [0], [1], [0, 0, 1, 1], [], []>} : vector<64x128xf32>, vector<128x64xf32>, vector<64x64xf32> -> vector<64x64xf32>
    %206 = arith.addf %201, %205 : vector<64x64xf32>
    %207 = vector.extract_strided_slice %177 {offsets = [0, 2, 0, 0], sizes = [1, 8, 8, 128], strides = [1, 1, 1, 1]} : vector<1x10x10x128xf32> to vector<1x8x8x128xf32>
    %208 = vector.shape_cast %207 : vector<1x8x8x128xf32> to vector<64x128xf32>
    %c768_89 = arith.constant 768 : index
    %c0_90 = arith.constant 0 : index
    %209 = vector.load %arg5[%c768_89, %c0_90] : memref<1152x64xf32, #tpu.memory_space<vmem>>, vector<128x64xf32>
    %cst_91 = arith.constant dense<0.000000e+00> : vector<64x64xf32>
    %210 = tpu.matmul %208, %209, %cst_91 {dimension_numbers = #tpu.dot_dimension_numbers<[1], [0], [0], [1], [0, 0, 1, 1], [], []>} : vector<64x128xf32>, vector<128x64xf32>, vector<64x64xf32> -> vector<64x64xf32>
    %211 = arith.addf %206, %210 : vector<64x64xf32>
    %212 = vector.extract_strided_slice %177 {offsets = [0, 2, 1, 0], sizes = [1, 8, 8, 128], strides = [1, 1, 1, 1]} : vector<1x10x10x128xf32> to vector<1x8x8x128xf32>
    %213 = vector.shape_cast %212 : vector<1x8x8x128xf32> to vector<64x128xf32>
    %c896_92 = arith.constant 896 : index
    %c0_93 = arith.constant 0 : index
    %214 = vector.load %arg5[%c896_92, %c0_93] : memref<1152x64xf32, #tpu.memory_space<vmem>>, vector<128x64xf32>
    %cst_94 = arith.constant dense<0.000000e+00> : vector<64x64xf32>
    %215 = tpu.matmul %213, %214, %cst_94 {dimension_numbers = #tpu.dot_dimension_numbers<[1], [0], [0], [1], [0, 0, 1, 1], [], []>} : vector<64x128xf32>, vector<128x64xf32>, vector<64x64xf32> -> vector<64x64xf32>
    %216 = arith.addf %211, %215 : vector<64x64xf32>
    %217 = vector.extract_strided_slice %177 {offsets = [0, 2, 2, 0], sizes = [1, 8, 8, 128], strides = [1, 1, 1, 1]} : vector<1x10x10x128xf32> to vector<1x8x8x128xf32>
    %218 = vector.shape_cast %217 : vector<1x8x8x128xf32> to vector<64x128xf32>
    %c1024_95 = arith.constant 1024 : index
    %c0_96 = arith.constant 0 : index
    %219 = vector.load %arg5[%c1024_95, %c0_96] : memref<1152x64xf32, #tpu.memory_space<vmem>>, vector<128x64xf32>
    %cst_97 = arith.constant dense<0.000000e+00> : vector<64x64xf32>
    %220 = tpu.matmul %218, %219, %cst_97 {dimension_numbers = #tpu.dot_dimension_numbers<[1], [0], [0], [1], [0, 0, 1, 1], [], []>} : vector<64x128xf32>, vector<128x64xf32>, vector<64x64xf32> -> vector<64x64xf32>
    %221 = arith.addf %216, %220 : vector<64x64xf32>
    %c0_98 = arith.constant 0 : index
    %c768_99 = arith.constant 768 : index
    %222 = vector.load %arg6[%c0_98, %c768_99] : memref<1x832xf32, #tpu.memory_space<vmem>>, vector<1x64xf32>
    %223 = vector.broadcast %222 : vector<1x64xf32> to vector<64x64xf32>
    %224 = arith.addf %221, %223 : vector<64x64xf32>
    %cst_100 = arith.constant 0.000000e+00 : f32
    %225 = vector.broadcast %cst_100 : f32 to vector<64x64xf32>
    %226 = arith.maximumf %224, %225 : vector<64x64xf32>
    %227 = arith.negf %226 : vector<64x64xf32>
    %228 = math.exp %227 : vector<64x64xf32>
    %cst_101 = arith.constant 1.000000e+00 : f32
    %229 = vector.broadcast %cst_101 : f32 to vector<64x64xf32>
    %230 = arith.addf %229, %228 : vector<64x64xf32>
    %231 = arith.divf %229, %230 : vector<64x64xf32>
    %232 = vector.shape_cast %231 : vector<64x64xf32> to vector<1x64x64xf32>
    %c0_102 = arith.constant 0 : index
    %c0_103 = arith.constant 0 : index
    %c0_104 = arith.constant 0 : index
    %233 = vector.load %arg7[%c0_102, %c0_103, %c0_104] : memref<1x64x64xf32, #tpu.memory_space<vmem>>, vector<1x64x64xf32>
    tpu.vector_store %arg7[%c0_102, %c0_103, %c0_104], %232 {strides = array<i32>} : memref<1x64x64xf32, #tpu.memory_space<vmem>>, vector<1x64x64xf32>,
    return
  }
  func.func @transform_0(%arg0: i32) -> (i32, i32, i32) {
    %c0_i32 = arith.constant 0 : i32
    %c0_i32_0 = arith.constant 0 : i32
    %c0_i32_1 = arith.constant 0 : i32
    return %arg0, %c0_i32, %c0_i32_0 : i32, i32, i32
  }
  func.func @transform_1(%arg0: i32) -> (i32, i32) {
    %c0_i32 = arith.constant 0 : i32
    %c0_i32_0 = arith.constant 0 : i32
    %c0_i32_1 = arith.constant 0 : i32
    return %c0_i32, %c0_i32_0 : i32, i32
  }
  func.func @transform_2(%arg0: i32) -> (i32, i32) {
    %c0_i32 = arith.constant 0 : i32
    %c0_i32_0 = arith.constant 0 : i32
    %c0_i32_1 = arith.constant 0 : i32
    return %c0_i32, %c0_i32_0 : i32, i32
  }
  func.func @transform_3(%arg0: i32) -> (i32, i32) {
    %c0_i32 = arith.constant 0 : i32
    %c0_i32_0 = arith.constant 0 : i32
    %c0_i32_1 = arith.constant 0 : i32
    return %c0_i32, %c0_i32_0 : i32, i32
  }
  func.func @transform_4(%arg0: i32) -> (i32, i32) {
    %c0_i32 = arith.constant 0 : i32
    %c0_i32_0 = arith.constant 0 : i32
    %c0_i32_1 = arith.constant 0 : i32
    return %c0_i32, %c0_i32_0 : i32, i32
  }
  func.func @transform_5(%arg0: i32) -> (i32, i32) {
    %c0_i32 = arith.constant 0 : i32
    %c0_i32_0 = arith.constant 0 : i32
    %c0_i32_1 = arith.constant 0 : i32
    return %c0_i32, %c0_i32_0 : i32, i32
  }
  func.func @transform_6(%arg0: i32) -> (i32, i32, i32) {
    %c0_i32 = arith.constant 0 : i32
    %c0_i32_0 = arith.constant 0 : i32
    %c0_i32_1 = arith.constant 0 : i32
    return %arg0, %c0_i32, %c0_i32_0 : i32, i32, i32
  }
}

</mosaic_0001>

<bundles_post_ra>
// kernel: forward.1
= control target key start
LH: loop header
LB: loop body
LE: loop exit
PB: predicated region body
PF: predicated region fallthrough
CT: control target
= control target key end

     0   :  { %11 = vsyncpa [#allocation3], 0  ;;  %s8844_s0 = inlined_call_operand.hbm [shape: f32[2,1,16], index: 0, kind: input, shape index: {}]   ;;  %s8845_s1 = inlined_call_operand.hbm [shape: f32[16,256], index: 1, kind: input, shape index: {}]   ;;  %s8846_s2 = inlined_call_operand.hbm [shape: f32[1152,256], index: 2, kind: input, shape index: {}]   ;;  %s8847_s3 = inlined_call_operand.hbm [shape: f32[1152,256], index: 3, kind: input, shape index: {}]   ;;  %s8848_s4 = inlined_call_operand.vmem [shape: f32[1152,64], index: 4, kind: input, shape index: {}]   ;;  %s8849_s5 = inlined_call_operand.hbm [shape: f32[1,832], index: 5, kind: input, shape index: {}]   ;;  %s8850_s6 = inlined_call_operand.vmem [shape: f32[2,64,64], index: 6, kind: output, shape index: {}]  }
   0x1   :  { %13 = vsyncpa [#allocation3 + $0x1], 0 }
   0x2   :  { %14 = vsyncpa [#allocation5], 0 }
   0x3   :  { %15 = vsyncpa [#allocation8], 0  ;;  %s7200_s21 = smov 0   ;;  %s7202_s22 = smov 0  }
   0x4   :  { %s7204_s23 = smov 0   ;;  %s7206_s24 = smov 0  }
   0x5 LB: > { %s7151_s25 = smov [#allocation4]   ;;  %s7221_s27 = sadd.s32 4294967295, %s7149_s24   ;;  %s7149_s24 = sphi %s7206_s24, %s8875_s24   ;;  %s7145_s23 = sphi %s7204_s23, %s8874_s23   ;;  %s7141_s22 = sphi %s7202_s22, %s8873_s22   ;;  %s7137_s21 = sphi %s7200_s21, %s8872_s21  }
   0x6   : > { %s195_s26 = sshll.u32 %s7151_s25, 4  ;;  %p5161_p0 = scmp.ge.s32.totalorder %s7149_s24, 1  ;;  %s7226_s26 = int_to_ptr.vmem [resolvable:$true] %s195_s26 }
   0x7   : > { %p8851_p1 = scmp.eq.s32.totalorder %s7221_s27, 0  ;;  %p183_p2 = scmp.lt.s32.totalorder %s7149_s24, 3 }
   0x8   : > { %s7152_s29 = smov [#allocation7]   ;;  %s7153_s8 = smov [#allocation6]  }
   0x9   : > { %p7228_p3 = pnand %p5161_p0, %p183_p2  ;;  %s221_s30 = sshll.u32 %s7152_s29, 4  ;;  %s7240_s30 = int_to_ptr.vmem [resolvable:$true] %s221_s30 }
   0xa   : > { %s208_s9 = sshll.u32 %s7153_s8, 4  ;;  %s6965_s12 = scalar_lea.hbm %s8845_s1, 512  ;;  %s7242_s9 = int_to_ptr.vmem [resolvable:$true] %s208_s9 }
   0xb   : > { %s8853_s28 = scalar_select %p7228_p3, 1, 0 }
   0xc   : > { %p6862_p4 = pneg %p7228_p3  ;;  %p6966_p6 = scmp.ne.s32.totalorder %s8845_s1, %s6965_s12 }
   0xd   : > { %p6972_p10 = scmp.lt.u32.totalorder %s6965_s12, %s8845_s1 }
   0xe   : > { %p7236_p5 = pnand %p6862_p4, %p8851_p1 }
  0x10   : > { %p7252_p7 = pneg %p7236_p5 }
  0x12   : > { %p6968_p8 = pnand %p7252_p7, %p6966_p6 }
  0x14   : > { %p6969_p9 = pneg %p6968_p8 }
  0x16   : > { %p6974_p11 = pnand %p6972_p10, %p6969_p9 }
  0x18   : > { %6977 = shalt.err (!%p6974_p11)
}
  0x19   : > { %s6978_s18 = scalar_lea.vmem %s7226_s26, 512  ;;  %p6986_p2 = scmp.lt.s32.totalorder %s7226_s26, %s7226_s26 }
  0x1a   : > { %p6979_p12 = scmp.ne.s32.totalorder %s7226_s26, %s6978_s18  ;;  %p6987_p4 = scmp.lt.s32.totalorder %s6978_s18, %s6978_s18 }
  0x1c   : > { %p6981_p13 = pnand %p6979_p12, %p7252_p7  ;;  %p6988_p6 = por %p6987_p4, %p6986_p2 }
  0x1e   : > { %p6982_p0 = pneg %p6981_p13 }
  0x20   : > { %p6989_p8 = pnand %p6988_p6, %p6982_p0 }
  0x22   : > { %6992 = shalt.err (!%p6989_p8)
}
  0x23   : > { %s7154_s19 = smov 256   ;;  %s7155_s20 = smov 16  }
  0x24   : > { %6865 = dma.hbm_to_vmem [thread:$0]  (!%p7236_p5), %s8845_s1, 512, %s7226_s26, [#allocation5], %s7154_s19, %s7154_s19, %s7155_s20  }
  0x25   : > { %s6993_s11 = scalar_lea.hbm %s8847_s3, 36864 }
  0x26   : > { %p6994_p9 = scmp.ne.s32.totalorder %s8847_s3, %s6993_s11  ;;  %p7000_p12 = scmp.lt.u32.totalorder %s6993_s11, %s8847_s3 }
  0x28   : > { %p6996_p10 = pnand %p6994_p9, %p7252_p7 }
  0x2a   : > { %p6997_p11 = pneg %p6996_p10 }
  0x2c   : > { %p7002_p13 = pnand %p7000_p12, %p6997_p11 }
  0x2e   : > { %7005 = shalt.err (!%p7002_p13)
}
  0x2f   : > { %s7006_s26 = scalar_lea.vmem %s7240_s30, 36864  ;;  %p7014_p6 = scmp.lt.s32.totalorder %s7240_s30, %s7240_s30 }
  0x30   : > { %p7007_p0 = scmp.ne.s32.totalorder %s7240_s30, %s7006_s26  ;;  %p7015_p8 = scmp.lt.s32.totalorder %s7006_s26, %s7006_s26 }
  0x32   : > { %p7009_p2 = pnand %p7007_p0, %p7252_p7  ;;  %p7016_p9 = por %p7015_p8, %p7014_p6 }
  0x34   : > { %p7010_p4 = pneg %p7009_p2 }
  0x36   : > { %p7017_p10 = pnand %p7016_p9, %p7010_p4 }
  0x38   : > { %7020 = shalt.err (!%p7017_p10)
}
  0x39   : > { %6871 = dma.hbm_to_vmem [thread:$0]  (!%p7236_p5), %s8847_s3, 36864, %s7240_s30, [#allocation8], %s7154_s19, %s7154_s19, %s7155_s20  }
  0x3a   : > { %s7021_s8 = scalar_lea.hbm %s8846_s2, 36864 }
  0x3b   : > { %p7022_p11 = scmp.ne.s32.totalorder %s8846_s2, %s7021_s8  ;;  %p7028_p0 = scmp.lt.u32.totalorder %s7021_s8, %s8846_s2 }
  0x3d   : > { %p7024_p12 = pnand %p7022_p11, %p7252_p7 }
  0x3f   : > { %p7025_p13 = pneg %p7024_p12 }
  0x41   : > { %p7030_p2 = pnand %p7028_p0, %p7025_p13 }
  0x43   : > { %7033 = shalt.err (!%p7030_p2)
}
  0x44   : > { %s7034_s30 = scalar_lea.vmem %s7242_s9, 36864  ;;  %p7042_p9 = scmp.lt.s32.totalorder %s7242_s9, %s7242_s9 }
  0x45   : > { %p7035_p4 = scmp.ne.s32.totalorder %s7242_s9, %s7034_s30  ;;  %p7043_p10 = scmp.lt.s32.totalorder %s7034_s30, %s7034_s30 }
  0x47   : > { %p7037_p6 = pnand %p7035_p4, %p7252_p7  ;;  %p7044_p11 = por %p7043_p10, %p7042_p9 }
  0x49   : > { %p7038_p8 = pneg %p7037_p6 }
  0x4b   : > { %p7045_p12 = pnand %p7044_p11, %p7038_p8 }
  0x4d   : > { %7048 = shalt.err (!%p7045_p12)
}
  0x4e   : > { %6868 = dma.hbm_to_vmem [thread:$0]  (!%p7236_p5), %s8846_s2, 36864, %s7242_s9, [#allocation5], %s7154_s19, %s7154_s19, %s7155_s20  }
  0x4f   : > { %s7156_s26 = smov [#allocation9]   ;;  %s7049_s29 = scalar_lea.hbm %s8849_s5, 112 }
  0x50   : > { %s238_s17 = sshll.u32 %s7156_s26, 4  ;;  %p7050_p13 = scmp.ne.s32.totalorder %s8849_s5, %s7049_s29  ;;  %s239_s17 = int_to_ptr.vmem [resolvable:$true] %s238_s17 }
  0x51   : > { %p7056_p4 = scmp.lt.u32.totalorder %s7049_s29, %s8849_s5 }
  0x52   : > { %p7052_p0 = pnand %p7050_p13, %p7252_p7 }
  0x54   : > { %p7053_p2 = pneg %p7052_p0 }
  0x56   : > { %p7058_p6 = pnand %p7056_p4, %p7053_p2 }
  0x58   : > { %7061 = shalt.err (!%p7058_p6)
}
  0x59   : > { %s7062_s9 = scalar_lea.vmem %s239_s17, 112  ;;  %s7069_s19 = scalar_lea.vmem %s239_s17, 128 }
  0x5a   : > { %p7063_p8 = scmp.ne.s32.totalorder %s239_s17, %s7062_s9  ;;  %p7070_p11 = scmp.lt.s32.totalorder %s239_s17, %s239_s17 }
  0x5b   : > { %p7071_p12 = scmp.lt.s32.totalorder %s7069_s19, %s7062_s9 }
  0x5c   : > { %p7065_p9 = pnand %p7063_p8, %p7252_p7 }
  0x5d   : > { %p7072_p1 = por %p7071_p12, %p7070_p11 }
  0x5e   : > { %p7066_p10 = pneg %p7065_p9 }
  0x60   : > { %p7073_p3 = pnand %p7072_p1, %p7066_p10 }
  0x62   : > { %7076 = shalt.err (!%p7073_p3)
}
  0x63   : > { %6874 = dma.hbm_to_vmem [thread:$0]  (!%p7236_p5), %s8849_s5, 112, %s239_s17, [#allocation8]  }
  0x64   : > { %s7347_s15 = sadd.s32 1, %s7149_s24   ;;  %s28_s7 = sadd.s32 1, %s7145_s23 }
  0x65   : > { %s25_s30 = ssub.s32 %s7149_s24, %s7347_s15  ;;  %p35_p1 = scmp.ne.s32.totalorder %s7145_s23, %s7141_s22 }
  0x66   : > { %p26_p3 = scmp.eq.s32.totalorder %s25_s30, 0  ;;  %p36_p7 = scmp.eq.s32.totalorder %s7149_s24, 0 }
  0x67   : > { %p41_p13 = scmp.ne.s32.totalorder %s7141_s22, %s7137_s21  ;;  %p6883_p0 = scmp.lt.s32.totalorder %s7149_s24, 2 }
  0x68   : > { %s7359_s14 = scalar_select %p26_p3, %s7145_s23, %s28_s7  }
  0x69   : > { %p37_p2 = por %p36_p7, %p35_p1  ;;  %p8856_p4 = scmp.eq.s32.totalorder %s7221_s27, 0 }
  0x6a   : > { %s249_s26 = sand.u32 1, %s7145_s23   ;;  %s5167_s17 = sshll.u32 %s7149_s24, 4 }
  0x6b   : > { %p7363_p6 = por %p8856_p4, %p41_p13  ;;  %s7372_s29 = scalar_lea.hbm %s8844_s0, %s5167_s17 }
  0x6c   : > { %s252_s21 = scalar_lea.vmem [#allocation2], %s249_s26  ;;  %p7376_p5 = pnand %p6883_p0, %p37_p2 }
  0x6d   : > { %s259_s8 = sshll.u32 %s252_s21, 4  ;;  %s250_s24 = scalar_lea.sflag [#allocation3], %s249_s26  ;;  %s7374_s8 = int_to_ptr.vmem [resolvable:$true] %s259_s8 }
  0x6e   : > { %s7077_s11 = scalar_lea.hbm %s7372_s29, 16  ;;  %p7079_p9 = pneg %p7376_p5 }
  0x6f   : > { %p7078_p8 = scmp.ne.s32.totalorder %s7372_s29, %s7077_s11  ;;  %s7082_s19 = scalar_lea.hbm %s8844_s0, 32 }
  0x70   : > { %p7083_p12 = scmp.lt.u32.totalorder %s7372_s29, %s8844_s0  ;;  %p7084_p1 = scmp.lt.u32.totalorder %s7082_s19, %s7077_s11 }
  0x71   : > { %p7080_p10 = pnand %p7079_p9, %p7078_p8  ;;  %p7086_p7 = scmp.lt.u32.totalorder %s7077_s11, %s7372_s29 }
  0x72   : > { %p7085_p3 = por %p7084_p1, %p7083_p12 }
  0x73   : > { %p7081_p11 = pneg %p7080_p10 }
  0x74   : > { %p7087_p13 = por %p7086_p7, %p7085_p3 }
  0x76   : > { %p7088_p0 = pnand %p7087_p13, %p7081_p11 }
  0x78   : > { %7091 = shalt.err (!%p7088_p0)
}
  0x79   : > { %s7092_s7 = scalar_lea.vmem %s7374_s8, 16  ;;  %s7157_s30 = smov [#allocation2]  }
  0x7a   : > { %p7093_p2 = scmp.ne.s32.totalorder %s7374_s8, %s7092_s7  ;;  %s7097_s26 = sshll.u32 %s7157_s30, 4  ;;  %s7098_s26 = int_to_ptr.vmem [resolvable:$false] %s7097_s26 }
  0x7b   : > { %s7099_s17 = scalar_lea.vmem %s7098_s26, 32  ;;  %p7100_p10 = scmp.lt.s32.totalorder %s7374_s8, %s7098_s26 }
  0x7c   : > { %p7095_p4 = pnand %p7093_p2, %p7079_p9  ;;  %p7101_p12 = scmp.lt.s32.totalorder %s7099_s17, %s7092_s7 }
  0x7e   : > { %p7096_p8 = pneg %p7095_p4  ;;  %p7102_p1 = por %p7101_p12, %p7100_p10 }
  0x80   : > { %p7103_p3 = pnand %p7102_p1, %p7096_p8 }
  0x82   : > { %7106 = shalt.err (!%p7103_p3)
}
  0x83   : > { %6878 = dma.hbm_to_vmem [thread:$0]  (!%p7376_p5), %s7372_s29, 16, %s7374_s8, %s250_s24  }
  0x84   : > { %p8859_p11 = scmp.ne.s32.totalorder %s8853_s28, 0 }
  0x85   : > { %s270_s18 = sand.u32 (!%p8859_p11), 1, %s7141_s22  }
  0x86   : > { %268 = sbr.rel (%p8859_p11) target bundleno = 2959 (0xb8f), region = 44  ;;  %s271_s25 = scalar_lea.sflag (!%p8859_p11), [#allocation3], %s270_s18 }
  0x87   : > { %s273_s21 = scalar_lea.vmem (!%p8859_p11), [#allocation2], %s270_s18 }
  0x8d   : > { %7124 = dma.done.wait (%p7363_p6), %s271_s25, 16  }
  0x8e   : > { %7126 = vsyncadd (%p7363_p6), %s271_s25, 4294967280  ;;  %p8860_p9 = scmp.eq.s32.totalorder %s7221_s27, 0 }
  0x90   : > { %7128 = dma.done.wait (%p8860_p9), [#allocation5], 37376   ;;  %p8861_p7 = pmov %p8860_p9 }
  0x92   : > { %7130 = vsyncadd (%p8861_p7), [#allocation5], 4294929920  ;;  %p8862_p5 = pmov %p8861_p7 }
  0x94   : > { %7132 = dma.done.wait (%p8862_p5), [#allocation8], 36976   ;;  %p8863_p13 = pmov %p8862_p5 }
  0x95   : > { %v7158_v0 = vmov 0.0   ;;  %v324_v1 = vld [vmem:[#allocation4 + $0x8] sm:$0xff]  ;;  %v326_v2 = vld [vmem:[#allocation4 + $0x18] sm:$0xff]  ;;  %v323_v3 = vld [vmem:[#allocation4] sm:$0xff]  ;;  %vm339_vm0 = vcmask 130048   ;;  %v329_v8 = vlaneseq  ;;  %s7159_s28 = smov 64  }
  0x96   : > { %7134 = vsyncadd (%p8863_p13), [#allocation8], 4294930320  ;;  %407 = vmatprep.mubr.f32.mxu1 %v7158_v0  ;;  %628 = vmatprep.mubr.f32.mxu0 %v7158_v0  ;;  %v5864_v4 = vpack.c.bf16 %v326_v2, %v324_v1  ;;  %v325_v5 = vld [vmem:[#allocation4 + $0x10] sm:$0xff]  ;;  %v322_v7 = vld [vmem:[%s273_s21] sm:$0x1]  ;;  %vm426_vm1 = vcmask 1040384  }
  0x97   : > { %v5866_v6 = vpack.c.bf16 %v325_v5, %v323_v3  ;;  %v7424_v9 = vshrl.u32 %v329_v8, 7  ;;  %v327_v11 = vld [vmem:[#allocation9] sm:$0x3]  ;;  %v1071_v15 = vld [vmem:[#allocation6 + $0x508] sm:$0xff]  ;;  %v1073_v16 = vld [vmem:[#allocation6 + $0x518] sm:$0xff]  ;;  %s7160_s16 = smov 32  }
  0x98   : > { %5865 = vmatprep.subr.bf16.mxu1 %v5864_v4  ;;  %v524_v17 = vld [vmem:[#allocation6 + $0x108] sm:$0xff]  ;;  %v6028_v19 = vpack.c.bf16 %v1073_v16, %v1071_v15  ;;  %v526_v20 = vld [vmem:[#allocation6 + $0x118] sm:$0xff]  ;;  %v1070_v21 = vld [vmem:[#allocation6 + $0x500] sm:$0xff]  ;;  %vm455_vm2 = vcmask 1042432   ;;  %vm437_vm3 = vcmask 261120   ;;  %vm509_vm4 = vcmask 1042434  }
  0x99   : > { %5867 = vmatpush1.bf16.msra.mxu1 %v5866_v6  ;;  %v7427_v10 = vsub.s32 0, %v7424_v9  ;;  %v7430_v12 = vsub.s32 1, %v7424_v9  ;;  %v1072_v22 = vld [vmem:[#allocation6 + $0x510] sm:$0xff]  ;;  %v5868_v25 = vpack.c.bf16 %v526_v20, %v524_v17  ;;  %v523_v27 = vld [vmem:[#allocation6 + $0x100] sm:$0xff]  ;;  %v1075_v29 = vld [vmem:[#allocation6 + $0x528] sm:$0xff]  ;;  %vm440_vm5 = vcmask 785408  }
  0x9a   : > { %v6030_v26 = vpack.c.bf16 %v1072_v22, %v1070_v21  ;;  %v525_v28 = vld [vmem:[#allocation6 + $0x110] sm:$0xff]  ;;  %6029 = vmatprep.subr.bf16.mxu1 %v6028_v19  ;;  %v1077_v32 = vld [vmem:[#allocation6 + $0x538] sm:$0xff]  ;;  %v528_v33 = vld [vmem:[#allocation6 + $0x128] sm:$0xff]  ;;  %vm511_vm7 = vcmask 1044484   ;;  %vm513_vm9 = vcmask 1046534   ;;  %s7163_s29 = smov 16  }
  0x9b   : > { %v332_v13 = vrot.slane %v327_v11, %v7427_v10  ;;  %v336_v14 = vrot.slane %v327_v11, %v7430_v12  ;;  %v5870_v31 = vpack.c.bf16 %v525_v28, %v523_v27  ;;  %v530_v34 = vld [vmem:[#allocation6 + $0x138] sm:$0xff]  ;;  %5869 = vmatprep.subr.bf16.mxu0 %v5868_v25  ;;  %v6032_v36 = vpack.c.bf16 %v1077_v32, %v1075_v29  ;;  %v1074_v38 = vld [vmem:[#allocation6 + $0x520] sm:$0xff]  ;;  %v1076_v39 = vld [vmem:[#allocation6 + $0x530] sm:$0xff]  ;;  %s7164_s8 = smov 8   ;;  %p317_p6 = scmp.lt.s32.totalorder %s7221_s27, 1 }
  0x9c   : > { %5175 = vmatmul.mubr.msk.f32.vlgmr.msra.gmra.mrb[0].mxu1 %vm339_vm0, %v322_v7  ;;  %v5872_v37 = vpack.c.bf16 %v530_v34, %v528_v33  ;;  %v527_v40 = vld [vmem:[#allocation6 + $0x120] sm:$0xff]  ;;  %v6034_v41 = vpack.c.bf16 %v1076_v39, %v1074_v38  ;;  %v529_v42 = vld [vmem:[#allocation6 + $0x130] sm:$0xff]  ;;  %v1079_v43 = vld [vmem:[#allocation6 + $0x548] sm:$0xff]  ;;  %vm1762_vm11 = vcmask 1044480   ;;  %vm1741_vm12 = vcmask 654336  }
  0x9d   : > { %1175 = vmatprep.mubr.f32.mxu1 %v7158_v0  ;;  %6031 = vmatpush1.bf16.msra.mxu1 %v6030_v26  ;;  %v1081_v44 = vld [vmem:[#allocation6 + $0x558] sm:$0xff]  ;;  %v5874_v47 = vpack.c.bf16 %v529_v42, %v527_v40  ;;  %v532_v49 = vld [vmem:[#allocation6 + $0x148] sm:$0xff]  ;;  %v1078_v51 = vld [vmem:[#allocation6 + $0x540] sm:$0xff]  ;;  %vm1808_vm13 = vcmask 1046532   ;;  %vm2020_vm15 = vcmask 1041408   ;;  %s8877_s27 = smov (!%p317_p6, %s7221_s27), 1 }
  0x9e   : > { %5871 = vmatpush1.bf16.msra.mxu0 %v5870_v31  ;;  %6033 = vmatprep.subr.bf16.mxu1 %v6032_v36  ;;  %v6036_v48 = vpack.c.bf16 %v1081_v44, %v1079_v43  ;;  %v534_v50 = vld [vmem:[#allocation6 + $0x158] sm:$0xff]  ;;  %v1080_v53 = vld [vmem:[#allocation6 + $0x550] sm:$0xff]  ;;  %v531_v54 = vld [vmem:[#allocation6 + $0x140] sm:$0xff]  ;;  %s5251_s13 = sshll.u32 %s8877_s27, 6 }
  0x9f   : > { %5873 = vmatprep.subr.bf16.mxu0 %v5872_v37  ;;  %v5876_v52 = vpack.c.bf16 %v534_v50, %v532_v49  ;;  %v533_v55 = vld [vmem:[#allocation6 + $0x150] sm:$0xff]  ;;  %v6038_v56 = vpack.c.bf16 %v1080_v53, %v1078_v51  ;;  %v1083_v57 = vld [vmem:[#allocation6 + $0x568] sm:$0xff]  ;;  %v1085_v58 = vld [vmem:[#allocation6 + $0x578] sm:$0xff]  ;;  %s321_s30 = scalar_lea.vmem %s8850_s6, %s5251_s13 }
  0xa0   : > { %v536_v59 = vld [vmem:[#allocation6 + $0x168] sm:$0xff]  ;;  %v5878_v60 = vpack.c.bf16 %v533_v55, %v531_v54  ;;  %v6040_v61 = vpack.c.bf16 %v1085_v58, %v1083_v57  ;;  %v538_v62 = vld [vmem:[#allocation6 + $0x178] sm:$0xff]  ;;  %v1082_v63 = vld [vmem:[#allocation6 + $0x560] sm:$0xff] }
  0xa1   : > { %6035 = vmatpush1.bf16.msra.mxu1 %v6034_v41  ;;  %v1084_v1 = vld [vmem:[#allocation6 + $0x570] sm:$0xff]  ;;  %v5880_v3 = vpack.c.bf16 %v538_v62, %v536_v59  ;;  %v535_v4 = vld [vmem:[#allocation6 + $0x160] sm:$0xff]  ;;  %v1087_v6 = vld [vmem:[#allocation6 + $0x588] sm:$0xff] }
  0xa2   : > { %5875 = vmatpush1.bf16.msra.mxu0 %v5874_v47  ;;  %6037 = vmatprep.subr.bf16.mxu1 %v6036_v48  ;;  %v537_v5 = vld [vmem:[#allocation6 + $0x170] sm:$0xff]  ;;  %v1089_v7 = vld [vmem:[#allocation6 + $0x598] sm:$0xff]  ;;  %v6042_v8 = vpack.c.bf16 %v1084_v1, %v1082_v63  ;;  %v1086_v16 = vld [vmem:[#allocation6 + $0x580] sm:$0xff] }
  0xa3   : > { %5877 = vmatprep.subr.bf16.mxu0 %v5876_v52  ;;  %v5882_v11 = vpack.c.bf16 %v537_v5, %v535_v4  ;;  %v542_v15 = vld [vmem:[#allocation6 + $0x198] sm:$0xff]  ;;  %v539_v19 = vld [vmem:[#allocation6 + $0x180] sm:$0xff]  ;;  %v541_v20 = vld [vmem:[#allocation6 + $0x190] sm:$0xff] }
  0xa4   : > { %v5886_v22 = vpack.c.bf16 %v541_v20, %v539_v19  ;;  %v1093_v25 = vld [vmem:[#allocation6 + $0x5b8] sm:$0xff]  ;;  %v544_v27 = vld [vmem:[#allocation6 + $0x1a8] sm:$0xff]  ;;  %v1090_v29 = vld [vmem:[#allocation6 + $0x5a0] sm:$0xff] }
  0xa5   : > { %6039 = vmatpush1.bf16.msra.mxu1 %v6038_v56  ;;  %v546_v28 = vld [vmem:[#allocation6 + $0x1b8] sm:$0xff]  ;;  %v1092_v32 = vld [vmem:[#allocation6 + $0x5b0] sm:$0xff]  ;;  %v543_v33 = vld [vmem:[#allocation6 + $0x1a0] sm:$0xff] }
  0xa6   : > { %5879 = vmatpush1.bf16.msra.mxu0 %v5878_v60  ;;  %6041 = vmatprep.subr.bf16.mxu1 %v6040_v61  ;;  %v5888_v31 = vpack.c.bf16 %v546_v28, %v544_v27  ;;  %v545_v34 = vld [vmem:[#allocation6 + $0x1b0] sm:$0xff]  ;;  %v6050_v36 = vpack.c.bf16 %v1092_v32, %v1090_v29  ;;  %v1095_v38 = vld [vmem:[#allocation6 + $0x5c8] sm:$0xff]  ;;  %v1097_v39 = vld [vmem:[#allocation6 + $0x5d8] sm:$0xff] }
  0xa7   : > { %5881 = vmatprep.subr.bf16.mxu0 %v5880_v3  ;;  %v5890_v37 = vpack.c.bf16 %v545_v34, %v543_v33  ;;  %v6052_v40 = vpack.c.bf16 %v1097_v39, %v1095_v38  ;;  %v548_v41 = vld [vmem:[#allocation6 + $0x1c8] sm:$0xff]  ;;  %v550_v42 = vld [vmem:[#allocation6 + $0x1d8] sm:$0xff]  ;;  %v1094_v43 = vld [vmem:[#allocation6 + $0x5c0] sm:$0xff] }
  0xa8   : > { %v5892_v44 = vpack.c.bf16 %v550_v42, %v548_v41  ;;  %v547_v47 = vld [vmem:[#allocation6 + $0x1c0] sm:$0xff]  ;;  %v549_v48 = vld [vmem:[#allocation6 + $0x1d0] sm:$0xff]  ;;  %v1099_v51 = vld [vmem:[#allocation6 + $0x5e8] sm:$0xff] }
  0xa9   : > { %6043 = vmatpush1.bf16.msra.mxu1 %v6042_v8  ;;  %v5894_v50 = vpack.c.bf16 %v549_v48, %v547_v47  ;;  %v1101_v52 = vld [vmem:[#allocation6 + $0x5f8] sm:$0xff]  ;;  %v552_v54 = vld [vmem:[#allocation6 + $0x1e8] sm:$0xff]  ;;  %v1098_v56 = vld [vmem:[#allocation6 + $0x5e0] sm:$0xff] }
  0xaa   : > { %5883 = vmatpush1.bf16.msra.mxu0 %v5882_v11  ;;  %v6056_v53 = vpack.c.bf16 %v1101_v52, %v1099_v51  ;;  %v554_v55 = vld [vmem:[#allocation6 + $0x1f8] sm:$0xff]  ;;  %v1100_v58 = vld [vmem:[#allocation6 + $0x5f0] sm:$0xff]  ;;  %v551_v59 = vld [vmem:[#allocation6 + $0x1e0] sm:$0xff] }
  0xab   : > { %v5896_v57 = vpack.c.bf16 %v554_v55, %v552_v54  ;;  %v553_v60 = vld [vmem:[#allocation6 + $0x1f0] sm:$0xff]  ;;  %v6058_v62 = vpack.c.bf16 %v1100_v58, %v1098_v56  ;;  %v1185_v1 = vld [vmem:[#allocation6 + $0x608] sm:$0xff]  ;;  %vm510_vm6 = vmor %vm426_vm1, %vm509_vm4  ;;  %vm3682_vm4 = vcmask 64512  }
  0xac   : > { %v5898_v63 = vpack.c.bf16 %v553_v60, %v551_v59  ;;  %v460_v3 = vld [vmem:[#allocation6 + $0x8] sm:$0xff]  ;;  %vm512_vm8 = vmor %vm510_vm6, %vm511_vm7  ;;  %v1184_v38 = vld [vmem:[#allocation6 + $0x600] sm:$0xff]  ;;  %vm4032_vm6 = vcmask 1045504  }
  0xad   : > { %vm7482_vm10 = vmor %vm512_vm8, %vm513_vm9  ;;  %v1186_v42 = vld [vmem:[#allocation6 + $0x610] sm:$0xff]  ;;  %v1189_v48 = vld [vmem:[#allocation6 + $0x628] sm:$0xff] }
  0xae   : > { %v461_v47 = vld [vmem:[#allocation6 + $0x10] sm:$0xff]  ;;  %v466_v54 = vld [vmem:[#allocation6 + $0x38] sm:$0xff]  ;;  %v6062_v55 = vpack.c.bf16 %v1186_v42, %v1184_v38  ;;  %v471_v38 = vld [vmem:[#allocation6 + $0x60] sm:$0xff] }
  0xaf   : > { %vm7628_vm14 = vmor %vm455_vm2, %vm1808_vm13 }
  0xb0   : > { %vm8305_vm7 = vmneg %vm426_vm1 }
 0x16f   : > { %v409_v18 = vpop.f32.mrb[0].mxu1 }
 0x170   : > { %v7434_v23 = vadd.f32 %v409_v18, %v332_v13  ;;  %v411_v24 = vpop.f32.mrb[1].mxu1  ;;  %v6044_v13 = vpack.c.bf16 %v1089_v7, %v1087_v6  ;;  %v1088_v18 = vld [vmem:[#allocation6 + $0x590] sm:$0xff]  ;;  %v462_v6 = vld [vmem:[#allocation6 + $0x18] sm:$0xff] }
 0x171   : > { %v7436_v30 = vadd.f32 %v411_v24, %v336_v14  ;;  %v540_v14 = vld [vmem:[#allocation6 + $0x188] sm:$0xff]  ;;  %v6046_v21 = vpack.c.bf16 %v1088_v18, %v1086_v16  ;;  %v5900_v7 = vpack.c.bf16 %v462_v6, %v460_v3  ;;  %v1195_v6 = vld [vmem:[#allocation6 + $0x658] sm:$0xff] }
 0x172   : > { %v414_v35 = vmax.f32 %v7434_v23, 0.0  ;;  %6045 = vmatprep.subr.bf16.mxu1 %v6044_v13  ;;  %v5884_v17 = vpack.c.bf16 %v542_v15, %v540_v14  ;;  %v1091_v24 = vld [vmem:[#allocation6 + $0x5a8] sm:$0xff]  ;;  %v7161_v13 = vmov 1983009808  }
 0x173   : > { %v415_v45 = vmax.f32 %v7436_v30, 0.0  ;;  %6047 = vmatpush1.bf16.msra.mxu1 %v6046_v21  ;;  %v6048_v26 = vpack.c.bf16 %v1093_v25, %v1091_v24  ;;  %v494_v23 = vunpack.c.l.s4 %v7161_v13 }
 0x174   : > { %v418_v46 = vrot.slane %v414_v35, 7  ;;  %5885 = vmatprep.subr.bf16.mxu0 %v5884_v17 }
 0x175   : > { %v419_v2 = vrot.slane %v415_v45, 7  ;;  %5887 = vmatpush1.bf16.msra.mxu0 %v5886_v22  ;;  %6049 = vmatprep.subr.bf16.mxu1 %v6048_v26  ;;  %v495_v14 = vunpack.c.0.s8 %v494_v23 }
 0x176   : > { %420 = vrot.lane.b32.xlu0 %v418_v46, %s7159_s28  ;;  %5889 = vmatprep.subr.bf16.mxu0 %v5888_v31  ;;  %v1096_v46 = vld [vmem:[#allocation6 + $0x5d0] sm:$0xff] }
 0x177   : > { %6051 = vmatpush1.bf16.msra.mxu1 %v6050_v36  ;;  %v6054_v49 = vpack.c.bf16 %v1096_v46, %v1094_v43  ;;  %v7460_v16 = vsub.s32 %v495_v14, %v7424_v9  ;;  %v459_v46 = vld [vmem:[#allocation6] sm:$0xff] }
 0x178   : > { %6053 = vmatprep.subr.bf16.mxu1 %v6052_v40 }
 0x179   : > { %5891 = vmatpush1.bf16.msra.mxu0 %v5890_v37 }
 0x17a   : > { %422 = vrot.lane.b32.xlu0 %v419_v2, %s7159_s28  ;;  %5893 = vmatprep.subr.bf16.mxu0 %v5892_v44  ;;  %v1187_v2 = vld [vmem:[#allocation6 + $0x618] sm:$0xff] }
 0x17b   : > { %6055 = vmatpush1.bf16.msra.mxu1 %v6054_v49  ;;  %v6060_v5 = vpack.c.bf16 %v1187_v2, %v1185_v1  ;;  %v1191_v49 = vld [vmem:[#allocation6 + $0x638] sm:$0xff]  ;;  %v463_v1 = vld [vmem:[#allocation6 + $0x20] sm:$0xff] }
 0x17c   : > { %6057 = vmatprep.subr.bf16.mxu1 %v6056_v53  ;;  %v464_v53 = vld [vmem:[#allocation6 + $0x28] sm:$0xff] }
 0x17d   : > { %5895 = vmatpush1.bf16.msra.mxu0 %v5894_v50  ;;  %v5904_v3 = vpack.c.bf16 %v466_v54, %v464_v53  ;;  %v1200_v53 = vld [vmem:[#allocation6 + $0x680] sm:$0xff]  ;;  %v1202_v54 = vld [vmem:[#allocation6 + $0x690] sm:$0xff] }
 0x17e   : > { %5897 = vmatprep.subr.bf16.mxu0 %v5896_v57  ;;  %v5902_v57 = vpack.c.bf16 %v461_v47, %v459_v46  ;;  %v1203_v46 = vld [vmem:[#allocation6 + $0x698] sm:$0xff]  ;;  %v476_v47 = vld [vmem:[#allocation6 + $0x88] sm:$0xff] }
 0x17f   : > { %6059 = vmatpush1.bf16.msra.mxu1 %v6058_v62  ;;  %v1188_v62 = vld [vmem:[#allocation6 + $0x620] sm:$0xff] }
 0x180   : > { %6061 = vmatprep.subr.bf16.mxu1 %v6060_v5  ;;  %v1193_v5 = vld [vmem:[#allocation6 + $0x648] sm:$0xff] }
 0x181   : > { %5899 = vmatpush1.bf16.msra.mxu0 %v5898_v63  ;;  %v1190_v63 = vld [vmem:[#allocation6 + $0x630] sm:$0xff] }
 0x182   : > { %5901 = vmatprep.subr.bf16.mxu0 %v5900_v7  ;;  %v6066_v23 = vpack.c.bf16 %v1190_v63, %v1188_v62  ;;  %v6078_v62 = vpack.c.bf16 %v1202_v54, %v1200_v53 }
 0x1e8   : > { %v421_v61 = vpop.permute.xlu0 %420 }
 0x1e9   : > { %v427_v4 = vsel %vm426_vm1, %v414_v35, %v421_v61  ;;  %v7453_v35 = vrot.slane %v7158_v0, 7  ;;  %v6064_v61 = vpack.c.bf16 %v1191_v49, %v1189_v48  ;;  %v478_v48 = vld [vmem:[#allocation6 + $0x98] sm:$0xff] }
 0x1ea   : > { %431 = vrot.lane.b32.xlu1 %v427_v4, %s7160_s16  ;;  %v465_v4 = vld [vmem:[#allocation6 + $0x30] sm:$0xff] }
 0x1eb   : > { %v7457_v15 = vsel %vm426_vm1, 0.0, %v7453_v35  ;;  %v5906_v14 = vpack.c.bf16 %v465_v4, %v463_v1  ;;  %v479_v4 = vld [vmem:[#allocation6 + $0xa0] sm:$0xff] }
 0x1ec   : > { %v423_v8 = vpop.permute.xlu0 %422  ;;  %v7464_v30 = vsel %vm455_vm2, %v7457_v15, 0.0 }
 0x1ed   : > { %v428_v11 = vsel %vm426_vm1, %v415_v45, %v423_v8  ;;  %v7468_v45 = vrot.slane %v7464_v30, %v7460_v16  ;;  %v468_v8 = vld [vmem:[#allocation6 + $0x48] sm:$0xff] }
 0x1ee   : > { %433 = vrot.lane.b32.xlu1 %v428_v11, %s7160_s16  ;;  %v470_v11 = vld [vmem:[#allocation6 + $0x58] sm:$0xff] }
 0x1ef   : > { %v500_v20 = vcombine.high %v7468_v45, %v7468_v45  ;;  %v5176_v28 = vrot.slane %v7468_v45, 9 }
 0x1f1   : > { %v517_v29 = vrot.slane %v500_v20, 7  ;;  %v467_v20 = vld [vmem:[#allocation6 + $0x40] sm:$0xff] }
 0x1f3   : > { %v7494_v39 = vsel %vm7482_vm10, %v5176_v28, %v517_v29  ;;  %v474_v28 = vld [vmem:[#allocation6 + $0x78] sm:$0xff] }
 0x25c   : > { %v432_v17 = vpop.permute.xlu1 %431 }
 0x25d   : > { %v438_v18 = vsel %vm437_vm3, 0.0, %v432_v17  ;;  %v6068_v17 = vpack.c.bf16 %v1195_v6, %v1193_v5  ;;  %v481_v6 = vld [vmem:[#allocation6 + $0xb0] sm:$0xff] }
 0x25e   : > { %v441_v19 = vsel %vm440_vm5, %v438_v18, 0.0  ;;  %v1192_v18 = vld [vmem:[#allocation6 + $0x640] sm:$0xff] }
 0x25f   : > { %v447_v21 = vrot.slane %v441_v19, 7  ;;  %v1194_v19 = vld [vmem:[#allocation6 + $0x650] sm:$0xff] }
 0x260   : > { %v434_v22 = vpop.permute.xlu1 %433  ;;  %v6070_v29 = vpack.c.bf16 %v1194_v19, %v1192_v18  ;;  %v5922_v18 = vpack.c.bf16 %v481_v6, %v479_v4 }
 0x261   : > { %v453_v24 = vsel %vm426_vm1, 0.0, %v447_v21  ;;  %v439_v25 = vsel %vm437_vm3, 0.0, %v434_v22  ;;  %v5908_v21 = vpack.c.bf16 %v470_v11, %v468_v8  ;;  %v469_v22 = vld [vmem:[#allocation6 + $0x50] sm:$0xff]  ;;  %v1209_v8 = vld [vmem:[#allocation6 + $0x6c8] sm:$0xff]  ;;  %v1211_v11 = vld [vmem:[#allocation6 + $0x6d8] sm:$0xff] }
 0x262   : > { %v7475_v26 = vsel %vm455_vm2, %v453_v24, 0.0  ;;  %v442_v27 = vsel %vm440_vm5, %v439_v25, 0.0  ;;  %v1197_v24 = vld [vmem:[#allocation6 + $0x668] sm:$0xff]  ;;  %v1199_v25 = vld [vmem:[#allocation6 + $0x678] sm:$0xff]  ;;  %v6084_v19 = vpack.c.bf16 %v1211_v11, %v1209_v8  ;;  %v1302_v8 = vld [vmem:[#allocation6 + $0x720] sm:$0xff]  ;;  %vm3691_vm5 = vcmask 588800  }
 0x263   : > { %v7480_v31 = vrot.slane %v7475_v26, %v7460_v16  ;;  %v448_v32 = vrot.slane %v442_v27, 7  ;;  %v472_v27 = vld [vmem:[#allocation6 + $0x68] sm:$0xff]  ;;  %v6072_v33 = vpack.c.bf16 %v1199_v25, %v1197_v24  ;;  %v485_v25 = vld [vmem:[#allocation6 + $0xd0] sm:$0xff] }
 0x264   : > { %v5912_v42 = vpack.c.bf16 %v474_v28, %v472_v27  ;;  %v1213_v27 = vld [vmem:[#allocation6 + $0x6e8] sm:$0xff]  ;;  %v1215_v28 = vld [vmem:[#allocation6 + $0x6f8] sm:$0xff]  ;;  %v1304_v11 = vld [vmem:[#allocation6 + $0x730] sm:$0xff] }
 0x265   : > { %v454_v34 = vsel %vm426_vm1, 0.0, %v448_v32  ;;  %v508_v36 = vcombine.high %v7480_v31, %v7480_v31  ;;  %v5177_v43 = vrot.slane %v7480_v31, 9  ;;  %v5910_v32 = vpack.c.bf16 %v469_v22, %v467_v20  ;;  %v1208_v20 = vld [vmem:[#allocation6 + $0x6c0] sm:$0xff] }
 0x266   : > { %v7490_v37 = vsel %vm455_vm2, %v454_v34, 0.0  ;;  %v1196_v34 = vld [vmem:[#allocation6 + $0x660] sm:$0xff]  ;;  %vm2021_vm2 = vcmask 1045508  }
 0x267   : > { %v862_v40 = vcombine.low %v7475_v26, %v7490_v37  ;;  %v7500_v41 = vrot.slane %v7490_v37, %v7460_v16  ;;  %v521_v44 = vrot.slane %v508_v36, 7  ;;  %v1198_v36 = vld [vmem:[#allocation6 + $0x670] sm:$0xff]  ;;  %v483_v22 = vld [vmem:[#allocation6 + $0xc0] sm:$0xff]  ;;  %v1216_v53 = vcombine.low %v7490_v37, %v7464_v30  ;;  %vm7711_vm3 = vmor %vm2020_vm15, %vm2021_vm2 }
 0x268   : > { %v6074_v49 = vpack.c.bf16 %v1198_v36, %v1196_v34  ;;  %v5926_v34 = vpack.c.bf16 %v485_v25, %v483_v22  ;;  %v6088_v36 = vpack.c.bf16 %v1215_v28, %v1213_v27  ;;  %v6098_v22 = vpack.c.bf16 %v1304_v11, %v1302_v8  ;;  %v1306_v27 = vld [vmem:[#allocation6 + $0x740] sm:$0xff]  ;;  %v1308_v28 = vld [vmem:[#allocation6 + $0x750] sm:$0xff] }
 0x269   : > { %v5180_v50 = vcombine.high %v7480_v31, %v7500_v41  ;;  %v7507_v51 = vsel %vm7482_vm10, %v5177_v43, %v521_v44  ;;  %v951_v52 = vcombine.high %v7500_v41, %v7500_v41  ;;  %v5179_v59 = vrot.slane %v7500_v41, 9  ;;  %v473_v43 = vld [vmem:[#allocation6 + $0x70] sm:$0xff]  ;;  %v1201_v44 = vld [vmem:[#allocation6 + $0x688] sm:$0xff] }
 0x26a   : > { %v555_v56 = vcombine.low %v7494_v39, %v7507_v51  ;;  %v1223_v4 = vrot.slane %v1216_v53, %v7460_v16  ;;  %v1315_v53 = vld [vmem:[#allocation6 + $0x788] sm:$0xff] }
 0x26b   : > { %v1109_v58 = vrot.slane %v5180_v50, %v7460_v16  ;;  %v954_v60 = vrot.slane %v951_v52, 7  ;;  %v5914_v50 = vpack.c.bf16 %v473_v43, %v471_v38  ;;  %v6076_v52 = vpack.c.bf16 %v1203_v46, %v1201_v44  ;;  %v1212_v38 = vld [vmem:[#allocation6 + $0x6e0] sm:$0xff]  ;;  %v489_v46 = vld [vmem:[#allocation6 + $0xf0] sm:$0xff] }
 0x26c   : > { %v562_v2 = vrot.slane %v555_v56, %v7460_v16  ;;  %v5916_v56 = vpack.c.bf16 %v478_v48, %v476_v47  ;;  %v487_v43 = vld [vmem:[#allocation6 + $0xe0] sm:$0xff]  ;;  %v1299_v47 = vld [vmem:[#allocation6 + $0x708] sm:$0xff]  ;;  %v1301_v48 = vld [vmem:[#allocation6 + $0x718] sm:$0xff] }
 0x26d   : > { %1176 = vmatmul.mubr.f32.vlgmr.msra.gmra.mrb[2].mxu1 %v1109_v58  ;;  %v7518_v7 = vsel %vm7482_vm10, %v5179_v59, %v954_v60  ;;  %v1205_v58 = vld [vmem:[#allocation6 + $0x6a8] sm:$0xff]  ;;  %v1207_v59 = vld [vmem:[#allocation6 + $0x6b8] sm:$0xff]  ;;  %v5930_v54 = vpack.c.bf16 %v489_v46, %v487_v43  ;;  %v6102_v43 = vpack.c.bf16 %v1308_v28, %v1306_v27  ;;  %v1322_v28 = vld [vmem:[#allocation6 + $0x7c0] sm:$0xff] }
 0x26e   : > { %6063 = vmatpush1.bf16.msra.mxu1 %v6062_v55  ;;  %629 = vmatmul.mubr.f32.vlgmr.msra.gmra.mrb[0].mxu0 %v562_v2  ;;  %v988_v13 = vcombine.low %v7507_v51, %v7518_v7  ;;  %v475_v55 = vld [vmem:[#allocation6 + $0x80] sm:$0xff]  ;;  %v480_v60 = vld [vmem:[#allocation6 + $0xa8] sm:$0xff]  ;;  %v6080_v1 = vpack.c.bf16 %v1207_v59, %v1205_v58  ;;  %v635_v59 = vcombine.low %v7464_v30, %v7475_v26 }
 0x26f   : > { %5903 = vmatpush1.bf16.msra.mxu0 %v5902_v57  ;;  %6065 = vmatprep.subr.bf16.mxu1 %v6064_v61  ;;  %v477_v57 = vld [vmem:[#allocation6 + $0x90] sm:$0xff]  ;;  %v482_v61 = vld [vmem:[#allocation6 + $0xb8] sm:$0xff]  ;;  %v1204_v2 = vld [vmem:[#allocation6 + $0x6a0] sm:$0xff] }
 0x270   : > { %5905 = vmatprep.subr.bf16.mxu0 %v5904_v3  ;;  %1289 = vmatprep.mubr.f32.mxu1 %v7158_v0  ;;  %v5918_v63 = vpack.c.bf16 %v477_v57, %v475_v55  ;;  %v1206_v3 = vld [vmem:[#allocation6 + $0x6b0] sm:$0xff]  ;;  %v5920_v5 = vpack.c.bf16 %v482_v61, %v480_v60  ;;  %v6092_v55 = vpack.c.bf16 %v1301_v48, %v1299_v47  ;;  %v715_v58 = vld [vmem:[#allocation6 + $0x200] sm:$0xff] }
 0x271   : > { %708 = vmatprep.mubr.f32.mxu0 %v7158_v0  ;;  %v1300_v57 = vld [vmem:[#allocation6 + $0x710] sm:$0xff]  ;;  %v642_v30 = vrot.slane %v635_v59, %v7460_v16  ;;  %v1310_v47 = vld [vmem:[#allocation6 + $0x760] sm:$0xff] }
 0x272   : > { %6067 = vmatpush1.bf16.msra.mxu1 %v6066_v23  ;;  %v484_v23 = vld [vmem:[#allocation6 + $0xc8] sm:$0xff]  ;;  %v717_v61 = vld [vmem:[#allocation6 + $0x210] sm:$0xff] }
 0x273   : > { %5907 = vmatpush1.bf16.msra.mxu0 %v5906_v14  ;;  %6069 = vmatprep.subr.bf16.mxu1 %v6068_v17  ;;  %v486_v14 = vld [vmem:[#allocation6 + $0xd8] sm:$0xff]  ;;  %v6082_v17 = vpack.c.bf16 %v1206_v3, %v1204_v2  ;;  %v1312_v48 = vld [vmem:[#allocation6 + $0x770] sm:$0xff] }
 0x274   : > { %5909 = vmatprep.subr.bf16.mxu0 %v5908_v21  ;;  %v1210_v21 = vld [vmem:[#allocation6 + $0x6d0] sm:$0xff]  ;;  %v5924_v24 = vpack.c.bf16 %v486_v14, %v484_v23  ;;  %v722_v2 = vld [vmem:[#allocation6 + $0x238] sm:$0xff]  ;;  %v719_v23 = vld [vmem:[#allocation6 + $0x220] sm:$0xff] }
 0x276   : > { %6071 = vmatpush1.bf16.msra.mxu1 %v6070_v29  ;;  %v488_v29 = vld [vmem:[#allocation6 + $0xe8] sm:$0xff] }
 0x277   : > { %5911 = vmatpush1.bf16.msra.mxu0 %v5910_v32  ;;  %6073 = vmatprep.subr.bf16.mxu1 %v6072_v33  ;;  %v490_v32 = vld [vmem:[#allocation6 + $0xf8] sm:$0xff]  ;;  %v6086_v33 = vpack.c.bf16 %v1210_v21, %v1208_v20  ;;  %v724_v20 = vld [vmem:[#allocation6 + $0x248] sm:$0xff] }
 0x278   : > { %5913 = vmatprep.subr.bf16.mxu0 %v5912_v42  ;;  %v1214_v42 = vld [vmem:[#allocation6 + $0x6f0] sm:$0xff]  ;;  %v5928_v44 = vpack.c.bf16 %v490_v32, %v488_v29  ;;  %v726_v21 = vld [vmem:[#allocation6 + $0x258] sm:$0xff]  ;;  %v723_v29 = vld [vmem:[#allocation6 + $0x240] sm:$0xff] }
 0x279   : > { %v5940_v32 = vpack.c.bf16 %v726_v21, %v724_v20  ;;  %v1325_v20 = vld [vmem:[#allocation6 + $0x7d8] sm:$0xff]  ;;  %v740_v21 = vld [vmem:[#allocation6 + $0x2c8] sm:$0xff] }
 0x27a   : > { %6075 = vmatpush1.bf16.msra.mxu1 %v6074_v49  ;;  %v716_v49 = vld [vmem:[#allocation6 + $0x208] sm:$0xff] }
 0x27b   : > { %5915 = vmatpush1.bf16.msra.mxu0 %v5914_v50  ;;  %6077 = vmatprep.subr.bf16.mxu1 %v6076_v52  ;;  %v718_v50 = vld [vmem:[#allocation6 + $0x218] sm:$0xff]  ;;  %v6090_v52 = vpack.c.bf16 %v1214_v42, %v1212_v38  ;;  %v728_v38 = vld [vmem:[#allocation6 + $0x268] sm:$0xff] }
 0x27c   : > { %5917 = vmatprep.subr.bf16.mxu0 %v5916_v56  ;;  %v1298_v56 = vld [vmem:[#allocation6 + $0x700] sm:$0xff]  ;;  %v5932_v60 = vpack.c.bf16 %v718_v50, %v716_v49  ;;  %v730_v42 = vld [vmem:[#allocation6 + $0x278] sm:$0xff] }
 0x27d   : > { %v6094_v3 = vpack.c.bf16 %v1300_v57, %v1298_v56  ;;  %v727_v49 = vld [vmem:[#allocation6 + $0x260] sm:$0xff]  ;;  %v5944_v50 = vpack.c.bf16 %v730_v42, %v728_v38  ;;  %v734_v56 = vld [vmem:[#allocation6 + $0x298] sm:$0xff]  ;;  %v6106_v57 = vpack.c.bf16 %v1312_v48, %v1310_v47  ;;  %v744_v42 = vld [vmem:[#allocation6 + $0x2e8] sm:$0xff] }
 0x27e   : > { %6079 = vmatpush1.bf16.msra.mxu1 %v6078_v62  ;;  %v1303_v62 = vld [vmem:[#allocation6 + $0x728] sm:$0xff]  ;;  %v1329_v38 = vld [vmem:[#allocation6 + $0x7f8] sm:$0xff]  ;;  %v1326_v48 = vld [vmem:[#allocation6 + $0x7e0] sm:$0xff] }
 0x27f   : > { %5919 = vmatpush1.bf16.msra.mxu0 %v5918_v63  ;;  %6081 = vmatprep.subr.bf16.mxu1 %v6080_v1  ;;  %v1305_v63 = vld [vmem:[#allocation6 + $0x738] sm:$0xff]  ;;  %v720_v1 = vld [vmem:[#allocation6 + $0x228] sm:$0xff] }
 0x280   : > { %5921 = vmatprep.subr.bf16.mxu0 %v5920_v5  ;;  %v5934_v5 = vpack.c.bf16 %v717_v61, %v715_v58  ;;  %v6096_v6 = vpack.c.bf16 %v1305_v63, %v1303_v62  ;;  %v5936_v14 = vpack.c.bf16 %v722_v2, %v720_v1  ;;  %v1316_v61 = vld [vmem:[#allocation6 + $0x790] sm:$0xff]  ;;  %v731_v62 = vld [vmem:[#allocation6 + $0x280] sm:$0xff]  ;;  %v1319_v2 = vld [vmem:[#allocation6 + $0x7a8] sm:$0xff] }
 0x281   : > { %v733_v1 = vld [vmem:[#allocation6 + $0x290] sm:$0xff] }
 0x282   : > { %6083 = vmatpush1.bf16.msra.mxu1 %v6082_v17  ;;  %v721_v17 = vld [vmem:[#allocation6 + $0x230] sm:$0xff]  ;;  %v5950_v8 = vpack.c.bf16 %v733_v1, %v731_v62  ;;  %v1412_v62 = vld [vmem:[#allocation6 + $0x800] sm:$0xff] }
 0x283   : > { %5923 = vmatpush1.bf16.msra.mxu0 %v5922_v18  ;;  %6085 = vmatprep.subr.bf16.mxu1 %v6084_v19  ;;  %v1307_v18 = vld [vmem:[#allocation6 + $0x748] sm:$0xff]  ;;  %v1309_v19 = vld [vmem:[#allocation6 + $0x758] sm:$0xff]  ;;  %v829_v1 = vld [vmem:[#allocation6 + $0x300] sm:$0xff] }
 0x284   : > { %5925 = vmatprep.subr.bf16.mxu0 %v5924_v24  ;;  %v5938_v24 = vpack.c.bf16 %v721_v17, %v719_v23  ;;  %v6100_v25 = vpack.c.bf16 %v1309_v19, %v1307_v18  ;;  %v1318_v23 = vld [vmem:[#allocation6 + $0x7a0] sm:$0xff]  ;;  %v737_v18 = vld [vmem:[#allocation6 + $0x2b0] sm:$0xff]  ;;  %v1323_v19 = vld [vmem:[#allocation6 + $0x7c8] sm:$0xff] }
 0x285   : > { %v6116_v27 = vpack.c.bf16 %v1325_v20, %v1323_v19  ;;  %v833_v19 = vld [vmem:[#allocation6 + $0x320] sm:$0xff] }
 0x286   : > { %6087 = vmatpush1.bf16.msra.mxu1 %v6086_v33  ;;  %v725_v33 = vld [vmem:[#allocation6 + $0x250] sm:$0xff] }
 0x287   : > { %5927 = vmatpush1.bf16.msra.mxu0 %v5926_v34  ;;  %6089 = vmatprep.subr.bf16.mxu1 %v6088_v36  ;;  %v1311_v34 = vld [vmem:[#allocation6 + $0x768] sm:$0xff]  ;;  %v1313_v36 = vld [vmem:[#allocation6 + $0x778] sm:$0xff] }
 0x288   : > { %5929 = vmatprep.subr.bf16.mxu0 %v5928_v44  ;;  %v5942_v44 = vpack.c.bf16 %v725_v33, %v723_v29  ;;  %v6104_v46 = vpack.c.bf16 %v1313_v36, %v1311_v34  ;;  %v1324_v29 = vld [vmem:[#allocation6 + $0x7d0] sm:$0xff]  ;;  %v1327_v36 = vld [vmem:[#allocation6 + $0x7e8] sm:$0xff] }
 0x289   : > { %v741_v34 = vld [vmem:[#allocation6 + $0x2d0] sm:$0xff]  ;;  %v6120_v47 = vpack.c.bf16 %v1329_v38, %v1327_v36  ;;  %v837_v36 = vld [vmem:[#allocation6 + $0x340] sm:$0xff] }
 0x28a   : > { %6091 = vmatpush1.bf16.msra.mxu1 %v6090_v52  ;;  %v729_v52 = vld [vmem:[#allocation6 + $0x270] sm:$0xff] }
 0x28b   : > { %5931 = vmatpush1.bf16.msra.mxu0 %v5930_v54  ;;  %6093 = vmatprep.subr.bf16.mxu1 %v6092_v55  ;;  %v1317_v54 = vld [vmem:[#allocation6 + $0x798] sm:$0xff]  ;;  %v732_v55 = vld [vmem:[#allocation6 + $0x288] sm:$0xff]  ;;  %v5946_v58 = vpack.c.bf16 %v729_v52, %v727_v49  ;;  %v1328_v49 = vld [vmem:[#allocation6 + $0x7f0] sm:$0xff] }
 0x28c   : > { %5933 = vmatprep.subr.bf16.mxu0 %v5932_v60  ;;  %v6108_v59 = vpack.c.bf16 %v1317_v54, %v1315_v53  ;;  %v1314_v60 = vld [vmem:[#allocation6 + $0x780] sm:$0xff]  ;;  %v5948_v63 = vpack.c.bf16 %v734_v56, %v732_v55  ;;  %v745_v53 = vld [vmem:[#allocation6 + $0x2f0] sm:$0xff]  ;;  %v1413_v54 = vld [vmem:[#allocation6 + $0x808] sm:$0xff] }
 0x28d   : > { %1290 = vmatmul.mubr.f32.vlgmr.msra.gmra.mrb[2].mxu1 %v1223_v4  ;;  %v736_v4 = vld [vmem:[#allocation6 + $0x2a8] sm:$0xff]  ;;  %v1415_v55 = vld [vmem:[#allocation6 + $0x818] sm:$0xff] }
 0x28e   : > { %709 = vmatmul.mubr.f32.vlgmr.msra.gmra.mrb[0].mxu0 %v642_v30  ;;  %6095 = vmatpush1.bf16.msra.mxu1 %v6094_v3  ;;  %v1321_v3 = vld [vmem:[#allocation6 + $0x7b8] sm:$0xff]  ;;  %v1320_v30 = vld [vmem:[#allocation6 + $0x7b0] sm:$0xff]  ;;  %v830_v56 = vld [vmem:[#allocation6 + $0x308] sm:$0xff] }
 0x28f   : > { %5935 = vmatpush1.bf16.msra.mxu0 %v5934_v5  ;;  %6097 = vmatprep.subr.bf16.mxu1 %v6096_v6  ;;  %v738_v5 = vld [vmem:[#allocation6 + $0x2b8] sm:$0xff]  ;;  %v6110_v6 = vpack.c.bf16 %v1316_v61, %v1314_v60  ;;  %v6112_v11 = vpack.c.bf16 %v1321_v3, %v1319_v2  ;;  %v6124_v61 = vpack.c.bf16 %v1415_v55, %v1413_v54  ;;  %v841_v54 = vld [vmem:[#allocation6 + $0x360] sm:$0xff] }
 0x290   : > { %5937 = vmatprep.subr.bf16.mxu0 %v5936_v14  ;;  %1403 = vmatprep.mubr.f32.mxu1 %v7158_v0  ;;  %v735_v14 = vld [vmem:[#allocation6 + $0x2a0] sm:$0xff]  ;;  %v5952_v17 = vpack.c.bf16 %v738_v5, %v736_v4  ;;  %v5178_v2 = vcombine.high %v7468_v45, %v7480_v31  ;;  %v831_v4 = vld [vmem:[#allocation6 + $0x310] sm:$0xff]  ;;  %v1417_v5 = vld [vmem:[#allocation6 + $0x828] sm:$0xff] }
 0x291   : > { %820 = vmatprep.mubr.f32.mxu0 %v7158_v0 }
 0x292   : > { %6099 = vmatpush1.bf16.msra.mxu1 %v6098_v22  ;;  %v742_v22 = vld [vmem:[#allocation6 + $0x2d8] sm:$0xff]  ;;  %v754_v20 = vrot.slane %v5178_v2, %v7460_v16  ;;  %v1430_v2 = vld [vmem:[#allocation6 + $0x890] sm:$0xff] }
 0x293   : > { %5939 = vmatpush1.bf16.msra.mxu0 %v5938_v24  ;;  %6101 = vmatprep.subr.bf16.mxu1 %v6100_v25  ;;  %v6114_v24 = vpack.c.bf16 %v1320_v30, %v1318_v23  ;;  %v5954_v25 = vpack.c.bf16 %v737_v18, %v735_v14  ;;  %v5956_v33 = vpack.c.bf16 %v742_v22, %v740_v21  ;;  %v1418_v18 = vld [vmem:[#allocation6 + $0x830] sm:$0xff]  ;;  %v1421_v22 = vld [vmem:[#allocation6 + $0x848] sm:$0xff] }
 0x294   : > { %5941 = vmatprep.subr.bf16.mxu0 %v5940_v32  ;;  %v739_v32 = vld [vmem:[#allocation6 + $0x2c0] sm:$0xff]  ;;  %v5966_v30 = vpack.c.bf16 %v831_v4, %v829_v1  ;;  %v835_v21 = vld [vmem:[#allocation6 + $0x330] sm:$0xff] }
 0x295   : > { %v1428_v1 = vld [vmem:[#allocation6 + $0x880] sm:$0xff] }
 0x296   : > { %6103 = vmatpush1.bf16.msra.mxu1 %v6102_v43  ;;  %v746_v43 = vld [vmem:[#allocation6 + $0x2f8] sm:$0xff] }
 0x297   : > { %5943 = vmatpush1.bf16.msra.mxu0 %v5942_v44  ;;  %6105 = vmatprep.subr.bf16.mxu1 %v6104_v46  ;;  %v6118_v44 = vpack.c.bf16 %v1324_v29, %v1322_v28  ;;  %v5958_v46 = vpack.c.bf16 %v741_v34, %v739_v32  ;;  %v5960_v52 = vpack.c.bf16 %v746_v43, %v744_v42  ;;  %v1422_v34 = vld [vmem:[#allocation6 + $0x850] sm:$0xff]  ;;  %v1425_v43 = vld [vmem:[#allocation6 + $0x868] sm:$0xff] }
 0x298   : > { %5945 = vmatprep.subr.bf16.mxu0 %v5944_v50  ;;  %v743_v50 = vld [vmem:[#allocation6 + $0x2e0] sm:$0xff]  ;;  %v5970_v29 = vpack.c.bf16 %v835_v21, %v833_v19  ;;  %v839_v42 = vld [vmem:[#allocation6 + $0x350] sm:$0xff]  ;;  %v1437_v21 = vld [vmem:[#allocation6 + $0x8c8] sm:$0xff] }
 0x299   : > { %v5962_v60 = vpack.c.bf16 %v745_v53, %v743_v50  ;;  %v1426_v53 = vld [vmem:[#allocation6 + $0x870] sm:$0xff]  ;;  %v849_v19 = vld [vmem:[#allocation6 + $0x3a0] sm:$0xff] }
 0x29a   : > { %6107 = vmatpush1.bf16.msra.mxu1 %v6106_v57  ;;  %v832_v57 = vld [vmem:[#allocation6 + $0x318] sm:$0xff] }
 0x29b   : > { %5947 = vmatpush1.bf16.msra.mxu0 %v5946_v58  ;;  %6109 = vmatprep.subr.bf16.mxu1 %v6108_v59  ;;  %v6122_v58 = vpack.c.bf16 %v1328_v49, %v1326_v48  ;;  %v1330_v59 = vcombine.low %v7518_v7, %v7494_v39  ;;  %v5964_v3 = vpack.c.bf16 %v832_v57, %v830_v56  ;;  %v843_v56 = vld [vmem:[#allocation6 + $0x370] sm:$0xff]  ;;  %v1429_v57 = vld [vmem:[#allocation6 + $0x888] sm:$0xff] }
 0x29c   : > { %5949 = vmatprep.subr.bf16.mxu0 %v5948_v63  ;;  %v1414_v63 = vld [vmem:[#allocation6 + $0x810] sm:$0xff]  ;;  %v5974_v49 = vpack.c.bf16 %v839_v42, %v837_v36  ;;  %v1441_v42 = vld [vmem:[#allocation6 + $0x8e8] sm:$0xff] }
 0x29d   : > { %v6126_v23 = vpack.c.bf16 %v1414_v63, %v1412_v62  ;;  %v1337_v39 = vrot.slane %v1330_v59, %v7460_v16  ;;  %v846_v59 = vld [vmem:[#allocation6 + $0x388] sm:$0xff]  ;;  %v5978_v62 = vpack.c.bf16 %v843_v56, %v841_v54  ;;  %v857_v54 = vld [vmem:[#allocation6 + $0x3e0] sm:$0xff] }
 0x29e   : > { %6111 = vmatpush1.bf16.msra.mxu1 %v6110_v6  ;;  %v1419_v6 = vld [vmem:[#allocation6 + $0x838] sm:$0xff]  ;;  %v957_v56 = vld [vmem:[#allocation6 + $0x408] sm:$0xff] }
 0x29f   : > { %5951 = vmatpush1.bf16.msra.mxu0 %v5950_v8  ;;  %6113 = vmatprep.subr.bf16.mxu1 %v6112_v11  ;;  %v834_v8 = vld [vmem:[#allocation6 + $0x328] sm:$0xff]  ;;  %v836_v11 = vld [vmem:[#allocation6 + $0x338] sm:$0xff]  ;;  %v6128_v14 = vpack.c.bf16 %v1419_v6, %v1417_v5  ;;  %v847_v5 = vld [vmem:[#allocation6 + $0x390] sm:$0xff] }
 0x2a0   : > { %5953 = vmatprep.subr.bf16.mxu0 %v5952_v17  ;;  %v1416_v17 = vld [vmem:[#allocation6 + $0x820] sm:$0xff]  ;;  %v5968_v31 = vpack.c.bf16 %v836_v11, %v834_v8  ;;  %v1433_v6 = vld [vmem:[#allocation6 + $0x8a8] sm:$0xff]  ;;  %v1435_v8 = vld [vmem:[#allocation6 + $0x8b8] sm:$0xff] }
 0x2a1   : > { %v6130_v28 = vpack.c.bf16 %v1418_v18, %v1416_v17  ;;  %v850_v11 = vld [vmem:[#allocation6 + $0x3a8] sm:$0xff]  ;;  %v1432_v17 = vld [vmem:[#allocation6 + $0x8a0] sm:$0xff]  ;;  %v1434_v18 = vld [vmem:[#allocation6 + $0x8b0] sm:$0xff] }
 0x2a2   : > { %6115 = vmatpush1.bf16.msra.mxu1 %v6114_v24  ;;  %v1423_v24 = vld [vmem:[#allocation6 + $0x858] sm:$0xff] }
 0x2a3   : > { %5955 = vmatpush1.bf16.msra.mxu0 %v5954_v25  ;;  %6117 = vmatprep.subr.bf16.mxu1 %v6116_v27  ;;  %v838_v25 = vld [vmem:[#allocation6 + $0x348] sm:$0xff]  ;;  %v840_v27 = vld [vmem:[#allocation6 + $0x358] sm:$0xff]  ;;  %v6132_v32 = vpack.c.bf16 %v1423_v24, %v1421_v22 }
 0x2a4   : > { %5957 = vmatprep.subr.bf16.mxu0 %v5956_v33  ;;  %v1420_v33 = vld [vmem:[#allocation6 + $0x840] sm:$0xff]  ;;  %v5972_v38 = vpack.c.bf16 %v840_v27, %v838_v25  ;;  %v1439_v22 = vld [vmem:[#allocation6 + $0x8d8] sm:$0xff]  ;;  %v854_v24 = vld [vmem:[#allocation6 + $0x3c8] sm:$0xff]  ;;  %v6146_v27 = vpack.c.bf16 %v1434_v18, %v1432_v17 }
 0x2a5   : > { %v6134_v48 = vpack.c.bf16 %v1422_v34, %v1420_v33  ;;  %v856_v25 = vld [vmem:[#allocation6 + $0x3d8] sm:$0xff]  ;;  %v1438_v33 = vld [vmem:[#allocation6 + $0x8d0] sm:$0xff]  ;;  %v853_v34 = vld [vmem:[#allocation6 + $0x3c0] sm:$0xff] }
 0x2a6   : > { %6119 = vmatpush1.bf16.msra.mxu1 %v6118_v44  ;;  %v1427_v44 = vld [vmem:[#allocation6 + $0x878] sm:$0xff]  ;;  %v5988_v36 = vpack.c.bf16 %v856_v25, %v854_v24  ;;  %v969_v17 = vld [vmem:[#allocation6 + $0x468] sm:$0xff]  ;;  %v972_v24 = vld [vmem:[#allocation6 + $0x480] sm:$0xff] }
 0x2a7   : > { %5959 = vmatpush1.bf16.msra.mxu0 %v5958_v46  ;;  %6121 = vmatprep.subr.bf16.mxu1 %v6120_v47  ;;  %v842_v46 = vld [vmem:[#allocation6 + $0x368] sm:$0xff]  ;;  %v844_v47 = vld [vmem:[#allocation6 + $0x378] sm:$0xff]  ;;  %v6136_v50 = vpack.c.bf16 %v1427_v44, %v1425_v43  ;;  %v974_v25 = vld [vmem:[#allocation6 + $0x490] sm:$0xff] }
 0x2a8   : > { %5961 = vmatprep.subr.bf16.mxu0 %v5960_v52  ;;  %v1424_v52 = vld [vmem:[#allocation6 + $0x860] sm:$0xff]  ;;  %v5976_v55 = vpack.c.bf16 %v844_v47, %v842_v46  ;;  %v1443_v43 = vld [vmem:[#allocation6 + $0x8f8] sm:$0xff]  ;;  %v858_v44 = vld [vmem:[#allocation6 + $0x3e8] sm:$0xff] }
 0x2a9   : > { %v860_v46 = vld [vmem:[#allocation6 + $0x3f8] sm:$0xff] }
 0x2aa   : > { %6123 = vmatpush1.bf16.msra.mxu1 %v6122_v58  ;;  %v1431_v58 = vld [vmem:[#allocation6 + $0x898] sm:$0xff] }
 0x2ab   : > { %5963 = vmatpush1.bf16.msra.mxu0 %v5962_v60  ;;  %6125 = vmatprep.subr.bf16.mxu1 %v6124_v61  ;;  %v848_v60 = vld [vmem:[#allocation6 + $0x398] sm:$0xff]  ;;  %v6138_v61 = vpack.c.bf16 %v1426_v53, %v1424_v52  ;;  %v6140_v63 = vpack.c.bf16 %v1431_v58, %v1429_v57  ;;  %v1442_v52 = vld [vmem:[#allocation6 + $0x8f0] sm:$0xff]  ;;  %v5992_v53 = vpack.c.bf16 %v860_v46, %v858_v44  ;;  %v980_v44 = vld [vmem:[#allocation6 + $0x4c0] sm:$0xff] }
 0x2ac   : > { %5965 = vmatprep.subr.bf16.mxu0 %v5964_v3  ;;  %v845_v3 = vld [vmem:[#allocation6 + $0x380] sm:$0xff]  ;;  %v5980_v4 = vpack.c.bf16 %v848_v60, %v846_v59  ;;  %v959_v57 = vld [vmem:[#allocation6 + $0x418] sm:$0xff]  ;;  %v5181_v60 = vcombine.high %v7500_v41, %v7468_v45  ;;  %v962_v45 = vld [vmem:[#allocation6 + $0x430] sm:$0xff] }
 0x2ad   : > { %1404 = vmatmul.mubr.f32.vlgmr.msra.gmra.mrb[2].mxu1 %v1337_v39  ;;  %v6142_v39 = vpack.c.bf16 %v1430_v2, %v1428_v1  ;;  %v961_v1 = vld [vmem:[#allocation6 + $0x428] sm:$0xff]  ;;  %v963_v2 = vld [vmem:[#allocation6 + $0x438] sm:$0xff]  ;;  %v982_v46 = vld [vmem:[#allocation6 + $0x4d0] sm:$0xff] }
 0x2ae   : > { %821 = vmatmul.mubr.f32.vlgmr.msra.gmra.mrb[0].mxu0 %v754_v20  ;;  %6127 = vmatpush1.bf16.msra.mxu1 %v6126_v23  ;;  %v852_v23 = vld [vmem:[#allocation6 + $0x3b8] sm:$0xff]  ;;  %v965_v41 = vld [vmem:[#allocation6 + $0x448] sm:$0xff] }
 0x2af   : > { %5967 = vmatpush1.bf16.msra.mxu0 %v5966_v30  ;;  %6129 = vmatprep.subr.bf16.mxu1 %v6128_v14  ;;  %v5982_v30 = vpack.c.bf16 %v847_v5, %v845_v3  ;;  %v6144_v14 = vpack.c.bf16 %v1435_v8, %v1433_v6  ;;  %v5984_v20 = vpack.c.bf16 %v852_v23, %v850_v11  ;;  %v960_v8 = vld [vmem:[#allocation6 + $0x420] sm:$0xff]  ;;  %v967_v11 = vld [vmem:[#allocation6 + $0x458] sm:$0xff] }
 0x2b0   : > { %5969 = vmatprep.subr.bf16.mxu0 %v5968_v31  ;;  %1517 = vmatprep.mubr.f32.mxu1 %v7158_v0  ;;  %v851_v31 = vld [vmem:[#allocation6 + $0x3b0] sm:$0xff]  ;;  %v1451_v3 = vrot.slane %v5181_v60, %v7460_v16  ;;  %v869_v5 = vrot.slane %v862_v40, %v7460_v16  ;;  %v6000_v6 = vpack.c.bf16 %v963_v2, %v961_v1  ;;  %v971_v18 = vld [vmem:[#allocation6 + $0x478] sm:$0xff]  ;;  %v968_v40 = vld [vmem:[#allocation6 + $0x460] sm:$0xff]  ;;  %v7162_v60 = vmov 1966171168  }
 0x2b1   : > { %935 = vmatprep.mubr.f32.mxu0 %v7158_v0  ;;  %v6002_v23 = vpack.c.bf16 %v962_v45, %v960_v8  ;;  %v6008_v37 = vpack.c.bf16 %v971_v18, %v969_v17  ;;  %v1829_v17 = vld [vmem:[#allocation7 + $0x118] sm:$0xff]  ;;  %v1826_v18 = vld [vmem:[#allocation7 + $0x100] sm:$0xff] }
 0x2b2   : > { %6131 = vmatpush1.bf16.msra.mxu1 %v6130_v28  ;;  %v5986_v28 = vpack.c.bf16 %v851_v31, %v849_v19  ;;  %v970_v19 = vld [vmem:[#allocation6 + $0x470] sm:$0xff]  ;;  %v975_v31 = vld [vmem:[#allocation6 + $0x498] sm:$0xff] }
 0x2b3   : > { %5971 = vmatpush1.bf16.msra.mxu0 %v5970_v29  ;;  %6133 = vmatprep.subr.bf16.mxu1 %v6132_v32  ;;  %v6148_v29 = vpack.c.bf16 %v1439_v22, %v1437_v21  ;;  %v1436_v32 = vld [vmem:[#allocation6 + $0x8c0] sm:$0xff]  ;;  %v6010_v21 = vpack.c.bf16 %v970_v19, %v968_v40  ;;  %v1828_v40 = vld [vmem:[#allocation7 + $0x110] sm:$0xff]  ;;  %v1831_v19 = vld [vmem:[#allocation7 + $0x128] sm:$0xff] }
 0x2b4   : > { %5973 = vmatprep.subr.bf16.mxu0 %v5972_v38  ;;  %v855_v38 = vld [vmem:[#allocation6 + $0x3d0] sm:$0xff]  ;;  %v6150_v47 = vpack.c.bf16 %v1438_v33, %v1436_v32  ;;  %v976_v33 = vld [vmem:[#allocation6 + $0x4a0] sm:$0xff] }
 0x2b6   : > { %6135 = vmatpush1.bf16.msra.mxu1 %v6134_v48  ;;  %v5990_v48 = vpack.c.bf16 %v855_v38, %v853_v34  ;;  %v978_v34 = vld [vmem:[#allocation6 + $0x4b0] sm:$0xff]  ;;  %v983_v38 = vld [vmem:[#allocation6 + $0x4d8] sm:$0xff] }
 0x2b7   : > { %5975 = vmatpush1.bf16.msra.mxu0 %v5974_v49  ;;  %6137 = vmatprep.subr.bf16.mxu1 %v6136_v50  ;;  %v6152_v49 = vpack.c.bf16 %v1443_v43, %v1441_v42  ;;  %v1440_v50 = vld [vmem:[#allocation6 + $0x8e0] sm:$0xff]  ;;  %v6018_v42 = vpack.c.bf16 %v978_v34, %v976_v33  ;;  %v1836_v33 = vld [vmem:[#allocation7 + $0x150] sm:$0xff] }
 0x2b8   : > { %5977 = vmatprep.subr.bf16.mxu0 %v5976_v55  ;;  %v859_v55 = vld [vmem:[#allocation6 + $0x3f0] sm:$0xff]  ;;  %v6154_v58 = vpack.c.bf16 %v1442_v52, %v1440_v50  ;;  %v984_v52 = vld [vmem:[#allocation6 + $0x4e0] sm:$0xff] }
 0x2b9   : > { %v5994_v59 = vpack.c.bf16 %v859_v55, %v857_v54  ;;  %v995_v55 = vrot.slane %v988_v13, %v7460_v16 }
 0x2ba   : > { %6139 = vmatpush1.bf16.msra.mxu1 %v6138_v61  ;;  %v5996_v61 = vpack.c.bf16 %v959_v57, %v957_v56 }
 0x2bb   : > { %5979 = vmatpush1.bf16.msra.mxu0 %v5978_v62  ;;  %6141 = vmatprep.subr.bf16.mxu1 %v6140_v63  ;;  %v956_v62 = vld [vmem:[#allocation6 + $0x400] sm:$0xff]  ;;  %v958_v63 = vld [vmem:[#allocation6 + $0x410] sm:$0xff] }
 0x2bc   : > { %5981 = vmatprep.subr.bf16.mxu0 %v5980_v4  ;;  %v5998_v4 = vpack.c.bf16 %v958_v63, %v956_v62 }
 0x2be   : > { %6143 = vmatpush1.bf16.msra.mxu1 %v6142_v39  ;;  %v6004_v39 = vpack.c.bf16 %v967_v11, %v965_v41 }
 0x2bf   : > { %5983 = vmatpush1.bf16.msra.mxu0 %v5982_v30  ;;  %6145 = vmatprep.subr.bf16.mxu1 %v6144_v14  ;;  %v964_v30 = vld [vmem:[#allocation6 + $0x440] sm:$0xff]  ;;  %v966_v14 = vld [vmem:[#allocation6 + $0x450] sm:$0xff] }
 0x2c0   : > { %5985 = vmatprep.subr.bf16.mxu0 %v5984_v20  ;;  %v6006_v26 = vpack.c.bf16 %v966_v14, %v964_v30  ;;  %v973_v20 = vld [vmem:[#allocation6 + $0x488] sm:$0xff] }
 0x2c1   : > { %v6012_v22 = vpack.c.bf16 %v975_v31, %v973_v20  ;;  %v1827_v14 = vld [vmem:[#allocation7 + $0x108] sm:$0xff]  ;;  %v1833_v20 = vld [vmem:[#allocation7 + $0x138] sm:$0xff]  ;;  %v6158_v31 = vpack.c.bf16 %v1828_v40, %v1826_v18 }
 0x2c2   : > { %6147 = vmatpush1.bf16.msra.mxu1 %v6146_v27  ;;  %v977_v27 = vld [vmem:[#allocation6 + $0x4a8] sm:$0xff] }
 0x2c3   : > { %5987 = vmatpush1.bf16.msra.mxu0 %v5986_v28  ;;  %6149 = vmatprep.subr.bf16.mxu1 %v6148_v29  ;;  %v979_v28 = vld [vmem:[#allocation6 + $0x4b8] sm:$0xff]  ;;  %v6014_v29 = vpack.c.bf16 %v974_v25, %v972_v24  ;;  %v1832_v24 = vld [vmem:[#allocation7 + $0x130] sm:$0xff]  ;;  %v1835_v25 = vld [vmem:[#allocation7 + $0x148] sm:$0xff] }
 0x2c4   : > { %5989 = vmatprep.subr.bf16.mxu0 %v5988_v36  ;;  %v6016_v32 = vpack.c.bf16 %v979_v28, %v977_v27  ;;  %v981_v36 = vld [vmem:[#allocation6 + $0x4c8] sm:$0xff]  ;;  %v1837_v27 = vld [vmem:[#allocation7 + $0x158] sm:$0xff] }
 0x2c5   : > { %v6020_v43 = vpack.c.bf16 %v983_v38, %v981_v36  ;;  %v1839_v36 = vld [vmem:[#allocation7 + $0x168] sm:$0xff]  ;;  %v1841_v38 = vld [vmem:[#allocation7 + $0x178] sm:$0xff] }
 0x2c6   : > { %6151 = vmatpush1.bf16.msra.mxu1 %v6150_v47  ;;  %v985_v47 = vld [vmem:[#allocation6 + $0x4e8] sm:$0xff] }
 0x2c7   : > { %5991 = vmatpush1.bf16.msra.mxu0 %v5990_v48  ;;  %6153 = vmatprep.subr.bf16.mxu1 %v6152_v49  ;;  %v987_v48 = vld [vmem:[#allocation6 + $0x4f8] sm:$0xff]  ;;  %v6022_v49 = vpack.c.bf16 %v982_v46, %v980_v44  ;;  %v1840_v44 = vld [vmem:[#allocation7 + $0x170] sm:$0xff] }
 0x2c8   : > { %5993 = vmatprep.subr.bf16.mxu0 %v5992_v53  ;;  %v6024_v50 = vpack.c.bf16 %v987_v48, %v985_v47  ;;  %v986_v53 = vld [vmem:[#allocation6 + $0x4f0] sm:$0xff]  ;;  %v1843_v47 = vld [vmem:[#allocation7 + $0x188] sm:$0xff]  ;;  %v1845_v48 = vld [vmem:[#allocation7 + $0x198] sm:$0xff] }
 0x2c9   : > { %v6026_v54 = vpack.c.bf16 %v986_v53, %v984_v52  ;;  %v1844_v52 = vld [vmem:[#allocation7 + $0x190] sm:$0xff] }
 0x2ca   : > { %6155 = vmatpush1.bf16.msra.mxu1 %v6154_v58  ;;  %v1526_v58 = vld [vmem:[#allocation9 + $0x2] sm:$0x3] }
 0x2cb   : > { %5995 = vmatpush1.bf16.msra.mxu0 %v5994_v59  ;;  %v1531_v59 = vrot.slane %v1526_v58, %v7427_v10  ;;  %v1535_v63 = vrot.slane %v1526_v58, %v7430_v12  ;;  %v1848_v58 = vld [vmem:[#allocation7 + $0x1b0] sm:$0xff] }
 0x2cc   : > { %5997 = vmatprep.subr.bf16.mxu0 %v5996_v61  ;;  %v1566_v61 = vunpack.c.l.s4 %v7162_v60 }
 0x2cd   : > { %1518 = vmatmul.mubr.f32.vlgmr.msra.gmra.mrb[2].mxu1 %v1451_v3 }
 0x2ce   : > { %936 = vmatmul.mubr.f32.vlgmr.msra.gmra.mrb[0].mxu0 %v869_v5  ;;  %v1567_v5 = vunpack.c.0.s8 %v1566_v61 }
 0x2cf   : > { %5999 = vmatpush1.bf16.msra.mxu0 %v5998_v4  ;;  %1061 = vmatprep.mubr.f32.mxu0 %v7158_v0 }
 0x2d0   : > { %6001 = vmatprep.subr.bf16.mxu0 %v6000_v6  ;;  %v7556_v6 = vsub.s32 %v1567_v5, %v7424_v9 }
 0x2d3   : > { %6003 = vmatpush1.bf16.msra.mxu0 %v6002_v23 }
 0x2d4   : > { %6005 = vmatprep.subr.bf16.mxu0 %v6004_v39 }
 0x2d7   : > { %6007 = vmatpush1.bf16.msra.mxu0 %v6006_v26 }
 0x2d8   : > { %6009 = vmatprep.subr.bf16.mxu0 %v6008_v37  ;;  %v6156_v37 = vpack.c.bf16 %v1829_v17, %v1827_v14 }
 0x2db   : > { %6011 = vmatpush1.bf16.msra.mxu0 %v6010_v21  ;;  %v6160_v21 = vpack.c.bf16 %v1833_v20, %v1831_v19  ;;  %v1854_v19 = vld [vmem:[#allocation7 + $0x1e0] sm:$0xff] }
 0x2dc   : > { %6013 = vmatprep.subr.bf16.mxu0 %v6012_v22  ;;  %v1830_v22 = vld [vmem:[#allocation7 + $0x120] sm:$0xff] }
 0x2dd   : > { %v6162_v28 = vpack.c.bf16 %v1832_v24, %v1830_v22  ;;  %v1769_v24 = vld [vmem:[#allocation7 + $0x8] sm:$0xff] }
 0x2df   : > { %6015 = vmatpush1.bf16.msra.mxu0 %v6014_v29  ;;  %v6164_v29 = vpack.c.bf16 %v1837_v27, %v1835_v25  ;;  %v1771_v25 = vld [vmem:[#allocation7 + $0x18] sm:$0xff] }
 0x2e0   : > { %6017 = vmatprep.subr.bf16.mxu0 %v6016_v32  ;;  %v1834_v32 = vld [vmem:[#allocation7 + $0x140] sm:$0xff]  ;;  %v6188_v27 = vpack.c.bf16 %v1771_v25, %v1769_v24 }
 0x2e1   : > { %v6166_v34 = vpack.c.bf16 %v1836_v33, %v1834_v32 }
 0x2e3   : > { %6019 = vmatpush1.bf16.msra.mxu0 %v6018_v42  ;;  %v6168_v42 = vpack.c.bf16 %v1841_v38, %v1839_v36 }
 0x2e4   : > { %6021 = vmatprep.subr.bf16.mxu0 %v6020_v43  ;;  %v1838_v43 = vld [vmem:[#allocation7 + $0x160] sm:$0xff] }
 0x2e5   : > { %v6170_v46 = vpack.c.bf16 %v1840_v44, %v1838_v43 }
 0x2e7   : > { %6023 = vmatpush1.bf16.msra.mxu0 %v6022_v49  ;;  %v6172_v49 = vpack.c.bf16 %v1845_v48, %v1843_v47  ;;  %v7609_v47 = vsel %vm1762_vm11, %v7457_v15, 0.0 }
 0x2e8   : > { %6025 = vmatprep.subr.bf16.mxu0 %v6024_v50  ;;  %v1842_v50 = vld [vmem:[#allocation7 + $0x180] sm:$0xff] }
 0x2e9   : > { %v6174_v53 = vpack.c.bf16 %v1844_v52, %v1842_v50 }
 0x2eb   : > { %6027 = vmatpush1.bf16.msra.mxu0 %v6026_v54  ;;  %v1847_v54 = vld [vmem:[#allocation7 + $0x1a8] sm:$0xff] }
 0x2ec   : > { %6157 = vmatprep.subr.bf16.mxu0 %v6156_v37  ;;  %v1857_v37 = vld [vmem:[#allocation7 + $0x1f8] sm:$0xff] }
 0x2ee   : > { %1062 = vmatmul.mubr.f32.vlgmr.msra.gmra.mrb[0].mxu0 %v995_v55  ;;  %v1849_v55 = vld [vmem:[#allocation7 + $0x1b8] sm:$0xff] }
 0x2ef   : > { %1926 = vmatprep.mubr.f32.mxu0 %v7158_v0  ;;  %6159 = vmatpush1.bf16.msra.mxu0 %v6158_v31 }
 0x2f0   : > { %6161 = vmatprep.subr.bf16.mxu0 %v6160_v21 }
 0x2f3   : > { %6163 = vmatpush1.bf16.msra.mxu0 %v6162_v28 }
 0x2f4   : > { %6165 = vmatprep.subr.bf16.mxu0 %v6164_v29 }
 0x2f7   : > { %6167 = vmatpush1.bf16.msra.mxu0 %v6166_v34 }
 0x2f8   : > { %6169 = vmatprep.subr.bf16.mxu0 %v6168_v42 }
 0x2fb   : > { %6171 = vmatpush1.bf16.msra.mxu0 %v6170_v46 }
 0x2fc   : > { %6173 = vmatprep.subr.bf16.mxu0 %v6172_v49 }
 0x2ff   : > { %6175 = vmatpush1.bf16.msra.mxu0 %v6174_v53  ;;  %v7617_v53 = vcombine.high %v7609_v47, %v7609_v47 }
 0x3a0   : > { %v1519_v56 = vpop.f32.mrb[2].mxu1 }
 0x3a1   : > { %v1521_v57 = vpop.f32.mrb[3].mxu1 }
 0x3c1   : > { %v1063_v62 = vpop.f32.mrb[0].mxu0 }
 0x3c2   : > { %v6732_v1 = vadd.f32 %v1519_v56, %v1063_v62  ;;  %v1065_v2 = vpop.f32.mrb[1].mxu0  ;;  %v6176_v56 = vpack.c.bf16 %v1849_v55, %v1847_v54 }
 0x3c3   : > { %v6733_v3 = vadd.f32 %v1521_v57, %v1065_v2  ;;  %v1846_v57 = vld [vmem:[#allocation7 + $0x1a0] sm:$0xff] }
 0x3c4   : > { %v1538_v4 = vadd.f32 %v6732_v1, %v1531_v59  ;;  %v6178_v60 = vpack.c.bf16 %v1848_v58, %v1846_v57  ;;  %6177 = vmatprep.subr.bf16.mxu0 %v6176_v56  ;;  %v1853_v1 = vld [vmem:[#allocation7 + $0x1d8] sm:$0xff] }
 0x3c5   : > { %v1539_v51 = vadd.f32 %v6733_v3, %v1535_v63  ;;  %v1851_v63 = vld [vmem:[#allocation7 + $0x1c8] sm:$0xff] }
 0x3c6   : > { %v1540_v7 = vmax.f32 %v1538_v4, 0.0  ;;  %6179 = vmatpush1.bf16.msra.mxu0 %v6178_v60  ;;  %v6180_v5 = vpack.c.bf16 %v1853_v1, %v1851_v63  ;;  %v1812_v63 = vrot.slane %v7617_v53, 5 }
 0x3c7   : > { %v1541_v13 = vmax.f32 %v1539_v51, 0.0  ;;  %v1850_v51 = vld [vmem:[#allocation7 + $0x1c0] sm:$0xff] }
 0x3c8   : > { %6181 = vmatprep.subr.bf16.mxu0 %v6180_v5  ;;  %v1768_v5 = vld [vmem:[#allocation7] sm:$0xff] }
 0x3c9   : > { %v1544_v8 = vcombine.low %v1540_v7, %v1541_v13  ;;  %v1852_v7 = vld [vmem:[#allocation7 + $0x1d0] sm:$0xff] }
 0x3cb   : > { %v7559_v45 = vrot.slane %v1544_v8, %v7460_v16  ;;  %v6182_v8 = vpack.c.bf16 %v1852_v7, %v1850_v51  ;;  %v1770_v51 = vld [vmem:[#allocation7 + $0x10] sm:$0xff] }
 0x3cd   : > { %1555 = vrot.lane.b32.xlu0 %v7559_v45, %s7159_s28  ;;  %v7565_v41 = vrot.slane %v7559_v45, %v7556_v6  ;;  %v7572_v9 = vcombine.high %v7559_v45, %v7559_v45  ;;  %6183 = vmatpush1.bf16.msra.mxu0 %v6182_v8  ;;  %v1553_v28 = vrot.slane %v7559_v45, 2 }
 0x3cf   : > { %v1624_v11 = vrot.slane %v7565_v41, %v7427_v10  ;;  %v7578_v30 = vcombine.high %v7565_v41, %v7565_v41  ;;  %v1587_v62 = vrot.slane %v7572_v9, %v7556_v6  ;;  %v1579_v29 = vrot.slane %v1553_v28, %v7556_v6  ;;  %v1782_v28 = vld [vmem:[#allocation7 + $0x70] sm:$0xff] }
 0x3d1   : > { %1653 = vrot.lane.b32.xlu0 %v1624_v11, %s7159_s28  ;;  %v1628_v26 = vrot.slane %v7578_v30, %v7427_v10  ;;  %v1640_v18 = vrot.slane %v1587_v62, %v7427_v10  ;;  %v1580_v33 = vcombine.high %v1579_v29, %v1579_v29 }
 0x3d5   : > { %1557 = vrot.lane.b32.xlu0 %v7572_v9, %s7159_s28 }
 0x43f   : > { %v1556_v23 = vpop.permute.xlu0 %1555 }
 0x440   : > { %v1559_v39 = vrot.slane %v1556_v23, 2 }
 0x442   : > { %1561 = vrot.lane.b32.xlu1 %v1559_v39, %s7159_s28  ;;  %v1588_v39 = vcombine.high %v1587_v62, %v1587_v62 }
 0x443   : > { %v1654_v2 = vpop.permute.xlu0 %1653 }
 0x444   : > { %v1677_v14 = vsel %vm426_vm1, %v7565_v41, %v1654_v2  ;;  %v1644_v20 = vrot.slane %v1588_v39, %v7427_v10 }
 0x446   : > { %1655 = vrot.lane.b32.xlu1 %v1628_v26, %s7159_s28  ;;  %v1855_v26 = vld [vmem:[#allocation7 + $0x1e8] sm:$0xff] }
 0x447   : > { %v6184_v40 = vpack.c.bf16 %v1857_v37, %v1855_v26  ;;  %v1558_v21 = vpop.permute.xlu0 %1557  ;;  %v1772_v26 = vld [vmem:[#allocation7 + $0x20] sm:$0xff]  ;;  %v1774_v37 = vld [vmem:[#allocation7 + $0x30] sm:$0xff] }
 0x448   : > { %v1560_v22 = vrot.slane %v1558_v21, 2  ;;  %v1778_v21 = vld [vmem:[#allocation7 + $0x50] sm:$0xff] }
 0x449   : > { %6185 = vmatprep.subr.bf16.mxu0 %v6184_v40  ;;  %v1777_v40 = vld [vmem:[#allocation7 + $0x48] sm:$0xff] }
 0x4b4   : > { %v1562_v59 = vpop.permute.xlu1 %1561 }
 0x4b5   : > { %v1611_v61 = vrot.slane %v1562_v59, %v7556_v6  ;;  %v5182_v59 = vrot.slane %v7609_v47, 9 }
 0x4b7   : > { %v1612_v3 = vcombine.high %v1611_v61, %v1611_v61  ;;  %v1632_v4 = vrot.slane %v1611_v61, %v7427_v10 }
 0x4b8   : > { %v1656_v13 = vpop.permute.xlu1 %1655 }
 0x4b9   : > { %v1678_v11 = vsel %vm426_vm1, %v7578_v30, %v1656_v13  ;;  %1657 = vrot.lane.b32.xlu1 %v1632_v4, %s7159_s28  ;;  %v1636_v23 = vrot.slane %v1612_v3, %v7427_v10  ;;  %v1856_v30 = vld [vmem:[#allocation7 + $0x1f0] sm:$0xff]  ;;  %v7644_v13 = vsel %vm7628_vm14, %v5182_v59, %v1812_v63  ;;  %v2040_v63 = vld [vmem:[#allocation7 + $0x208] sm:$0xff] }
 0x4ba   : > { %v1693_v17 = vcombine.low %v1677_v14, %v1678_v11  ;;  %v6186_v31 = vpack.c.bf16 %v1856_v30, %v1854_v19  ;;  %v1773_v11 = vld [vmem:[#allocation7 + $0x28] sm:$0xff]  ;;  %v6190_v14 = vpack.c.bf16 %v1770_v51, %v1768_v5  ;;  %v1779_v19 = vld [vmem:[#allocation7 + $0x58] sm:$0xff]  ;;  %v6194_v30 = vpack.c.bf16 %v1774_v37, %v1772_v26 }
 0x4bb   : > { %1659 = vrot.lane.b32.xlu0 %v1636_v23, %s7159_s28  ;;  %v1775_v23 = vld [vmem:[#allocation7 + $0x38] sm:$0xff] }
 0x4bc   : > { %v1700_v41 = vrot.slane %v1693_v17, %v7460_v16  ;;  %6187 = vmatpush1.bf16.msra.mxu0 %v6186_v31  ;;  %v1776_v31 = vld [vmem:[#allocation7 + $0x40] sm:$0xff] }
 0x4bd   : > { %1661 = vrot.lane.b32.xlu1 %v1640_v18, %s7159_s28  ;;  %6189 = vmatprep.subr.bf16.mxu0 %v6188_v27  ;;  %v6192_v18 = vpack.c.bf16 %v1775_v23, %v1773_v11  ;;  %v6198_v24 = vpack.c.bf16 %v1778_v21, %v1776_v31  ;;  %v1780_v27 = vld [vmem:[#allocation7 + $0x60] sm:$0xff]  ;;  %v1554_v11 = vrot.slane %v7572_v9, 2 }
 0x4bf   : > { %1663 = vrot.lane.b32.xlu0 %v1644_v20, %s7159_s28  ;;  %v6196_v20 = vpack.c.bf16 %v1779_v19, %v1777_v40  ;;  %v1595_v37 = vrot.slane %v1554_v11, %v7556_v6  ;;  %v2056_v11 = vld [vmem:[#allocation7 + $0x288] sm:$0xff] }
 0x4c1   : > { %1725 = vrot.lane.b32.xlu1 %v1700_v41, %s7163_s29  ;;  %v1781_v41 = vld [vmem:[#allocation7 + $0x68] sm:$0xff]  ;;  %v1596_v21 = vcombine.high %v1595_v37, %v1595_v37 }
 0x4c3   : > { %1563 = vrot.lane.b32.xlu0 %v1560_v22, %s7159_s28  ;;  %v1783_v22 = vld [vmem:[#allocation7 + $0x78] sm:$0xff] }
 0x4c4   : > { %v6200_v25 = vpack.c.bf16 %v1783_v22, %v1781_v41 }
 0x52b   : > { %v1658_v32 = vpop.permute.xlu1 %1657 }
 0x52c   : > { %v1679_v36 = vsel %vm426_vm1, %v1579_v29, %v1658_v32  ;;  %v1785_v29 = vld [vmem:[#allocation7 + $0x88] sm:$0xff]  ;;  %v1787_v32 = vld [vmem:[#allocation7 + $0x98] sm:$0xff] }
 0x52d   : > { %v1660_v34 = vpop.permute.xlu0 %1659 }
 0x52e   : > { %v1680_v38 = vsel %vm426_vm1, %v1580_v33, %v1660_v34  ;;  %v6202_v33 = vpack.c.bf16 %v1782_v28, %v1780_v27  ;;  %v6204_v34 = vpack.c.bf16 %v1787_v32, %v1785_v29 }
 0x52f   : > { %v1701_v42 = vcombine.low %v1679_v36, %v1680_v38  ;;  %v1662_v43 = vpop.permute.xlu1 %1661  ;;  %v1784_v36 = vld [vmem:[#allocation7 + $0x80] sm:$0xff]  ;;  %v1786_v38 = vld [vmem:[#allocation7 + $0x90] sm:$0xff] }
 0x530   : > { %v1681_v45 = vsel %vm426_vm1, %v1587_v62, %v1662_v43  ;;  %v1791_v43 = vld [vmem:[#allocation7 + $0xb8] sm:$0xff] }
 0x531   : > { %v1664_v44 = vpop.permute.xlu0 %1663  ;;  %v1708_v46 = vrot.slane %v1701_v42, %v7460_v16  ;;  %v1789_v42 = vld [vmem:[#allocation7 + $0xa8] sm:$0xff] }
 0x532   : > { %v1682_v48 = vsel %vm426_vm1, %v1588_v39, %v1664_v44  ;;  %v6206_v44 = vpack.c.bf16 %v1786_v38, %v1784_v36 }
 0x533   : > { %v1709_v49 = vcombine.low %v1681_v45, %v1682_v48  ;;  %1727 = vrot.lane.b32.xlu1 %v1708_v46, %s7163_s29  ;;  %v1726_v50 = vpop.permute.xlu1 %1725  ;;  %v6208_v46 = vpack.c.bf16 %v1791_v43, %v1789_v42  ;;  %v1788_v45 = vld [vmem:[#allocation7 + $0xa0] sm:$0xff]  ;;  %v1790_v48 = vld [vmem:[#allocation7 + $0xb0] sm:$0xff] }
 0x534   : > { %v1737_v52 = vsel %vm339_vm0, 0.0, %v1726_v50  ;;  %v1795_v50 = vld [vmem:[#allocation7 + $0xd8] sm:$0xff] }
 0x535   : > { %v1742_v54 = vsel %vm1741_vm12, %v1737_v52, 0.0  ;;  %v1564_v55 = vpop.permute.xlu0 %1563  ;;  %v1716_v56 = vrot.slane %v1709_v49, %v7460_v16  ;;  %v1793_v49 = vld [vmem:[#allocation7 + $0xc8] sm:$0xff]  ;;  %v6210_v52 = vpack.c.bf16 %v1790_v48, %v1788_v45  ;;  %v2046_v48 = vld [vmem:[#allocation7 + $0x238] sm:$0xff] }
 0x536   : > { %v1750_v57 = vrot.slane %v1742_v54, 7  ;;  %v1619_v58 = vrot.slane %v1564_v55, %v7556_v6  ;;  %v6212_v54 = vpack.c.bf16 %v1795_v50, %v1793_v49  ;;  %v1792_v55 = vld [vmem:[#allocation7 + $0xc0] sm:$0xff]  ;;  %v2044_v45 = vld [vmem:[#allocation7 + $0x228] sm:$0xff] }
 0x537   : > { %1729 = vrot.lane.b32.xlu0 %v1716_v56, %s7163_s29  ;;  %v1794_v56 = vld [vmem:[#allocation7 + $0xd0] sm:$0xff] }
 0x538   : > { %v1758_v60 = vsel %vm426_vm1, 0.0, %v1750_v57  ;;  %v1620_v61 = vcombine.high %v1619_v58, %v1619_v58  ;;  %v1648_v62 = vrot.slane %v1619_v58, %v7427_v10  ;;  %v1797_v57 = vld [vmem:[#allocation7 + $0xe8] sm:$0xff]  ;;  %v1799_v58 = vld [vmem:[#allocation7 + $0xf8] sm:$0xff]  ;;  %v6214_v59 = vpack.c.bf16 %v1794_v56, %v1792_v55  ;;  %v2045_v55 = vld [vmem:[#allocation7 + $0x230] sm:$0xff] }
 0x539   : > { %v7633_v2 = vsel %vm1762_vm11, %v1758_v60, 0.0  ;;  %v6216_v60 = vpack.c.bf16 %v1799_v58, %v1797_v57  ;;  %v2048_v56 = vld [vmem:[#allocation7 + $0x248] sm:$0xff]  ;;  %v2050_v57 = vld [vmem:[#allocation7 + $0x258] sm:$0xff] }
 0x53a   : > { %v7637_v3 = vcombine.high %v7633_v2, %v7633_v2  ;;  %1665 = vrot.lane.b32.xlu1 %v1648_v62, %s7159_s28  ;;  %v1652_v4 = vrot.slane %v1620_v61, %v7427_v10  ;;  %v5183_v7 = vrot.slane %v7633_v2, 9  ;;  %v1796_v61 = vld [vmem:[#allocation7 + $0xe0] sm:$0xff]  ;;  %v1798_v62 = vld [vmem:[#allocation7 + $0xf0] sm:$0xff]  ;;  %v1939_v50 = vcombine.low %v7609_v47, %v7633_v2 }
 0x53b   : > { %v6218_v5 = vpack.c.bf16 %v1798_v62, %v1796_v61  ;;  %v2047_v61 = vld [vmem:[#allocation7 + $0x240] sm:$0xff]  ;;  %v2049_v62 = vld [vmem:[#allocation7 + $0x250] sm:$0xff] }
 0x53c   : > { %v1816_v8 = vrot.slane %v7637_v3, 5  ;;  %1667 = vrot.lane.b32.xlu0 %v1652_v4, %s7159_s28  ;;  %v2042_v4 = vld [vmem:[#allocation7 + $0x218] sm:$0xff] }
 0x53d   : > { %v6220_v51 = vpack.c.bf16 %v2042_v4, %v2040_v63  ;;  %v2052_v63 = vld [vmem:[#allocation7 + $0x268] sm:$0xff]  ;;  %v2054_v4 = vld [vmem:[#allocation7 + $0x278] sm:$0xff] }
 0x53e   : > { %v7650_v39 = vsel %vm7628_vm14, %v5183_v7, %v1816_v8 }
 0x53f   : > { %v1858_v17 = vcombine.low %v7644_v13, %v7650_v39 }
 0x541   : > { %1927 = vmatmul.mubr.f32.vlgmr.msra.gmra.mrb[2].mxu0 %v1858_v17 }
 0x542   : > { %6191 = vmatpush1.bf16.msra.mxu0 %v6190_v14  ;;  %1932 = vmatprep.mubr.f32.mxu0 %v7158_v0 }
 0x543   : > { %6193 = vmatprep.subr.bf16.mxu0 %v6192_v18 }
 0x546   : > { %6195 = vmatpush1.bf16.msra.mxu0 %v6194_v30 }
 0x547   : > { %6197 = vmatprep.subr.bf16.mxu0 %v6196_v20 }
 0x54a   : > { %6199 = vmatpush1.bf16.msra.mxu0 %v6198_v24 }
 0x54b   : > { %6201 = vmatprep.subr.bf16.mxu0 %v6200_v25 }
 0x54e   : > { %6203 = vmatpush1.bf16.msra.mxu0 %v6202_v33 }
 0x54f   : > { %6205 = vmatprep.subr.bf16.mxu0 %v6204_v34 }
 0x552   : > { %6207 = vmatpush1.bf16.msra.mxu0 %v6206_v44  ;;  %v2039_v44 = vld [vmem:[#allocation7 + $0x200] sm:$0xff] }
 0x553   : > { %6209 = vmatprep.subr.bf16.mxu0 %v6208_v46  ;;  %v2041_v46 = vld [vmem:[#allocation7 + $0x210] sm:$0xff] }
 0x554   : > { %v6222_v49 = vpack.c.bf16 %v2041_v46, %v2039_v44  ;;  %v2067_v46 = vld [vmem:[#allocation7 + $0x2e0] sm:$0xff] }
 0x556   : > { %6211 = vmatpush1.bf16.msra.mxu0 %v6210_v52  ;;  %v6224_v52 = vpack.c.bf16 %v2046_v48, %v2044_v45  ;;  %v2069_v45 = vld [vmem:[#allocation7 + $0x2f0] sm:$0xff]  ;;  %v2029_v48 = vrot.slane %v7637_v3, 6 }
 0x557   : > { %6213 = vmatprep.subr.bf16.mxu0 %v6212_v54  ;;  %v2043_v54 = vld [vmem:[#allocation7 + $0x220] sm:$0xff] }
 0x558   : > { %v6226_v58 = vpack.c.bf16 %v2045_v55, %v2043_v54  ;;  %v2159_v54 = vld [vmem:[#allocation7 + $0x318] sm:$0xff] }
 0x55a   : > { %6215 = vmatpush1.bf16.msra.mxu0 %v6214_v59 }
 0x55b   : > { %6217 = vmatprep.subr.bf16.mxu0 %v6216_v60  ;;  %v6228_v60 = vpack.c.bf16 %v2050_v57, %v2048_v56  ;;  %v5187_v56 = vrot.slane %v7633_v2, 10  ;;  %v6250_v57 = vpack.c.bf16 %v2069_v45, %v2067_v46  ;;  %v2174_v46 = vld [vmem:[#allocation7 + $0x390] sm:$0xff]  ;;  %v2177_v45 = vld [vmem:[#allocation7 + $0x3a8] sm:$0xff] }
 0x55e   : > { %6219 = vmatpush1.bf16.msra.mxu0 %v6218_v5  ;;  %v6230_v5 = vpack.c.bf16 %v2049_v62, %v2047_v61  ;;  %v2158_v61 = vld [vmem:[#allocation7 + $0x310] sm:$0xff] }
 0x55f   : > { %6221 = vmatprep.subr.bf16.mxu0 %v6220_v51  ;;  %v6232_v51 = vpack.c.bf16 %v2054_v4, %v2052_v63  ;;  %v2161_v63 = vld [vmem:[#allocation7 + $0x328] sm:$0xff]  ;;  %v2163_v4 = vld [vmem:[#allocation7 + $0x338] sm:$0xff] }
 0x5a5   : > { %v1728_v7 = vpop.permute.xlu1 %1727 }
 0x5a6   : > { %v1738_v8 = vsel %vm339_vm0, 0.0, %v1728_v7  ;;  %v2051_v7 = vld [vmem:[#allocation7 + $0x260] sm:$0xff] }
 0x5a7   : > { %v1743_v23 = vsel %vm1741_vm12, %v1738_v8, 0.0  ;;  %v2053_v8 = vld [vmem:[#allocation7 + $0x270] sm:$0xff] }
 0x5a8   : > { %v1751_v14 = vrot.slane %v1743_v23, 7  ;;  %v2058_v23 = vld [vmem:[#allocation7 + $0x298] sm:$0xff] }
 0x5a9   : > { %v1730_v17 = vpop.permute.xlu0 %1729 }
 0x5aa   : > { %v1759_v18 = vsel %vm426_vm1, 0.0, %v1751_v14  ;;  %v1739_v26 = vsel %vm339_vm0, 0.0, %v1730_v17  ;;  %v6234_v14 = vpack.c.bf16 %v2053_v8, %v2051_v7  ;;  %v6236_v17 = vpack.c.bf16 %v2058_v23, %v2056_v11  ;;  %v2160_v23 = vld [vmem:[#allocation7 + $0x320] sm:$0xff] }
 0x5ab   : > { %v7662_v40 = vsel %vm1762_vm11, %v1759_v18, 0.0  ;;  %v1744_v19 = vsel %vm1741_vm12, %v1739_v26, 0.0  ;;  %v2055_v18 = vld [vmem:[#allocation7 + $0x280] sm:$0xff]  ;;  %v2057_v26 = vld [vmem:[#allocation7 + $0x290] sm:$0xff]  ;;  %v6256_v11 = vpack.c.bf16 %v2163_v4, %v2161_v63  ;;  %v2185_v63 = vld [vmem:[#allocation7 + $0x3e8] sm:$0xff] }
 0x5ac   : > { %v7667_v30 = vcombine.high %v7662_v40, %v7662_v40  ;;  %v1752_v9 = vrot.slane %v1744_v19, 7  ;;  %v1666_v20 = vpop.permute.xlu1 %1665  ;;  %v5184_v32 = vrot.slane %v7662_v40, 9  ;;  %v2062_v19 = vld [vmem:[#allocation7 + $0x2b8] sm:$0xff] }
 0x5ad   : > { %v1683_v25 = vsel %vm426_vm1, %v1595_v37, %v1666_v20  ;;  %v2060_v37 = vld [vmem:[#allocation7 + $0x2a8] sm:$0xff]  ;;  %v2187_v4 = vld [vmem:[#allocation7 + $0x3f8] sm:$0xff] }
 0x5ae   : > { %v1760_v31 = vsel %vm426_vm1, 0.0, %v1752_v9  ;;  %v1668_v22 = vpop.permute.xlu0 %1667  ;;  %v1820_v28 = vrot.slane %v7667_v30, 5  ;;  %v6238_v9 = vpack.c.bf16 %v2057_v26, %v2055_v18  ;;  %v6240_v20 = vpack.c.bf16 %v2062_v19, %v2060_v37  ;;  %v2165_v18 = vld [vmem:[#allocation7 + $0x348] sm:$0xff]  ;;  %v2167_v26 = vld [vmem:[#allocation7 + $0x358] sm:$0xff] }
 0x5af   : > { %v7671_v41 = vsel %vm1762_vm11, %v1760_v31, 0.0  ;;  %v1684_v27 = vsel %vm426_vm1, %v1596_v21, %v1668_v22  ;;  %v2059_v31 = vld [vmem:[#allocation7 + $0x2a0] sm:$0xff]  ;;  %v2061_v21 = vld [vmem:[#allocation7 + $0x2b0] sm:$0xff]  ;;  %v2064_v22 = vld [vmem:[#allocation7 + $0x2c8] sm:$0xff] }
 0x5b0   : > { %v7675_v24 = vcombine.high %v7671_v41, %v7671_v41  ;;  %v1717_v29 = vcombine.low %v1683_v25, %v1684_v27  ;;  %v5185_v33 = vrot.slane %v7671_v41, 9  ;;  %v7686_v38 = vsel %vm7628_vm14, %v5184_v32, %v1820_v28  ;;  %v2066_v25 = vld [vmem:[#allocation7 + $0x2d8] sm:$0xff]  ;;  %v2065_v32 = vld [vmem:[#allocation7 + $0x2d0] sm:$0xff] }
 0x5b1   : > { %v7704_v59 = vcombine.low %v7662_v40, %v7671_v41  ;;  %v6242_v27 = vpack.c.bf16 %v2061_v21, %v2059_v31  ;;  %v6244_v28 = vpack.c.bf16 %v2066_v25, %v2064_v22  ;;  %v5189_v7 = vrot.slane %v7671_v41, 10  ;;  %v2166_v31 = vld [vmem:[#allocation7 + $0x350] sm:$0xff]  ;;  %v2169_v21 = vld [vmem:[#allocation7 + $0x368] sm:$0xff]  ;;  %v2171_v22 = vld [vmem:[#allocation7 + $0x378] sm:$0xff] }
 0x5b2   : > { %v1824_v34 = vrot.slane %v7675_v24, 5  ;;  %v1724_v36 = vrot.slane %v1717_v29, %v7460_v16  ;;  %v2063_v29 = vld [vmem:[#allocation7 + $0x2c0] sm:$0xff]  ;;  %v2037_v62 = vrot.slane %v7675_v24, 6 }
 0x5b4   : > { %v7690_v42 = vsel %vm7628_vm14, %v5185_v33, %v1824_v34  ;;  %1731 = vrot.lane.b32.xlu1 %v1724_v36, %s7163_s29  ;;  %v2068_v33 = vld [vmem:[#allocation7 + $0x2e8] sm:$0xff]  ;;  %v2070_v34 = vld [vmem:[#allocation7 + $0x2f8] sm:$0xff]  ;;  %v6246_v36 = vpack.c.bf16 %v2065_v32, %v2063_v29  ;;  %v7732_v24 = vsel %vm7711_vm3, %v5189_v7, %v2037_v62  ;;  %v2170_v29 = vld [vmem:[#allocation7 + $0x370] sm:$0xff] }
 0x5b5   : > { %v7695_v43 = vcombine.low %v7686_v38, %v7690_v42  ;;  %v6248_v44 = vpack.c.bf16 %v2070_v34, %v2068_v33  ;;  %v2173_v32 = vld [vmem:[#allocation7 + $0x388] sm:$0xff]  ;;  %v2175_v33 = vld [vmem:[#allocation7 + $0x398] sm:$0xff]  ;;  %v2182_v62 = vld [vmem:[#allocation7 + $0x3d0] sm:$0xff] }
 0x5b6   : > { %v2184_v7 = vld [vmem:[#allocation7 + $0x3e0] sm:$0xff] }
 0x5b7   : > { %1933 = vmatmul.mubr.f32.gmra.mrb[4].mxu0 %v7695_v43 }
 0x5b8   : > { %2007 = vmatprep.mubr.f32.mxu0 %v7158_v0 }
 0x5bb   : > { %2008 = vmatmul.mubr.f32.vlgmr.msra.gmra.mrb[2].mxu0 %v1939_v50  ;;  %v5186_v50 = vrot.slane %v7609_v47, 10 }
 0x5bc   : > { %6223 = vmatpush1.bf16.msra.mxu0 %v6222_v49  ;;  %2013 = vmatprep.mubr.f32.mxu0 %v7158_v0  ;;  %v2025_v49 = vrot.slane %v7617_v53, 6  ;;  %v7722_v53 = vsel %vm7711_vm3, %v5187_v56, %v2029_v48  ;;  %v2179_v48 = vld [vmem:[#allocation7 + $0x3b8] sm:$0xff]  ;;  %v2181_v56 = vld [vmem:[#allocation7 + $0x3c8] sm:$0xff] }
 0x5bd   : > { %6225 = vmatprep.subr.bf16.mxu0 %v6224_v52  ;;  %v2157_v52 = vld [vmem:[#allocation7 + $0x308] sm:$0xff] }
 0x5be   : > { %v7718_v3 = vsel %vm7711_vm3, %v5186_v50, %v2025_v49  ;;  %v6272_v50 = vpack.c.bf16 %v2179_v48, %v2177_v45  ;;  %v2293_v45 = vld [vmem:[#allocation7 + $0x470] sm:$0xff]  ;;  %v2296_v48 = vld [vmem:[#allocation7 + $0x488] sm:$0xff] }
 0x5bf   : > { %2014 = vmatmul.mubr.f32.gmra.mrb[4].mxu0 %v7704_v59  ;;  %v2071_v8 = vcombine.low %v7718_v3, %v7722_v53 }
 0x5c0   : > { %6227 = vmatpush1.bf16.msra.mxu0 %v6226_v58  ;;  %2139 = vmatprep.mubr.f32.mxu0 %v7158_v0  ;;  %v6252_v58 = vpack.c.bf16 %v2159_v54, %v2157_v52  ;;  %v2176_v52 = vld [vmem:[#allocation7 + $0x3a0] sm:$0xff]  ;;  %v2178_v54 = vld [vmem:[#allocation7 + $0x3b0] sm:$0xff] }
 0x5c1   : > { %6229 = vmatprep.subr.bf16.mxu0 %v6228_v60  ;;  %v2156_v60 = vld [vmem:[#allocation7 + $0x300] sm:$0xff] }
 0x5c4   : > { %6231 = vmatpush1.bf16.msra.mxu0 %v6230_v5  ;;  %v6254_v5 = vpack.c.bf16 %v2158_v61, %v2156_v60  ;;  %v2180_v61 = vld [vmem:[#allocation7 + $0x3c0] sm:$0xff] }
 0x5c5   : > { %6233 = vmatprep.subr.bf16.mxu0 %v6232_v51  ;;  %v2033_v51 = vrot.slane %v7667_v30, 6 }
 0x5c8   : > { %6235 = vmatpush1.bf16.msra.mxu0 %v6234_v14  ;;  %v2162_v14 = vld [vmem:[#allocation7 + $0x330] sm:$0xff] }
 0x5c9   : > { %6237 = vmatprep.subr.bf16.mxu0 %v6236_v17  ;;  %v5188_v17 = vrot.slane %v7662_v40, 10  ;;  %v6258_v37 = vpack.c.bf16 %v2162_v14, %v2160_v23  ;;  %v2282_v23 = vld [vmem:[#allocation7 + $0x418] sm:$0xff] }
 0x5cb   : > { %v7737_v30 = vsel %vm7711_vm3, %v5188_v17, %v2033_v51  ;;  %v6280_v51 = vpack.c.bf16 %v2187_v4, %v2185_v63  ;;  %v2301_v63 = vld [vmem:[#allocation7 + $0x4b0] sm:$0xff]  ;;  %v2304_v4 = vld [vmem:[#allocation7 + $0x4c8] sm:$0xff] }
 0x5cc   : > { %6239 = vmatpush1.bf16.msra.mxu0 %v6238_v9  ;;  %v7741_v19 = vcombine.low %v7737_v30, %v7732_v24  ;;  %v6260_v9 = vpack.c.bf16 %v2167_v26, %v2165_v18  ;;  %v2279_v18 = vld [vmem:[#allocation7 + $0x400] sm:$0xff]  ;;  %v2281_v26 = vld [vmem:[#allocation7 + $0x410] sm:$0xff] }
 0x5cd   : > { %6241 = vmatprep.subr.bf16.mxu0 %v6240_v20  ;;  %v2164_v20 = vld [vmem:[#allocation7 + $0x340] sm:$0xff] }
 0x5ce   : > { %v6262_v25 = vpack.c.bf16 %v2166_v31, %v2164_v20  ;;  %v6286_v20 = vpack.c.bf16 %v2281_v26, %v2279_v18  ;;  %v2189_v31 = vcombine.low %v7633_v2, %v7662_v40  ;;  %v2291_v40 = vld [vmem:[#allocation7 + $0x460] sm:$0xff] }
 0x5cf   : > { %v2307_v26 = vld [vmem:[#allocation7 + $0x4e0] sm:$0xff] }
 0x5d0   : > { %6243 = vmatpush1.bf16.msra.mxu0 %v6242_v27  ;;  %v6264_v27 = vpack.c.bf16 %v2171_v22, %v2169_v21  ;;  %v2283_v22 = vld [vmem:[#allocation7 + $0x420] sm:$0xff] }
 0x5d1   : > { %6245 = vmatprep.subr.bf16.mxu0 %v6244_v28  ;;  %v2168_v28 = vld [vmem:[#allocation7 + $0x360] sm:$0xff] }
 0x5d2   : > { %v6266_v34 = vpack.c.bf16 %v2170_v29, %v2168_v28  ;;  %v2290_v28 = vld [vmem:[#allocation7 + $0x458] sm:$0xff] }
 0x5d4   : > { %6247 = vmatpush1.bf16.msra.mxu0 %v6246_v36  ;;  %v6268_v36 = vpack.c.bf16 %v2175_v33, %v2173_v32  ;;  %v2287_v33 = vld [vmem:[#allocation7 + $0x440] sm:$0xff] }
 0x5d5   : > { %6249 = vmatprep.subr.bf16.mxu0 %v6248_v44  ;;  %v2172_v44 = vld [vmem:[#allocation7 + $0x380] sm:$0xff] }
 0x5d6   : > { %v6270_v49 = vpack.c.bf16 %v2174_v46, %v2172_v44  ;;  %v2294_v44 = vld [vmem:[#allocation7 + $0x478] sm:$0xff] }
 0x5d8   : > { %6251 = vmatpush1.bf16.msra.mxu0 %v6250_v57  ;;  %v2183_v57 = vld [vmem:[#allocation7 + $0x3d8] sm:$0xff] }
 0x5d9   : > { %6253 = vmatprep.subr.bf16.mxu0 %v6252_v58  ;;  %v6274_v58 = vpack.c.bf16 %v2178_v54, %v2176_v52  ;;  %v6276_v60 = vpack.c.bf16 %v2183_v57, %v2181_v56  ;;  %v2295_v54 = vld [vmem:[#allocation7 + $0x480] sm:$0xff]  ;;  %v2297_v56 = vld [vmem:[#allocation7 + $0x490] sm:$0xff]  ;;  %v2300_v57 = vld [vmem:[#allocation7 + $0x4a8] sm:$0xff] }
 0x5db   : > { %2140 = vmatmul.mubr.f32.vlgmr.msra.gmra.mrb[2].mxu0 %v2071_v8  ;;  %v2186_v8 = vld [vmem:[#allocation7 + $0x3f0] sm:$0xff] }
 0x5dc   : > { %6255 = vmatpush1.bf16.msra.mxu0 %v6254_v5  ;;  %2145 = vmatprep.mubr.f32.mxu0 %v7158_v0  ;;  %v6278_v5 = vpack.c.bf16 %v2182_v62, %v2180_v61  ;;  %v6282_v14 = vpack.c.bf16 %v2186_v8, %v2184_v7  ;;  %v2299_v62 = vld [vmem:[#allocation7 + $0x4a0] sm:$0xff] }
 0x5dd   : > { %6257 = vmatprep.subr.bf16.mxu0 %v6256_v11  ;;  %v2280_v11 = vld [vmem:[#allocation7 + $0x408] sm:$0xff]  ;;  %v2303_v8 = vld [vmem:[#allocation7 + $0x4c0] sm:$0xff] }
 0x5de   : > { %v6284_v17 = vpack.c.bf16 %v2282_v23, %v2280_v11  ;;  %v2305_v11 = vld [vmem:[#allocation7 + $0x4d0] sm:$0xff]  ;;  %v2308_v23 = vld [vmem:[#allocation7 + $0x4e8] sm:$0xff] }
 0x5df   : > { %2146 = vmatmul.mubr.f32.gmra.mrb[4].mxu0 %v7741_v19 }
 0x5e0   : > { %6259 = vmatpush1.bf16.msra.mxu0 %v6258_v37  ;;  %2257 = vmatprep.mubr.f32.mxu0 %v7158_v0  ;;  %v2284_v37 = vld [vmem:[#allocation7 + $0x428] sm:$0xff] }
 0x5e1   : > { %6261 = vmatprep.subr.bf16.mxu0 %v6260_v9  ;;  %v2286_v9 = vld [vmem:[#allocation7 + $0x438] sm:$0xff] }
 0x5e2   : > { %v6288_v21 = vpack.c.bf16 %v2286_v9, %v2284_v37  ;;  %v2309_v37 = vld [vmem:[#allocation7 + $0x4f0] sm:$0xff]  ;;  %v2401_v9 = vld [vmem:[#allocation7 + $0x508] sm:$0xff] }
 0x5e4   : > { %6263 = vmatpush1.bf16.msra.mxu0 %v6262_v25  ;;  %v2285_v25 = vld [vmem:[#allocation7 + $0x430] sm:$0xff] }
 0x5e5   : > { %6265 = vmatprep.subr.bf16.mxu0 %v6264_v27  ;;  %v2288_v27 = vld [vmem:[#allocation7 + $0x448] sm:$0xff]  ;;  %v6290_v29 = vpack.c.bf16 %v2285_v25, %v2283_v22 }
 0x5e6   : > { %v6292_v32 = vpack.c.bf16 %v2290_v28, %v2288_v27 }
 0x5e8   : > { %6267 = vmatpush1.bf16.msra.mxu0 %v6266_v34  ;;  %v2289_v34 = vld [vmem:[#allocation7 + $0x450] sm:$0xff] }
 0x5e9   : > { %6269 = vmatprep.subr.bf16.mxu0 %v6268_v36  ;;  %v2292_v36 = vld [vmem:[#allocation7 + $0x468] sm:$0xff]  ;;  %v6294_v46 = vpack.c.bf16 %v2289_v34, %v2287_v33 }
 0x5ea   : > { %v6296_v2 = vpack.c.bf16 %v2294_v44, %v2292_v36  ;;  %v2400_v36 = vld [vmem:[#allocation7 + $0x500] sm:$0xff]  ;;  %v2402_v44 = vld [vmem:[#allocation7 + $0x510] sm:$0xff] }
 0x5ec   : > { %6271 = vmatpush1.bf16.msra.mxu0 %v6270_v49  ;;  %v2298_v49 = vld [vmem:[#allocation7 + $0x498] sm:$0xff] }
 0x5ed   : > { %6273 = vmatprep.subr.bf16.mxu0 %v6272_v50  ;;  %v6298_v50 = vpack.c.bf16 %v2293_v45, %v2291_v40  ;;  %v6300_v52 = vpack.c.bf16 %v2298_v49, %v2296_v48  ;;  %v6318_v45 = vpack.c.bf16 %v2402_v44, %v2400_v36  ;;  %v2311_v49 = vcombine.low %v7650_v39, %v7686_v38  ;;  %v2408_v39 = vld [vmem:[#allocation7 + $0x540] sm:$0xff]  ;;  %v2410_v38 = vld [vmem:[#allocation7 + $0x550] sm:$0xff] }
 0x5ee   : > { %v6326_v1 = vpack.c.bf16 %v2410_v38, %v2408_v39  ;;  %v2521_v38 = vld [vmem:[#allocation7 + $0x620] sm:$0xff] }
 0x5f0   : > { %6275 = vmatpush1.bf16.msra.mxu0 %v6274_v58  ;;  %v2302_v58 = vld [vmem:[#allocation7 + $0x4b8] sm:$0xff] }
 0x5f1   : > { %6277 = vmatprep.subr.bf16.mxu0 %v6276_v60  ;;  %v6302_v60 = vpack.c.bf16 %v2297_v56, %v2295_v54  ;;  %v6304_v61 = vpack.c.bf16 %v2302_v58, %v2300_v57  ;;  %v2406_v54 = vld [vmem:[#allocation7 + $0x530] sm:$0xff]  ;;  %v2409_v56 = vld [vmem:[#allocation7 + $0x548] sm:$0xff]  ;;  %v2411_v57 = vld [vmem:[#allocation7 + $0x558] sm:$0xff] }
 0x5f4   : > { %6279 = vmatpush1.bf16.msra.mxu0 %v6278_v5  ;;  %v2306_v5 = vld [vmem:[#allocation7 + $0x4d8] sm:$0xff] }
 0x5f5   : > { %6281 = vmatprep.subr.bf16.mxu0 %v6280_v51  ;;  %v6306_v51 = vpack.c.bf16 %v2301_v63, %v2299_v62  ;;  %v6308_v7 = vpack.c.bf16 %v2306_v5, %v2304_v4  ;;  %v2413_v62 = vld [vmem:[#allocation7 + $0x568] sm:$0xff]  ;;  %v2415_v63 = vld [vmem:[#allocation7 + $0x578] sm:$0xff]  ;;  %v2412_v5 = vld [vmem:[#allocation7 + $0x560] sm:$0xff] }
 0x5f6   : > { %v6328_v4 = vpack.c.bf16 %v2415_v63, %v2413_v62  ;;  %v2523_v62 = vld [vmem:[#allocation7 + $0x630] sm:$0xff] }
 0x5f8   : > { %6283 = vmatpush1.bf16.msra.mxu0 %v6282_v14  ;;  %v2310_v14 = vld [vmem:[#allocation7 + $0x4f8] sm:$0xff] }
 0x5f9   : > { %6285 = vmatprep.subr.bf16.mxu0 %v6284_v17  ;;  %v6310_v17 = vpack.c.bf16 %v2305_v11, %v2303_v8  ;;  %v6312_v18 = vpack.c.bf16 %v2310_v14, %v2308_v23  ;;  %v2419_v8 = vld [vmem:[#allocation7 + $0x598] sm:$0xff]  ;;  %v2416_v23 = vld [vmem:[#allocation7 + $0x580] sm:$0xff]  ;;  %v2418_v14 = vld [vmem:[#allocation7 + $0x590] sm:$0xff] }
 0x5fb   : > { %2258 = vmatmul.mubr.f32.vlgmr.msra.gmra.mrb[2].mxu0 %v2189_v31  ;;  %v6314_v31 = vpack.c.bf16 %v2309_v37, %v2307_v26  ;;  %v6334_v26 = vpack.c.bf16 %v2418_v14, %v2416_v23  ;;  %v2531_v23 = vld [vmem:[#allocation7 + $0x670] sm:$0xff]  ;;  %v2534_v14 = vld [vmem:[#allocation7 + $0x688] sm:$0xff] }
 0x5fc   : > { %6287 = vmatpush1.bf16.msra.mxu0 %v6286_v20  ;;  %2263 = vmatprep.mubr.f32.mxu0 %v7158_v0  ;;  %v2403_v20 = vld [vmem:[#allocation7 + $0x518] sm:$0xff] }
 0x5fd   : > { %6289 = vmatprep.subr.bf16.mxu0 %v6288_v21  ;;  %v6316_v21 = vpack.c.bf16 %v2403_v20, %v2401_v9  ;;  %v2420_v9 = vld [vmem:[#allocation7 + $0x5a0] sm:$0xff]  ;;  %v2422_v20 = vld [vmem:[#allocation7 + $0x5b0] sm:$0xff] }
 0x600   : > { %6291 = vmatpush1.bf16.msra.mxu0 %v6290_v29 }
 0x601   : > { %6293 = vmatprep.subr.bf16.mxu0 %v6292_v32 }
 0x604   : > { %6295 = vmatpush1.bf16.msra.mxu0 %v6294_v46  ;;  %v2405_v46 = vld [vmem:[#allocation7 + $0x528] sm:$0xff] }
 0x605   : > { %6297 = vmatprep.subr.bf16.mxu0 %v6296_v2  ;;  %v2407_v2 = vld [vmem:[#allocation7 + $0x538] sm:$0xff] }
 0x608   : > { %6299 = vmatpush1.bf16.msra.mxu0 %v6298_v50  ;;  %v6320_v50 = vpack.c.bf16 %v2407_v2, %v2405_v46  ;;  %v2428_v46 = vld [vmem:[#allocation7 + $0x5e0] sm:$0xff]  ;;  %v2430_v2 = vld [vmem:[#allocation7 + $0x5f0] sm:$0xff] }
 0x609   : > { %6301 = vmatprep.subr.bf16.mxu0 %v6300_v52  ;;  %v2404_v52 = vld [vmem:[#allocation7 + $0x520] sm:$0xff] }
 0x60a   : > { %v6322_v58 = vpack.c.bf16 %v2406_v54, %v2404_v52  ;;  %v2519_v52 = vld [vmem:[#allocation7 + $0x610] sm:$0xff] }
 0x60c   : > { %6303 = vmatpush1.bf16.msra.mxu0 %v6302_v60 }
 0x60d   : > { %6305 = vmatprep.subr.bf16.mxu0 %v6304_v61  ;;  %v6324_v61 = vpack.c.bf16 %v2411_v57, %v2409_v56  ;;  %v2522_v56 = vld [vmem:[#allocation7 + $0x628] sm:$0xff]  ;;  %v2524_v57 = vld [vmem:[#allocation7 + $0x638] sm:$0xff] }
 0x60e   : > { %v6352_v39 = vpack.c.bf16 %v2524_v57, %v2522_v56  ;;  %v2632_v57 = vld [vmem:[#allocation7 + $0x700] sm:$0xff] }
 0x610   : > { %6307 = vmatpush1.bf16.msra.mxu0 %v6306_v51  ;;  %v2414_v51 = vld [vmem:[#allocation7 + $0x570] sm:$0xff] }
 0x611   : > { %6309 = vmatprep.subr.bf16.mxu0 %v6308_v7  ;;  %v2417_v7 = vld [vmem:[#allocation7 + $0x588] sm:$0xff]  ;;  %v6330_v11 = vpack.c.bf16 %v2414_v51, %v2412_v5  ;;  %v2527_v51 = vld [vmem:[#allocation7 + $0x650] sm:$0xff] }
 0x614   : > { %6311 = vmatpush1.bf16.msra.mxu0 %v6310_v17  ;;  %v2421_v17 = vld [vmem:[#allocation7 + $0x5a8] sm:$0xff] }
 0x615   : > { %6313 = vmatprep.subr.bf16.mxu0 %v6312_v18  ;;  %v2423_v18 = vld [vmem:[#allocation7 + $0x5b8] sm:$0xff] }
 0x616   : > { %v6336_v37 = vpack.c.bf16 %v2423_v18, %v2421_v17  ;;  %v2536_v17 = vld [vmem:[#allocation7 + $0x698] sm:$0xff] }
 0x618   : > { %6315 = vmatpush1.bf16.msra.mxu0 %v6314_v31  ;;  %v2425_v31 = vld [vmem:[#allocation7 + $0x5c8] sm:$0xff] }
 0x619   : > { %6317 = vmatprep.subr.bf16.mxu0 %v6316_v21  ;;  %v2427_v21 = vld [vmem:[#allocation7 + $0x5d8] sm:$0xff] }
 0x626   : > { %v1732_v22 = vpop.permute.xlu1 %1731 }
 0x627   : > { %v1740_v25 = vsel %vm339_vm0, 0.0, %v1732_v22  ;;  %v6338_v22 = vpack.c.bf16 %v2422_v20, %v2420_v9  ;;  %v2538_v9 = vld [vmem:[#allocation7 + $0x6a8] sm:$0xff]  ;;  %v2540_v20 = vld [vmem:[#allocation7 + $0x6b8] sm:$0xff]  ;;  %vm3773_vm0 = vcmask 1046528  }
 0x628   : > { %v1745_v27 = vsel %vm1741_vm12, %v1740_v25, 0.0  ;;  %v6340_v25 = vpack.c.bf16 %v2427_v21, %v2425_v31  ;;  %v6368_v21 = vpack.c.bf16 %v2540_v20, %v2538_v9 }
 0x629   : > { %v1753_v28 = vrot.slane %v1745_v27, 7  ;;  %v2424_v27 = vld [vmem:[#allocation7 + $0x5c0] sm:$0xff] }
 0x62b   : > { %v1761_v29 = vsel %vm426_vm1, 0.0, %v1753_v28  ;;  %v2426_v28 = vld [vmem:[#allocation7 + $0x5d0] sm:$0xff] }
 0x62c   : > { %v7752_v32 = vsel %vm1762_vm11, %v1761_v29, 0.0  ;;  %v2429_v29 = vld [vmem:[#allocation7 + $0x5e8] sm:$0xff]  ;;  %v6342_v36 = vpack.c.bf16 %v2426_v28, %v2424_v27  ;;  %v2544_v28 = vld [vmem:[#allocation7 + $0x6d8] sm:$0xff] }
 0x62d   : > { %v7756_v33 = vcombine.high %v7752_v32, %v7752_v32  ;;  %v2190_v34 = vcombine.low %v7671_v41, %v7752_v32  ;;  %v5190_v48 = vrot.slane %v7752_v32, 9  ;;  %v2542_v27 = vld [vmem:[#allocation7 + $0x6c8] sm:$0xff] }
 0x62f   : > { %2264 = vmatmul.mubr.f32.gmra.mrb[4].mxu0 %v2190_v34  ;;  %v2277_v40 = vrot.slane %v7756_v33, 5  ;;  %v2431_v34 = vld [vmem:[#allocation7 + $0x5f8] sm:$0xff]  ;;  %v2398_v54 = vrot.slane %v7756_v33, 6  ;;  %v6354_v33 = vpack.c.bf16 %v2523_v62, %v2521_v38  ;;  %v2636_v62 = vld [vmem:[#allocation7 + $0x720] sm:$0xff] }
 0x630   : > { %2379 = vmatprep.mubr.f32.mxu0 %v7158_v0  ;;  %v6344_v44 = vpack.c.bf16 %v2431_v34, %v2429_v29  ;;  %v6372_v34 = vpack.c.bf16 %v2544_v28, %v2542_v27 }
 0x631   : > { %v7767_v41 = vsel %vm7628_vm14, %v5190_v48, %v2277_v40  ;;  %v2518_v40 = vld [vmem:[#allocation7 + $0x608] sm:$0xff]  ;;  %v6346_v48 = vpack.c.bf16 %v2430_v2, %v2428_v46  ;;  %v2548_v2 = vld [vmem:[#allocation7 + $0x6f8] sm:$0xff] }
 0x632   : > { %v2312_v60 = vcombine.low %v7690_v42, %v7767_v41  ;;  %v6332_v42 = vpack.c.bf16 %v2419_v8, %v2417_v7  ;;  %v2530_v7 = vld [vmem:[#allocation7 + $0x668] sm:$0xff]  ;;  %v2532_v8 = vld [vmem:[#allocation7 + $0x678] sm:$0xff] }
 0x633   : > { %2380 = vmatmul.mubr.f32.vlgmr.msra.gmra.mrb[2].mxu0 %v2311_v49  ;;  %v2546_v46 = vld [vmem:[#allocation7 + $0x6e8] sm:$0xff] }
 0x634   : > { %6319 = vmatpush1.bf16.msra.mxu0 %v6318_v45  ;;  %2385 = vmatprep.mubr.f32.mxu0 %v7158_v0  ;;  %v2520_v45 = vld [vmem:[#allocation7 + $0x618] sm:$0xff] }
 0x635   : > { %6321 = vmatprep.subr.bf16.mxu0 %v6320_v50  ;;  %v6348_v49 = vpack.c.bf16 %v2520_v45, %v2518_v40  ;;  %v2517_v50 = vld [vmem:[#allocation7 + $0x600] sm:$0xff]  ;;  %v6376_v45 = vpack.c.bf16 %v2548_v2, %v2546_v46 }
 0x637   : > { %2386 = vmatmul.mubr.f32.gmra.mrb[4].mxu0 %v2312_v60  ;;  %v5191_v60 = vrot.slane %v7752_v32, 10 }
 0x638   : > { %6323 = vmatpush1.bf16.msra.mxu0 %v6322_v58  ;;  %2500 = vmatprep.mubr.f32.mxu0 %v7158_v0  ;;  %v6350_v58 = vpack.c.bf16 %v2519_v52, %v2517_v50  ;;  %v2633_v50 = vld [vmem:[#allocation7 + $0x708] sm:$0xff]  ;;  %v2635_v52 = vld [vmem:[#allocation7 + $0x718] sm:$0xff] }
 0x639   : > { %6325 = vmatprep.subr.bf16.mxu0 %v6324_v61  ;;  %v2432_v61 = vcombine.low %v7722_v53, %v7737_v30  ;;  %v7779_v63 = vsel %vm7711_vm3, %v5191_v60, %v2398_v54  ;;  %v2525_v30 = vld [vmem:[#allocation7 + $0x640] sm:$0xff]  ;;  %v6380_v56 = vpack.c.bf16 %v2635_v52, %v2633_v50  ;;  %v2637_v60 = vld [vmem:[#allocation7 + $0x728] sm:$0xff] }
 0x63a   : > { %v2433_v5 = vcombine.low %v7732_v24, %v7779_v63  ;;  %v6358_v55 = vpack.c.bf16 %v2527_v51, %v2525_v30  ;;  %v6364_v24 = vpack.c.bf16 %v2536_v17, %v2534_v14  ;;  %v2640_v51 = vld [vmem:[#allocation7 + $0x740] sm:$0xff]  ;;  %v2649_v14 = vld [vmem:[#allocation7 + $0x788] sm:$0xff]  ;;  %v2651_v17 = vld [vmem:[#allocation7 + $0x798] sm:$0xff] }
 0x63c   : > { %6327 = vmatpush1.bf16.msra.mxu0 %v6326_v1  ;;  %v2526_v1 = vld [vmem:[#allocation7 + $0x648] sm:$0xff] }
 0x63d   : > { %6329 = vmatprep.subr.bf16.mxu0 %v6328_v4  ;;  %v2528_v4 = vld [vmem:[#allocation7 + $0x658] sm:$0xff] }
 0x63e   : > { %v6356_v53 = vpack.c.bf16 %v2528_v4, %v2526_v1  ;;  %v2638_v1 = vld [vmem:[#allocation7 + $0x730] sm:$0xff]  ;;  %v2641_v4 = vld [vmem:[#allocation7 + $0x748] sm:$0xff] }
 0x640   : > { %6331 = vmatpush1.bf16.msra.mxu0 %v6330_v11  ;;  %v6360_v11 = vpack.c.bf16 %v2532_v8, %v2530_v7  ;;  %v2642_v7 = vld [vmem:[#allocation7 + $0x750] sm:$0xff]  ;;  %v2645_v8 = vld [vmem:[#allocation7 + $0x768] sm:$0xff] }
 0x641   : > { %6333 = vmatprep.subr.bf16.mxu0 %v6332_v42  ;;  %v2529_v42 = vld [vmem:[#allocation7 + $0x660] sm:$0xff] }
 0x642   : > { %v6362_v18 = vpack.c.bf16 %v2531_v23, %v2529_v42  ;;  %v2644_v42 = vld [vmem:[#allocation7 + $0x760] sm:$0xff]  ;;  %v2646_v23 = vld [vmem:[#allocation7 + $0x770] sm:$0xff] }
 0x644   : > { %6335 = vmatpush1.bf16.msra.mxu0 %v6334_v26  ;;  %v2533_v26 = vld [vmem:[#allocation7 + $0x680] sm:$0xff] }
 0x645   : > { %6337 = vmatprep.subr.bf16.mxu0 %v6336_v37  ;;  %v2535_v37 = vld [vmem:[#allocation7 + $0x690] sm:$0xff] }
 0x646   : > { %v6366_v31 = vpack.c.bf16 %v2535_v37, %v2533_v26  ;;  %v2653_v26 = vld [vmem:[#allocation7 + $0x7a8] sm:$0xff]  ;;  %v2655_v37 = vld [vmem:[#allocation7 + $0x7b8] sm:$0xff] }
 0x647   : > { %v6400_v20 = vpack.c.bf16 %v2655_v37, %v2653_v26  ;;  %v2769_v26 = vld [vmem:[#allocation7 + $0x8b0] sm:$0xff]  ;;  %v2772_v37 = vld [vmem:[#allocation7 + $0x8c8] sm:$0xff] }
 0x648   : > { %6339 = vmatpush1.bf16.msra.mxu0 %v6338_v22  ;;  %v2537_v22 = vld [vmem:[#allocation7 + $0x6a0] sm:$0xff] }
 0x649   : > { %6341 = vmatprep.subr.bf16.mxu0 %v6340_v25  ;;  %v2539_v25 = vld [vmem:[#allocation7 + $0x6b0] sm:$0xff] }
 0x64a   : > { %v6370_v29 = vpack.c.bf16 %v2539_v25, %v2537_v22  ;;  %v2657_v22 = vld [vmem:[#allocation7 + $0x7c8] sm:$0xff]  ;;  %v2659_v25 = vld [vmem:[#allocation7 + $0x7d8] sm:$0xff] }
 0x64b   : > { %v6404_v28 = vpack.c.bf16 %v2659_v25, %v2657_v22  ;;  %v2773_v22 = vld [vmem:[#allocation7 + $0x8d0] sm:$0xff]  ;;  %v2776_v25 = vld [vmem:[#allocation7 + $0x8e8] sm:$0xff] }
 0x64c   : > { %6343 = vmatpush1.bf16.msra.mxu0 %v6342_v36  ;;  %v2541_v36 = vld [vmem:[#allocation7 + $0x6c0] sm:$0xff] }
 0x64d   : > { %6345 = vmatprep.subr.bf16.mxu0 %v6344_v44  ;;  %v2543_v44 = vld [vmem:[#allocation7 + $0x6d0] sm:$0xff] }
 0x64e   : > { %v6374_v40 = vpack.c.bf16 %v2543_v44, %v2541_v36  ;;  %v2661_v36 = vld [vmem:[#allocation7 + $0x7e8] sm:$0xff]  ;;  %v2663_v44 = vld [vmem:[#allocation7 + $0x7f8] sm:$0xff] }
 0x64f   : > { %v6408_v2 = vpack.c.bf16 %v2663_v44, %v2661_v36  ;;  %v2777_v36 = vld [vmem:[#allocation7 + $0x8f0] sm:$0xff] }
 0x650   : > { %6347 = vmatpush1.bf16.msra.mxu0 %v6346_v48  ;;  %v2545_v48 = vld [vmem:[#allocation7 + $0x6e0] sm:$0xff] }
 0x651   : > { %6349 = vmatprep.subr.bf16.mxu0 %v6348_v49  ;;  %v2547_v49 = vld [vmem:[#allocation7 + $0x6f0] sm:$0xff] }
 0x652   : > { %v6378_v54 = vpack.c.bf16 %v2547_v49, %v2545_v48  ;;  %v2748_v48 = vld [vmem:[#allocation7 + $0x808] sm:$0xff]  ;;  %v2750_v49 = vld [vmem:[#allocation7 + $0x818] sm:$0xff] }
 0x653   : > { %2501 = vmatmul.mubr.f32.vlgmr.msra.gmra.mrb[2].mxu0 %v2432_v61  ;;  %v2639_v61 = vld [vmem:[#allocation7 + $0x738] sm:$0xff]  ;;  %v6412_v52 = vpack.c.bf16 %v2750_v49, %v2748_v48 }
 0x654   : > { %6351 = vmatpush1.bf16.msra.mxu0 %v6350_v58  ;;  %2506 = vmatprep.mubr.f32.mxu0 %v7158_v0  ;;  %v2634_v58 = vld [vmem:[#allocation7 + $0x710] sm:$0xff]  ;;  %v6384_v38 = vpack.c.bf16 %v2639_v61, %v2637_v60 }
 0x655   : > { %6353 = vmatprep.subr.bf16.mxu0 %v6352_v39  ;;  %v6382_v39 = vpack.c.bf16 %v2634_v58, %v2632_v57  ;;  %v2752_v57 = vld [vmem:[#allocation7 + $0x828] sm:$0xff]  ;;  %v2754_v58 = vld [vmem:[#allocation7 + $0x838] sm:$0xff] }
 0x656   : > { %v6416_v61 = vpack.c.bf16 %v2754_v58, %v2752_v57 }
 0x657   : > { %2507 = vmatmul.mubr.f32.gmra.mrb[4].mxu0 %v2433_v5  ;;  %v6386_v5 = vpack.c.bf16 %v2638_v1, %v2636_v62  ;;  %v2756_v62 = vld [vmem:[#allocation7 + $0x848] sm:$0xff]  ;;  %v2758_v1 = vld [vmem:[#allocation7 + $0x858] sm:$0xff] }
 0x658   : > { %6355 = vmatpush1.bf16.msra.mxu0 %v6354_v33  ;;  %2615 = vmatprep.mubr.f32.mxu0 %v7158_v0  ;;  %v2643_v33 = vld [vmem:[#allocation7 + $0x758] sm:$0xff] }
 0x659   : > { %6357 = vmatprep.subr.bf16.mxu0 %v6356_v53  ;;  %v2549_v53 = vcombine.low %v7752_v32, %v7609_v47  ;;  %v6388_v30 = vpack.c.bf16 %v2643_v33, %v2641_v4  ;;  %v6396_v47 = vpack.c.bf16 %v2651_v17, %v2649_v14  ;;  %v2648_v32 = vld [vmem:[#allocation7 + $0x780] sm:$0xff]  ;;  %v2664_v33 = vcombine.low %v7767_v41, %v7644_v13  ;;  %v2765_v14 = vld [vmem:[#allocation7 + $0x890] sm:$0xff]  ;;  %v2768_v17 = vld [vmem:[#allocation7 + $0x8a8] sm:$0xff] }
 0x65a   : > { %v2763_v41 = vld [vmem:[#allocation7 + $0x880] sm:$0xff] }
 0x65c   : > { %6359 = vmatpush1.bf16.msra.mxu0 %v6358_v55  ;;  %v2647_v55 = vld [vmem:[#allocation7 + $0x778] sm:$0xff] }
 0x65d   : > { %6361 = vmatprep.subr.bf16.mxu0 %v6360_v11  ;;  %v6390_v11 = vpack.c.bf16 %v2642_v7, %v2640_v51  ;;  %v2760_v51 = vld [vmem:[#allocation7 + $0x868] sm:$0xff]  ;;  %v2762_v7 = vld [vmem:[#allocation7 + $0x878] sm:$0xff] }
 0x660   : > { %6363 = vmatpush1.bf16.msra.mxu0 %v6362_v18  ;;  %v6394_v18 = vpack.c.bf16 %v2646_v23, %v2644_v42  ;;  %v2766_v42 = vld [vmem:[#allocation7 + $0x898] sm:$0xff] }
 0x661   : > { %6365 = vmatprep.subr.bf16.mxu0 %v6364_v24  ;;  %v2650_v24 = vld [vmem:[#allocation7 + $0x790] sm:$0xff] }
 0x662   : > { %v6398_v9 = vpack.c.bf16 %v2650_v24, %v2648_v32  ;;  %v2767_v24 = vld [vmem:[#allocation7 + $0x8a0] sm:$0xff] }
 0x664   : > { %6367 = vmatpush1.bf16.msra.mxu0 %v6366_v31  ;;  %v2652_v31 = vld [vmem:[#allocation7 + $0x7a0] sm:$0xff] }
 0x665   : > { %6369 = vmatprep.subr.bf16.mxu0 %v6368_v21  ;;  %v2654_v21 = vld [vmem:[#allocation7 + $0x7b0] sm:$0xff] }
 0x666   : > { %v6402_v27 = vpack.c.bf16 %v2654_v21, %v2652_v31  ;;  %v2771_v21 = vld [vmem:[#allocation7 + $0x8c0] sm:$0xff] }
 0x668   : > { %6371 = vmatpush1.bf16.msra.mxu0 %v6370_v29  ;;  %v2656_v29 = vld [vmem:[#allocation7 + $0x7c0] sm:$0xff] }
 0x669   : > { %6373 = vmatprep.subr.bf16.mxu0 %v6372_v34  ;;  %v2658_v34 = vld [vmem:[#allocation7 + $0x7d0] sm:$0xff] }
 0x66a   : > { %v6406_v46 = vpack.c.bf16 %v2658_v34, %v2656_v29  ;;  %v2775_v34 = vld [vmem:[#allocation7 + $0x8e0] sm:$0xff] }
 0x66b   : > { %v6442_v44 = vpack.c.bf16 %v2777_v36, %v2775_v34 }
 0x66c   : > { %6375 = vmatpush1.bf16.msra.mxu0 %v6374_v40  ;;  %v2660_v40 = vld [vmem:[#allocation7 + $0x7e0] sm:$0xff] }
 0x66d   : > { %6377 = vmatprep.subr.bf16.mxu0 %v6376_v45  ;;  %v2662_v45 = vld [vmem:[#allocation7 + $0x7f0] sm:$0xff] }
 0x66e   : > { %v6410_v50 = vpack.c.bf16 %v2662_v45, %v2660_v40 }
 0x670   : > { %6379 = vmatpush1.bf16.msra.mxu0 %v6378_v54  ;;  %v2747_v54 = vld [vmem:[#allocation7 + $0x800] sm:$0xff] }
 0x671   : > { %6381 = vmatprep.subr.bf16.mxu0 %v6380_v56  ;;  %v2749_v56 = vld [vmem:[#allocation7 + $0x810] sm:$0xff] }
 0x672   : > { %v6414_v60 = vpack.c.bf16 %v2749_v56, %v2747_v54 }
 0x673   : > { %2616 = vmatmul.mubr.f32.vlgmr.msra.gmra.mrb[2].mxu0 %v7704_v59  ;;  %v6392_v59 = vpack.c.bf16 %v2647_v55, %v2645_v8  ;;  %v2759_v55 = vld [vmem:[#allocation7 + $0x860] sm:$0xff] }
 0x674   : > { %6383 = vmatpush1.bf16.msra.mxu0 %v6382_v39  ;;  %2621 = vmatprep.mubr.f32.mxu0 %v7158_v0  ;;  %v2751_v39 = vld [vmem:[#allocation7 + $0x820] sm:$0xff] }
 0x675   : > { %6385 = vmatprep.subr.bf16.mxu0 %v6384_v38  ;;  %v2753_v38 = vld [vmem:[#allocation7 + $0x830] sm:$0xff] }
 0x676   : > { %v6418_v4 = vpack.c.bf16 %v2753_v38, %v2751_v39 }
 0x677   : > { %2622 = vmatmul.mubr.f32.gmra.mrb[4].mxu0 %v2549_v53  ;;  %v2755_v53 = vld [vmem:[#allocation7 + $0x840] sm:$0xff] }
 0x678   : > { %6387 = vmatpush1.bf16.msra.mxu0 %v6386_v5  ;;  %2730 = vmatprep.mubr.f32.mxu0 %v7158_v0  ;;  %v6420_v5 = vpack.c.bf16 %v2758_v1, %v2756_v62 }
 0x679   : > { %6389 = vmatprep.subr.bf16.mxu0 %v6388_v30  ;;  %v2757_v30 = vld [vmem:[#allocation7 + $0x850] sm:$0xff] }
 0x67a   : > { %v6422_v8 = vpack.c.bf16 %v2757_v30, %v2755_v53 }
 0x67c   : > { %6391 = vmatpush1.bf16.msra.mxu0 %v6390_v11  ;;  %v2761_v11 = vld [vmem:[#allocation7 + $0x870] sm:$0xff] }
 0x67d   : > { %6393 = vmatprep.subr.bf16.mxu0 %v6392_v59  ;;  %v2764_v59 = vld [vmem:[#allocation7 + $0x888] sm:$0xff]  ;;  %v6426_v23 = vpack.c.bf16 %v2761_v11, %v2759_v55 }
 0x67e   : > { %v6428_v13 = vpack.c.bf16 %v2766_v42, %v2764_v59 }
 0x680   : > { %6395 = vmatpush1.bf16.msra.mxu0 %v6394_v18  ;;  %v2770_v18 = vld [vmem:[#allocation7 + $0x8b8] sm:$0xff] }
 0x681   : > { %6397 = vmatprep.subr.bf16.mxu0 %v6396_v47  ;;  %v6430_v47 = vpack.c.bf16 %v2765_v14, %v2763_v41  ;;  %v6432_v32 = vpack.c.bf16 %v2770_v18, %v2768_v17 }
 0x684   : > { %6399 = vmatpush1.bf16.msra.mxu0 %v6398_v9  ;;  %v2774_v9 = vld [vmem:[#allocation7 + $0x8d8] sm:$0xff] }
 0x685   : > { %6401 = vmatprep.subr.bf16.mxu0 %v6400_v20  ;;  %v6434_v20 = vpack.c.bf16 %v2769_v26, %v2767_v24  ;;  %v6436_v31 = vpack.c.bf16 %v2774_v9, %v2772_v37 }
 0x688   : > { %6403 = vmatpush1.bf16.msra.mxu0 %v6402_v27  ;;  %v2778_v27 = vld [vmem:[#allocation7 + $0x8f8] sm:$0xff] }
 0x689   : > { %6405 = vmatprep.subr.bf16.mxu0 %v6404_v28  ;;  %v6438_v28 = vpack.c.bf16 %v2773_v22, %v2771_v21  ;;  %v6440_v29 = vpack.c.bf16 %v2778_v27, %v2776_v25 }
 0x68c   : > { %6407 = vmatpush1.bf16.msra.mxu0 %v6406_v46  ;;  %v2779_v46 = vcombine.low %v7779_v63, %v7718_v3 }
 0x68d   : > { %6409 = vmatprep.subr.bf16.mxu0 %v6408_v2  ;;  %v2862_v2 = vld [vmem:[#allocation9 + $0x4] sm:$0x3] }
 0x68e   : > { %v2867_v40 = vrot.slane %v2862_v2, %v7427_v10  ;;  %v2871_v45 = vrot.slane %v2862_v2, %v7430_v12 }
 0x690   : > { %6411 = vmatpush1.bf16.msra.mxu0 %v6410_v50 }
 0x691   : > { %6413 = vmatprep.subr.bf16.mxu0 %v6412_v52 }
 0x693   : > { %2731 = vmatmul.mubr.f32.vlgmr.msra.gmra.mrb[2].mxu0 %v7695_v43  ;;  %v6424_v43 = vpack.c.bf16 %v2762_v7, %v2760_v51 }
 0x694   : > { %6415 = vmatpush1.bf16.msra.mxu0 %v6414_v60  ;;  %2736 = vmatprep.mubr.f32.mxu0 %v7158_v0 }
 0x695   : > { %6417 = vmatprep.subr.bf16.mxu0 %v6416_v61 }
 0x697   : > { %2737 = vmatmul.mubr.f32.gmra.mrb[4].mxu0 %v2664_v33 }
 0x698   : > { %6419 = vmatpush1.bf16.msra.mxu0 %v6418_v4  ;;  %2845 = vmatprep.mubr.f32.mxu0 %v7158_v0 }
 0x699   : > { %6421 = vmatprep.subr.bf16.mxu0 %v6420_v5 }
 0x69c   : > { %6423 = vmatpush1.bf16.msra.mxu0 %v6422_v8 }
 0x69d   : > { %6425 = vmatprep.subr.bf16.mxu0 %v6424_v43 }
 0x6a0   : > { %6427 = vmatpush1.bf16.msra.mxu0 %v6426_v23 }
 0x6a1   : > { %6429 = vmatprep.subr.bf16.mxu0 %v6428_v13 }
 0x6a4   : > { %6431 = vmatpush1.bf16.msra.mxu0 %v6430_v47 }
 0x6a5   : > { %6433 = vmatprep.subr.bf16.mxu0 %v6432_v32 }
 0x6a8   : > { %6435 = vmatpush1.bf16.msra.mxu0 %v6434_v20 }
 0x6a9   : > { %6437 = vmatprep.subr.bf16.mxu0 %v6436_v31 }
 0x6ac   : > { %6439 = vmatpush1.bf16.msra.mxu0 %v6438_v28 }
 0x6ad   : > { %6441 = vmatprep.subr.bf16.mxu0 %v6440_v29 }
 0x6b0   : > { %6443 = vmatpush1.bf16.msra.mxu0 %v6442_v44 }
 0x6b3   : > { %2846 = vmatmul.mubr.f32.vlgmr.msra.gmra.mrb[2].mxu0 %v7741_v19 }
 0x6b4   : > { %2851 = vmatprep.mubr.f32.mxu0 %v7158_v0 }
 0x6b7   : > { %2852 = vmatmul.mubr.f32.gmra.mrb[4].mxu0 %v2779_v46 }
 0x786   : > { %v2847_v48 = vpop.f32.mrb[2].mxu0 }
 0x787   : > { %v2874_v49 = vadd.f32 %v2867_v40, %v2847_v48  ;;  %v2849_v50 = vpop.f32.mrb[3].mxu0 }
 0x788   : > { %v2875_v52 = vadd.f32 %v2871_v45, %v2849_v50 }
 0x789   : > { %v2878_v54 = vmax.f32 %v2874_v49, 0.0 }
 0x78a   : > { %v2879_v56 = vmax.f32 %v2875_v52, 0.0  ;;  %v2853_v57 = vpop.f32.mrb[4].mxu0 }
 0x78b   : > { %v2876_v58 = vadd.f32 %v2867_v40, %v2853_v57  ;;  %v2855_v19 = vpop.f32.mrb[5].mxu0  ;;  %v3806_v57 = vld [vmem:[%s8848_s4 + $0x80] sm:$0xff] }
 0x78c   : > { %v7801_v60 = vcombine.low %v2878_v54, %v2879_v56  ;;  %v7803_v0 = vcombine.high %v2878_v54, %v2879_v56  ;;  %v2877_v3 = vadd.f32 %v2871_v45, %v2855_v19 }
 0x78d   : > { %v2880_v63 = vmax.f32 %v2876_v58, 0.0  ;;  %v3807_v58 = vld [vmem:[%s8848_s4 + $0x88] sm:$0xff] }
 0x78e   : > { %2896 = vrot.lane.b32.xlu1 %v7803_v0, %s7159_s28  ;;  %2894 = vrot.lane.b32.xlu0 %v7801_v60, %s7159_s28  ;;  %v2881_v12 = vmax.f32 %v2877_v3, 0.0  ;;  %v2920_v38 = vrot.slane %v7801_v60, %v7556_v6  ;;  %v2968_v53 = vrot.slane %v7803_v0, %v7556_v6  ;;  %v6444_v3 = vpack.c.bf16 %v3807_v58, %v3806_v57 }
 0x790   : > { %v7809_v61 = vcombine.low %v2880_v63, %v2881_v12  ;;  %v7811_v39 = vcombine.high %v2880_v63, %v2881_v12  ;;  %v2921_v4 = vcombine.high %v2920_v38, %v2920_v38  ;;  %v7825_v8 = vrot.slane %v2920_v38, %v7556_v6  ;;  %6445 = vmatprep.subr.bf16.mxu1 %v6444_v3 }
 0x791   : > { %v2969_v43 = vcombine.high %v2968_v53, %v2968_v53  ;;  %v7854_v17 = vrot.slane %v2968_v53, %v7556_v6  ;;  %6447 = vmatpush3.bf16.msra.mxu1 %v6444_v3 }
 0x792   : > { %2898 = vrot.lane.b32.xlu0 %v7809_v61, %s7159_s28  ;;  %v7822_v51 = vrot.slane %v2921_v4, %v7556_v6  ;;  %v3237_v59 = vrot.slane %v7825_v8, %v7427_v10  ;;  %v7840_v42 = vcombine.high %v7825_v8, %v7825_v8  ;;  %v3016_v23 = vrot.slane %v7809_v61, %v7556_v6 }
 0x793   : > { %v7849_v41 = vrot.slane %v2969_v43, %v7556_v6  ;;  %v3269_v24 = vrot.slane %v7854_v17, %v7427_v10  ;;  %v7868_v26 = vcombine.high %v7854_v17, %v7854_v17  ;;  %v3064_v37 = vrot.slane %v7811_v39, %v7556_v6 }
 0x794   : > { %v3241_v55 = vrot.slane %v7822_v51, %v7427_v10  ;;  %v7834_v11 = vcombine.high %v7822_v51, %v7822_v51  ;;  %v3245_v14 = vrot.slane %v7840_v42, %v7427_v10  ;;  %v3017_v18 = vcombine.high %v3016_v23, %v3016_v23 }
 0x795   : > { %v3273_v47 = vrot.slane %v7849_v41, %v7427_v10  ;;  %v7862_v32 = vcombine.high %v7849_v41, %v7849_v41  ;;  %v3277_v31 = vrot.slane %v7868_v26, %v7427_v10  ;;  %v7882_v21 = vrot.slane %v3016_v23, %v7556_v6 }
 0x796   : > { %v3249_v13 = vrot.slane %v7834_v11, %v7427_v10  ;;  %v7877_v20 = vrot.slane %v3017_v18, %v7556_v6  ;;  %v3065_v22 = vcombine.high %v3064_v37, %v3064_v37  ;;  %v7908_v46 = vrot.slane %v3064_v37, %v7556_v6  ;;  %v3811_v18 = vld [vmem:[%s8848_s4 + $0xa8] sm:$0xff] }
 0x797   : > { %v3281_v9 = vrot.slane %v7862_v32, %v7427_v10  ;;  %v3301_v28 = vrot.slane %v7882_v21, %v7427_v10  ;;  %v7896_v29 = vcombine.high %v7882_v21, %v7882_v21 }
 0x798   : > { %v3305_v25 = vrot.slane %v7877_v20, %v7427_v10  ;;  %v7890_v27 = vcombine.high %v7877_v20, %v7877_v20  ;;  %v7903_v36 = vrot.slane %v3065_v22, %v7556_v6  ;;  %v3333_v40 = vrot.slane %v7908_v46, %v7427_v10 }
 0x799   : > { %v3309_v44 = vrot.slane %v7896_v29, %v7427_v10 }
 0x79a   : > { %v3313_v34 = vrot.slane %v7890_v27, %v7427_v10  ;;  %v3337_v2 = vrot.slane %v7903_v36, %v7427_v10 }
 0x800   : > { %v2897_v62 = vpop.permute.xlu1 %2896  ;;  %v2895_v1 = vpop.permute.xlu0 %2894 }
 0x801   : > { %v2903_v33 = vrot.slane %v2897_v62, 4  ;;  %v2902_v5 = vrot.slane %v2895_v1, 4 }
 0x803   : > { %2906 = vrot.lane.b32.xlu1 %v2902_v5, %s7159_s28  ;;  %2908 = vrot.lane.b32.xlu0 %v2903_v33, %s7159_s28  ;;  %v3808_v33 = vld [vmem:[%s8848_s4 + $0x90] sm:$0xff]  ;;  %v3809_v5 = vld [vmem:[%s8848_s4 + $0x98] sm:$0xff] }
 0x804   : > { %v2899_v30 = vpop.permute.xlu0 %2898 }
 0x805   : > { %v2904_v7 = vrot.slane %v2899_v30, 4 }
 0x807   : > { %2900 = vrot.lane.b32.xlu0 %v7811_v39, %s7159_s28  ;;  %2910 = vrot.lane.b32.xlu1 %v2904_v7, %s7159_s28  ;;  %v6448_v7 = vpack.c.bf16 %v3809_v5, %v3808_v33 }
 0x809   : > { %6449 = vmatprep.subr.bf16.mxu1 %v6448_v7 }
 0x80a   : > { %6451 = vmatpush3.bf16.msra.mxu1 %v6448_v7 }
 0x80b   : > { %3364 = vrot.lane.b32.xlu0 %v3241_v55, %s7159_s28  ;;  %3362 = vrot.lane.b32.xlu1 %v3237_v59, %s7159_s28 }
 0x80f   : > { %3368 = vrot.lane.b32.xlu0 %v3249_v13, %s7159_s28  ;;  %3366 = vrot.lane.b32.xlu1 %v3245_v14, %s7159_s28  ;;  %v3810_v14 = vld [vmem:[%s8848_s4 + $0xa0] sm:$0xff] }
 0x810   : > { %v6452_v37 = vpack.c.bf16 %v3811_v18, %v3810_v14 }
 0x812   : > { %6453 = vmatprep.subr.bf16.mxu1 %v6452_v37 }
 0x813   : > { %3380 = vrot.lane.b32.xlu0 %v3273_v47, %s7159_s28  ;;  %3378 = vrot.lane.b32.xlu1 %v3269_v24, %s7159_s28 }
 0x814   : > { %6455 = vmatpush3.bf16.msra.mxu1 %v6452_v37 }
 0x817   : > { %3384 = vrot.lane.b32.xlu0 %v3281_v9, %s7159_s28  ;;  %3382 = vrot.lane.b32.xlu1 %v3277_v31, %s7159_s28 }
 0x81b   : > { %3396 = vrot.lane.b32.xlu0 %v3305_v25, %s7159_s28  ;;  %3394 = vrot.lane.b32.xlu1 %v3301_v28, %s7159_s28 }
 0x81f   : > { %3400 = vrot.lane.b32.xlu0 %v3313_v34, %s7159_s28  ;;  %3398 = vrot.lane.b32.xlu1 %v3309_v44, %s7159_s28  ;;  %v3812_v34 = vld [vmem:[%s8848_s4 + $0xb0] sm:$0xff]  ;;  %v3813_v44 = vld [vmem:[%s8848_s4 + $0xb8] sm:$0xff] }
 0x823   : > { %3412 = vrot.lane.b32.xlu0 %v3337_v2, %s7159_s28  ;;  %3410 = vrot.lane.b32.xlu1 %v3333_v40, %s7159_s28  ;;  %v6456_v40 = vpack.c.bf16 %v3813_v44, %v3812_v34  ;;  %v3774_v34 = vrot.slane %v7457_v15, 1 }
 0x825   : > { %6457 = vmatprep.subr.bf16.mxu1 %v6456_v40 }
 0x826   : > { %6459 = vmatpush3.bf16.msra.mxu1 %v6456_v40 }
 0x875   : > { %v2907_v45 = vpop.permute.xlu1 %2906  ;;  %v2909_v48 = vpop.permute.xlu0 %2908 }
 0x876   : > { %v3144_v49 = vrot.slane %v2907_v45, %v7556_v6  ;;  %v3168_v50 = vrot.slane %v2909_v48, %v7556_v6 }
 0x878   : > { %v3145_v52 = vcombine.high %v3144_v49, %v3144_v49  ;;  %v3152_v54 = vrot.slane %v3144_v49, %v7556_v6  ;;  %v3169_v56 = vcombine.high %v3168_v50, %v3168_v50  ;;  %v3176_v38 = vrot.slane %v3168_v50, %v7556_v6 }
 0x879   : > { %v7927_v19 = vpop.permute.xlu0 %2900  ;;  %v2911_v12 = vpop.permute.xlu1 %2910 }
 0x87a   : > { %v3159_v63 = vrot.slane %v3145_v52, %v7556_v6  ;;  %v3253_v62 = vrot.slane %v3152_v54, %v7427_v10  ;;  %v3183_v1 = vrot.slane %v3169_v56, %v7556_v6  ;;  %v3160_v43 = vcombine.high %v3152_v54, %v3152_v54  ;;  %v3814_v54 = vld [vmem:[%s8848_s4 + $0xc0] sm:$0xff]  ;;  %v3815_v56 = vld [vmem:[%s8848_s4 + $0xc8] sm:$0xff] }
 0x87b   : > { %v3285_v55 = vrot.slane %v3176_v38, %v7427_v10  ;;  %v3192_v59 = vrot.slane %v2911_v12, %v7556_v6  ;;  %v3184_v9 = vcombine.high %v3176_v38, %v3176_v38  ;;  %v6460_v58 = vpack.c.bf16 %v3815_v56, %v3814_v54 }
 0x87c   : > { %v3257_v4 = vrot.slane %v3159_v63, %v7427_v10  ;;  %3370 = vrot.lane.b32.xlu1 %v3253_v62, %s7159_s28  ;;  %v3289_v23 = vrot.slane %v3183_v1, %v7427_v10  ;;  %v3161_v13 = vcombine.high %v3159_v63, %v3159_v63  ;;  %v3261_v31 = vrot.slane %v3160_v43, %v7427_v10 }
 0x87d   : > { %v7941_v53 = vpop.permute.xlu0 %3364  ;;  %v3363_v30 = vpop.permute.xlu1 %3362  ;;  %v3193_v22 = vcombine.high %v3192_v59, %v3192_v59  ;;  %v3185_v28 = vcombine.high %v3183_v1, %v3183_v1  ;;  %v3200_v48 = vrot.slane %v3192_v59, %v7556_v6  ;;  %v3293_v49 = vrot.slane %v3184_v9, %v7427_v10  ;;  %6461 = vmatprep.subr.bf16.mxu1 %v6460_v58  ;;  %v3816_v1 = vld [vmem:[%s8848_s4 + $0xd0] sm:$0xff] }
 0x87e   : > { %3372 = vrot.lane.b32.xlu0 %v3257_v4, %s7159_s28  ;;  %v3265_v25 = vrot.slane %v3161_v13, %v7427_v10  ;;  %v3817_v4 = vld [vmem:[%s8848_s4 + $0xd8] sm:$0xff]  ;;  %6463 = vmatpush3.bf16.msra.mxu1 %v6460_v58  ;;  %v7993_v59 = vcombine.high %v7908_v46, %v7908_v46  ;;  %v2905_v54 = vrot.slane %v7927_v19, 4  ;;  %v3742_v19 = vld [vmem:[%s8848_s4 + $0x8] sm:$0xff] }
 0x87f   : > { %v3207_v50 = vrot.slane %v3193_v22, %v7556_v6  ;;  %v3297_v52 = vrot.slane %v3185_v28, %v7427_v10  ;;  %v3208_v63 = vcombine.high %v3200_v48, %v3200_v48  ;;  %v3317_v12 = vrot.slane %v3200_v48, %v7427_v10 }
 0x880   : > { %3386 = vrot.lane.b32.xlu1 %v3285_v55, %s7159_s28  ;;  %v6464_v43 = vpack.c.bf16 %v3817_v4, %v3816_v1  ;;  %v3341_v22 = vrot.slane %v7993_v59, %v7427_v10  ;;  %v8034_v28 = vsel %vm426_vm1, %v7453_v35, 0.0  ;;  %v2890_v4 = vrot.slane %v7801_v60, 4 }
 0x881   : > { %v3369_v47 = vpop.permute.xlu0 %3368  ;;  %v3367_v24 = vpop.permute.xlu1 %3366  ;;  %v3321_v38 = vrot.slane %v3207_v50, %v7427_v10  ;;  %v3209_v62 = vcombine.high %v3207_v50, %v3207_v50  ;;  %v3325_v13 = vrot.slane %v3208_v63, %v7427_v10  ;;  %v3775_v40 = vrot.slane %v8034_v28, 1 }
 0x882   : > { %3388 = vrot.lane.b32.xlu0 %v3289_v23, %s7159_s28  ;;  %v3460_v33 = vsel %vm426_vm1, %v7840_v42, %v3367_v24  ;;  %v3461_v5 = vsel %vm426_vm1, %v7834_v11, %v3369_v47  ;;  %v7997_v23 = vcombine.high %v7903_v36, %v7903_v36  ;;  %v3458_v42 = vsel %vm426_vm1, %v7825_v8, %v3363_v30  ;;  %v3818_v47 = vld [vmem:[%s8848_s4 + $0xe0] sm:$0xff]  ;;  %v3819_v24 = vld [vmem:[%s8848_s4 + $0xe8] sm:$0xff] }
 0x883   : > { %v3459_v11 = vsel %vm426_vm1, %v7822_v51, %v7941_v53  ;;  %6465 = vmatprep.subr.bf16.mxu1 %v6464_v43  ;;  %v3523_v14 = vcombine.low %v3460_v33, %v3461_v5  ;;  %v3329_v18 = vrot.slane %v3209_v62, %v7427_v10  ;;  %v6468_v53 = vpack.c.bf16 %v3819_v24, %v3818_v47 }
 0x884   : > { %3374 = vrot.lane.b32.xlu1 %v3261_v31, %s7159_s28  ;;  %6467 = vmatpush3.bf16.msra.mxu1 %v6464_v43  ;;  %v3522_v30 = vcombine.low %v3458_v42, %v3459_v11  ;;  %v2891_v33 = vrot.slane %v7803_v0, 4 }
 0x885   : > { %v3381_v2 = vpop.permute.xlu0 %3380  ;;  %v3379_v45 = vpop.permute.xlu1 %3378  ;;  %6469 = vmatprep.subr.bf16.mxu1 %v6468_v53  ;;  %v3537_v44 = vrot.slane %v3523_v14, %v7460_v16 }
 0x886   : > { %3376 = vrot.lane.b32.xlu0 %v3265_v25, %s7159_s28  ;;  %v3467_v37 = vsel %vm426_vm1, %v7849_v41, %v3381_v2  ;;  %v3820_v25 = vld [vmem:[%s8848_s4 + $0xf0] sm:$0xff]  ;;  %v3821_v41 = vld [vmem:[%s8848_s4 + $0xf8] sm:$0xff]  ;;  %v2992_v11 = vrot.slane %v2891_v33, %v7556_v6 }
 0x888   : > { %3390 = vrot.lane.b32.xlu1 %v3293_v49, %s7159_s28  ;;  %6471 = vmatpush3.bf16.msra.mxu1 %v6468_v53  ;;  %v3530_v49 = vrot.slane %v3522_v30, %v7460_v16 }
 0x889   : > { %v3385_v57 = vpop.permute.xlu0 %3384  ;;  %v3383_v3 = vpop.permute.xlu1 %3382 }
 0x88a   : > { %3392 = vrot.lane.b32.xlu0 %v3297_v52, %s7159_s28  ;;  %v3468_v8 = vsel %vm426_vm1, %v7868_v26, %v3383_v3  ;;  %v3469_v51 = vsel %vm426_vm1, %v7862_v32, %v3385_v57  ;;  %v3345_v26 = vrot.slane %v7997_v23, %v7427_v10  ;;  %v3466_v32 = vsel %vm426_vm1, %v7854_v17, %v3379_v45  ;;  %v3741_v3 = vld [vmem:[%s8848_s4] sm:$0xff] }
 0x88b   : > { %v3557_v2 = vcombine.low %v3468_v8, %v3469_v51  ;;  %v6472_v17 = vpack.c.bf16 %v3821_v41, %v3820_v25  ;;  %v3556_v50 = vcombine.low %v3466_v32, %v3467_v37  ;;  %v8047_v52 = vsel %vm3773_vm0, %v3774_v34, %v3775_v40 }
 0x88c   : > { %3402 = vrot.lane.b32.xlu1 %v3317_v12, %s7159_s28  ;;  %5500 = vmatprep.mubr.f32.mxu1 %v8047_v52  ;;  %v3538_v58 = vcombine.low %v3530_v49, %v3537_v44  ;;  %v2993_v8 = vcombine.high %v2992_v11, %v2992_v11  ;;  %v3000_v51 = vrot.slane %v2992_v11, %v7556_v6 }
 0x88d   : > { %v3397_v7 = vpop.permute.xlu0 %3396  ;;  %v3395_v55 = vpop.permute.xlu1 %3394  ;;  %6473 = vmatprep.subr.bf16.mxu1 %v6472_v17  ;;  %v3571_v56 = vrot.slane %v3557_v2, %v7460_v16 }
 0x88e   : > { %3404 = vrot.lane.b32.xlu0 %v3321_v38, %s7159_s28  ;;  %6475 = vmatpush3.bf16.msra.mxu1 %v6472_v17  ;;  %v3007_v37 = vrot.slane %v2993_v8, %v7556_v6  ;;  %v3008_v2 = vcombine.high %v3000_v51, %v3000_v51 }
 0x890   : > { %3406 = vrot.lane.b32.xlu1 %v3325_v13, %s7159_s28  ;;  %v3009_v40 = vcombine.high %v3007_v37, %v3007_v37 }
 0x891   : > { %v3399_v9 = vpop.permute.xlu1 %3398  ;;  %v3401_v31 = vpop.permute.xlu0 %3400 }
 0x892   : > { %3408 = vrot.lane.b32.xlu0 %v3329_v18, %s7159_s28  ;;  %v3476_v45 = vsel %vm426_vm1, %v7896_v29, %v3399_v9  ;;  %v3477_v48 = vsel %vm426_vm1, %v7890_v27, %v3401_v31  ;;  %v3474_v29 = vsel %vm426_vm1, %v7882_v21, %v3395_v55  ;;  %v3475_v27 = vsel %vm426_vm1, %v7877_v20, %v3397_v7 }
 0x893   : > { %v3591_v57 = vcombine.low %v3476_v45, %v3477_v48  ;;  %v8063_v21 = vpack.c.bf16 %v3742_v19, %v3741_v3  ;;  %v3564_v20 = vrot.slane %v3556_v50, %v7460_v16  ;;  %v3590_v63 = vcombine.low %v3474_v29, %v3475_v27 }
 0x894   : > { %3414 = vrot.lane.b32.xlu1 %v3341_v22, %s7159_s28  ;;  %v2944_v7 = vrot.slane %v2890_v4, %v7556_v6  ;;  %v2892_v18 = vrot.slane %v7809_v61, 4 }
 0x895   : > { %6477 = vmatprep.subr.bf16.mxu1 %v8063_v21  ;;  %v3605_v12 = vrot.slane %v3591_v57, %v7460_v16  ;;  %v3572_v38 = vcombine.low %v3564_v20, %v3571_v56  ;;  %v3598_v62 = vrot.slane %v3590_v63, %v7460_v16  ;;  %v3411_v5 = vpop.permute.xlu1 %3410  ;;  %v3413_v43 = vpop.permute.xlu0 %3412 }
 0x896   : > { %3416 = vrot.lane.b32.xlu0 %v3345_v26, %s7159_s28  ;;  %v2945_v42 = vcombine.high %v2944_v7, %v2944_v7  ;;  %v2952_v14 = vrot.slane %v2944_v7, %v7556_v6  ;;  %v3040_v22 = vrot.slane %v2892_v18, %v7556_v6  ;;  %v3482_v11 = vsel %vm426_vm1, %v7908_v46, %v3411_v5 }
 0x897   : > { %v3606_v1 = vcombine.low %v3598_v62, %v3605_v12 }
 0x898   : > { %2912 = vrot.lane.b32.xlu1 %v2905_v54, %s7159_s28  ;;  %v2959_v47 = vrot.slane %v2945_v42, %v7556_v6  ;;  %v2960_v53 = vcombine.high %v2952_v14, %v2952_v14  ;;  %v3041_v45 = vcombine.high %v3040_v22, %v3040_v22  ;;  %v3048_v3 = vrot.slane %v3040_v22, %v7556_v6 }
 0x89a   : > { %3658 = vrot.lane.b32.xlu0 %v3538_v58, %s7164_s8  ;;  %v2961_v31 = vcombine.high %v2959_v47, %v2959_v47  ;;  %v3055_v19 = vrot.slane %v3041_v45, %v7556_v6  ;;  %v3056_v33 = vcombine.high %v3048_v3, %v3048_v3 }
 0x89c   : > { %v3057_v7 = vcombine.high %v3055_v19, %v3055_v19 }
 0x89e   : > { %3662 = vrot.lane.b32.xlu0 %v3572_v38, %s7164_s8 }
 0x8a2   : > { %3666 = vrot.lane.b32.xlu0 %v3606_v1, %s7164_s8 }
 0x8ee   : > { %v3371_v55 = vpop.permute.xlu1 %3370 }
 0x8ef   : > { %v3462_v30 = vsel %vm426_vm1, %v2952_v14, %v3371_v55 }
 0x8f0   : > { %v3373_v13 = vpop.permute.xlu0 %3372 }
 0x8f1   : > { %v3463_v0 = vsel %vm426_vm1, %v2959_v47, %v3373_v13  ;;  %v3483_v13 = vsel %vm426_vm1, %v7903_v36, %v3413_v43 }
 0x8f2   : > { %v3387_v24 = vpop.permute.xlu1 %3386  ;;  %v3539_v26 = vcombine.low %v3462_v30, %v3463_v0  ;;  %v3624_v8 = vcombine.low %v3482_v11, %v3483_v13  ;;  %v3755_v13 = vld [vmem:[%s8848_s4 + $0x70] sm:$0xff] }
 0x8f3   : > { %v3470_v44 = vsel %vm426_vm1, %v3000_v51, %v3387_v24 }
 0x8f4   : > { %v3389_v60 = vpop.permute.xlu0 %3388  ;;  %v3547_v48 = vrot.slane %v3539_v26, %v7460_v16  ;;  %v3632_v30 = vrot.slane %v3624_v8, %v7460_v16 }
 0x8f5   : > { %v3471_v32 = vsel %vm426_vm1, %v3007_v37, %v3389_v60 }
 0x8f6   : > { %v3375_v9 = vpop.permute.xlu1 %3374  ;;  %v3573_v49 = vcombine.low %v3470_v44, %v3471_v32  ;;  %v3743_v44 = vld [vmem:[%s8848_s4 + $0x10] sm:$0xff] }
 0x8f7   : > { %v3464_v25 = vsel %vm426_vm1, %v2960_v53, %v3375_v9 }
 0x8f8   : > { %v3377_v61 = vpop.permute.xlu0 %3376  ;;  %v3581_v20 = vrot.slane %v3573_v49, %v7460_v16 }
 0x8f9   : > { %v3465_v41 = vsel %vm426_vm1, %v2961_v31, %v3377_v61 }
 0x8fa   : > { %v3540_v34 = vcombine.low %v3464_v25, %v3465_v41  ;;  %v3391_v17 = vpop.permute.xlu1 %3390 }
 0x8fb   : > { %v3472_v29 = vsel %vm426_vm1, %v3008_v2, %v3391_v17  ;;  %v3744_v2 = vld [vmem:[%s8848_s4 + $0x18] sm:$0xff] }
 0x8fc   : > { %v3554_v50 = vrot.slane %v3540_v34, %v7460_v16  ;;  %v3393_v54 = vpop.permute.xlu0 %3392 }
 0x8fd   : > { %v3473_v27 = vsel %vm426_vm1, %v3009_v40, %v3393_v54 }
 0x8fe   : > { %v3574_v56 = vcombine.low %v3472_v29, %v3473_v27  ;;  %v3555_v57 = vcombine.low %v3547_v48, %v3554_v50  ;;  %v3403_v58 = vpop.permute.xlu1 %3402  ;;  %v6480_v29 = vpack.c.bf16 %v3744_v2, %v3743_v44 }
 0x8ff   : > { %v3478_v1 = vsel %vm426_vm1, %v3048_v3, %v3403_v58  ;;  %v3745_v58 = vld [vmem:[%s8848_s4 + $0x20] sm:$0xff]  ;;  %v3746_v3 = vld [vmem:[%s8848_s4 + $0x28] sm:$0xff] }
 0x900   : > { %v3588_v63 = vrot.slane %v3574_v56, %v7460_v16  ;;  %3660 = vrot.lane.b32.xlu1 %v3555_v57, %s7164_s8  ;;  %v3405_v12 = vpop.permute.xlu0 %3404 }
 0x901   : > { %v3479_v38 = vsel %vm426_vm1, %v3055_v19, %v3405_v12  ;;  %v3747_v12 = vld [vmem:[%s8848_s4 + $0x30] sm:$0xff] }
 0x902   : > { %v3589_v62 = vcombine.low %v3581_v20, %v3588_v63  ;;  %v3407_v4 = vpop.permute.xlu1 %3406  ;;  %v3607_v55 = vcombine.low %v3478_v1, %v3479_v38  ;;  %v6484_v20 = vpack.c.bf16 %v3746_v3, %v3745_v58  ;;  %v3748_v38 = vld [vmem:[%s8848_s4 + $0x38] sm:$0xff] }
 0x903   : > { %v3480_v14 = vsel %vm426_vm1, %v3056_v33, %v3407_v4  ;;  %v3751_v4 = vld [vmem:[%s8848_s4 + $0x50] sm:$0xff]  ;;  %v3752_v33 = vld [vmem:[%s8848_s4 + $0x58] sm:$0xff] }
 0x904   : > { %3664 = vrot.lane.b32.xlu1 %v3589_v62, %s7164_s8  ;;  %v3409_v42 = vpop.permute.xlu0 %3408  ;;  %v3615_v60 = vrot.slane %v3607_v55, %v7460_v16  ;;  %v3750_v62 = vld [vmem:[%s8848_s4 + $0x48] sm:$0xff]  ;;  %v3753_v55 = vld [vmem:[%s8848_s4 + $0x60] sm:$0xff] }
 0x905   : > { %v3481_v18 = vsel %vm426_vm1, %v3057_v7, %v3409_v42  ;;  %v6496_v7 = vpack.c.bf16 %v3752_v33, %v3751_v4  ;;  %v3754_v42 = vld [vmem:[%s8848_s4 + $0x68] sm:$0xff] }
 0x906   : > { %v3608_v47 = vcombine.low %v3480_v14, %v3481_v18  ;;  %v3415_v24 = vpop.permute.xlu1 %3414  ;;  %v6500_v11 = vpack.c.bf16 %v3754_v42, %v3753_v55  ;;  %v3756_v14 = vld [vmem:[%s8848_s4 + $0x78] sm:$0xff] }
 0x907   : > { %v3484_v53 = vsel %vm426_vm1, %v7993_v59, %v3415_v24  ;;  %v6504_v18 = vpack.c.bf16 %v3756_v14, %v3755_v13  ;;  %v4066_v24 = vld [vmem:[%s8848_s4 + $0x108] sm:$0xff] }
 0x908   : > { %v3622_v0 = vrot.slane %v3608_v47, %v7460_v16  ;;  %v3417_v51 = vpop.permute.xlu0 %3416  ;;  %v4065_v47 = vld [vmem:[%s8848_s4 + $0x100] sm:$0xff] }
 0x909   : > { %v3485_v46 = vsel %vm426_vm1, %v7997_v23, %v3417_v51  ;;  %v8191_v8 = vpack.c.bf16 %v4066_v24, %v4065_v47 }
 0x90a   : > { %v3625_v5 = vcombine.low %v3484_v53, %v3485_v46  ;;  %v3623_v36 = vcombine.low %v3615_v60, %v3622_v0  ;;  %v2913_v43 = vpop.permute.xlu1 %2912 }
 0x90b   : > { %v3216_v9 = vrot.slane %v2913_v43, %v7556_v6 }
 0x90c   : > { %v3639_v37 = vrot.slane %v3625_v5, %v7460_v16  ;;  %v3659_v31 = vpop.permute.xlu0 %3658  ;;  %3668 = vrot.lane.b32.xlu1 %v3623_v36, %s7164_s8 }
 0x90d   : > { %v3683_v22 = vsel %vm3682_vm4, 0.0, %v3659_v31  ;;  %v3217_v59 = vcombine.high %v3216_v9, %v3216_v9  ;;  %v3224_v26 = vrot.slane %v3216_v9, %v7556_v6 }
 0x90e   : > { %v3692_v23 = vsel %vm3691_vm5, %v3683_v22, 0.0  ;;  %v3640_v61 = vcombine.low %v3632_v30, %v3639_v37 }
 0x90f   : > { %v8119_v32 = vrot.slane %v3692_v23, 7  ;;  %v3231_v25 = vrot.slane %v3217_v59, %v7556_v6  ;;  %v3232_v41 = vcombine.high %v3224_v26, %v3224_v26  ;;  %v3349_v34 = vrot.slane %v3224_v26, %v7427_v10 }
 0x910   : > { %3670 = vrot.lane.b32.xlu0 %v3640_v61, %s7164_s8  ;;  %v3663_v60 = vpop.permute.xlu0 %3662 }
 0x911   : > { %v3724_v17 = vsel %vm426_vm1, 0.0, %v8119_v32  ;;  %v3733_v40 = vsel %vm426_vm1, %v8119_v32, 0.0  ;;  %3418 = vrot.lane.b32.xlu1 %v3349_v34, %s7159_s28  ;;  %v3353_v45 = vrot.slane %v3231_v25, %v7427_v10  ;;  %v3357_v56 = vrot.slane %v3232_v41, %v7427_v10 }
 0x912   : > { %v3777_v48 = vrot.slane %v3724_v17, 1  ;;  %v3778_v49 = vrot.slane %v3733_v40, 1  ;;  %v4036_v50 = vrot.slane %v3724_v17, 2  ;;  %v4037_v54 = vrot.slane %v3733_v40, 2 }
 0x913   : > { %v3233_v57 = vcombine.high %v3231_v25, %v3231_v25  ;;  %v3685_v0 = vsel %vm3682_vm4, 0.0, %v3663_v60 }
 0x914   : > { %3420 = vrot.lane.b32.xlu0 %v3353_v45, %s7159_s28  ;;  %v8138_v27 = vsel %vm3773_vm0, %v3777_v48, %v3778_v49  ;;  %v8152_v63 = vsel %vm4032_vm6, %v4036_v50, %v4037_v54  ;;  %v3667_v51 = vpop.permute.xlu0 %3666  ;;  %v3694_v53 = vsel %vm3691_vm5, %v3685_v0, 0.0  ;;  %v2893_v48 = vrot.slane %v7811_v39, 4 }
 0x915   : > { %5501 = vmatmul.mubr.f32.vlgmr.msra.gmra.mrb[4].mxu1 %v8138_v27  ;;  %3422 = vrot.lane.b32.xlu1 %v3357_v56, %s7159_s28  ;;  %v3361_v19 = vrot.slane %v3233_v57, %v7427_v10  ;;  %v6488_v10 = vpack.c.bf16 %v3748_v38, %v3747_v12  ;;  %v3687_v46 = vsel %vm3682_vm4, 0.0, %v3667_v51  ;;  %v8197_v5 = vrot.slane %v3694_v53, 7 }
 0x916   : > { %6479 = vmatpush3.bf16.msra.mxu1 %v8063_v21  ;;  %v3749_v21 = vld [vmem:[%s8848_s4 + $0x40] sm:$0xff]  ;;  %v3696_v36 = vsel %vm3691_vm5, %v3687_v46, 0.0 }
 0x917   : > { %6481 = vmatprep.subr.bf16.mxu1 %v6480_v29  ;;  %v6492_v1 = vpack.c.bf16 %v3750_v62, %v3749_v21  ;;  %v8200_v30 = vrot.slane %v3696_v36, 7  ;;  %v8205_v9 = vsel %vm426_vm1, 0.0, %v8197_v5  ;;  %v8209_v31 = vsel %vm426_vm1, %v8197_v5, 0.0 }
 0x918   : > { %3424 = vrot.lane.b32.xlu0 %v3361_v19, %s7159_s28  ;;  %v3783_v23 = vrot.slane %v8205_v9, 1  ;;  %v3784_v61 = vrot.slane %v8209_v31, 1  ;;  %v3088_v19 = vrot.slane %v2893_v48, %v7556_v6 }
 0x919   : > { %v8227_v44 = vsel %vm426_vm1, 0.0, %v8200_v30  ;;  %v8234_v45 = vsel %vm426_vm1, %v8200_v30, 0.0 }
 0x91a   : > { %6483 = vmatpush3.bf16.msra.mxu1 %v6480_v29  ;;  %v8243_v54 = vsel %vm3773_vm0, %v3783_v23, %v3784_v61  ;;  %v3789_v39 = vrot.slane %v8227_v44, 1  ;;  %v3790_v57 = vrot.slane %v8234_v45, 1  ;;  %v3096_v47 = vrot.slane %v3088_v19, %v7556_v6 }
 0x91b   : > { %6485 = vmatprep.subr.bf16.mxu1 %v6484_v20 }
 0x91e   : > { %6487 = vmatpush3.bf16.msra.mxu1 %v6484_v20 }
 0x91f   : > { %6489 = vmatprep.subr.bf16.mxu1 %v6488_v10 }
 0x922   : > { %6491 = vmatpush3.bf16.msra.mxu1 %v6488_v10  ;;  %v8266_v10 = vsel %vm3773_vm0, %v3789_v39, %v3790_v57 }
 0x923   : > { %6493 = vmatprep.subr.bf16.mxu1 %v6492_v1 }
 0x926   : > { %6495 = vmatpush3.bf16.msra.mxu1 %v6492_v1  ;;  %v3089_v1 = vcombine.high %v3088_v19, %v3088_v19 }
 0x927   : > { %6497 = vmatprep.subr.bf16.mxu1 %v6496_v7 }
 0x928   : > { %v3103_v24 = vrot.slane %v3089_v1, %v7556_v6  ;;  %v4071_v1 = vld [vmem:[%s8848_s4 + $0x130] sm:$0xff] }
 0x92a   : > { %6499 = vmatpush3.bf16.msra.mxu1 %v6496_v7 }
 0x92b   : > { %6501 = vmatprep.subr.bf16.mxu1 %v6500_v11 }
 0x92e   : > { %6503 = vmatpush3.bf16.msra.mxu1 %v6500_v11 }
 0x92f   : > { %6505 = vmatprep.subr.bf16.mxu1 %v6504_v18 }
 0x932   : > { %6507 = vmatpush3.bf16.msra.mxu1 %v6504_v18 }
 0x933   : > { %6509 = vmatprep.subr.bf16.mxu1 %v8191_v8 }
 0x972   : > { %v3661_v43 = vpop.permute.xlu1 %3660 }
 0x973   : > { %v3684_v37 = vsel %vm3682_vm4, 0.0, %v3661_v43 }
 0x974   : > { %v3693_v22 = vsel %vm3691_vm5, %v3684_v37, 0.0 }
 0x975   : > { %v8212_v59 = vrot.slane %v3693_v22, 7  ;;  %v3104_v22 = vcombine.high %v3096_v47, %v3096_v47 }
 0x976   : > { %v3665_v26 = vpop.permute.xlu1 %3664 }
 0x977   : > { %v3686_v25 = vsel %vm3682_vm4, 0.0, %v3665_v26  ;;  %v8219_v41 = vsel %vm426_vm1, 0.0, %v8212_v59  ;;  %v8223_v34 = vsel %vm426_vm1, %v8212_v59, 0.0  ;;  %v3105_v26 = vcombine.high %v3103_v24, %v3103_v24 }
 0x978   : > { %v3695_v2 = vsel %vm3691_vm5, %v3686_v25, 0.0  ;;  %v3780_v17 = vrot.slane %v8219_v41, 1  ;;  %v3781_v40 = vrot.slane %v8223_v34, 1 }
 0x979   : > { %v8237_v49 = vrot.slane %v3695_v2, 7 }
 0x97a   : > { %v8240_v50 = vsel %vm3773_vm0, %v3780_v17, %v3781_v40  ;;  %v4067_v17 = vld [vmem:[%s8848_s4 + $0x110] sm:$0xff]  ;;  %v4068_v40 = vld [vmem:[%s8848_s4 + $0x118] sm:$0xff] }
 0x97b   : > { %5503 = vmatprep.mubr.f32.mxu1 %v8240_v50  ;;  %v8248_v29 = vsel %vm426_vm1, 0.0, %v8237_v49  ;;  %v8252_v56 = vsel %vm426_vm1, %v8237_v49, 0.0 }
 0x97c   : > { %5504 = vmatmul.mubr.f32.gmra.mrb[6].mxu1 %v8243_v54  ;;  %v3786_v58 = vrot.slane %v8248_v29, 1  ;;  %v3787_v3 = vrot.slane %v8252_v56, 1 }
 0x97e   : > { %v3669_v20 = vpop.permute.xlu1 %3668  ;;  %v8261_v12 = vsel %vm3773_vm0, %v3786_v58, %v3787_v3  ;;  %v6512_v58 = vpack.c.bf16 %v4068_v40, %v4067_v17  ;;  %v4197_v17 = vld [vmem:[%s8848_s4 + $0x198] sm:$0xff]  ;;  %v4039_v40 = vrot.slane %v8219_v41, 2 }
 0x97f   : > { %v3688_v38 = vsel %vm3682_vm4, 0.0, %v3669_v20  ;;  %5506 = vmatprep.mubr.f32.mxu1 %v8261_v12  ;;  %v4069_v20 = vld [vmem:[%s8848_s4 + $0x120] sm:$0xff] }
 0x980   : > { %v3697_v21 = vsel %vm3691_vm5, %v3688_v38, 0.0  ;;  %5507 = vmatmul.mubr.f32.gmra.mrb[8].mxu1 %v8266_v10  ;;  %v4070_v38 = vld [vmem:[%s8848_s4 + $0x128] sm:$0xff] }
 0x981   : > { %v8270_v62 = vrot.slane %v3697_v21, 7 }
 0x982   : > { %v3671_v4 = vpop.permute.xlu0 %3670 }
 0x983   : > { %v3689_v33 = vsel %vm3682_vm4, 0.0, %v3671_v4  ;;  %v8275_v7 = vsel %vm426_vm1, 0.0, %v8270_v62  ;;  %v8279_v55 = vsel %vm426_vm1, %v8270_v62, 0.0  ;;  %v3419_v11 = vpop.permute.xlu1 %3418  ;;  %v4072_v4 = vld [vmem:[%s8848_s4 + $0x138] sm:$0xff] }
 0x984   : > { %v3698_v42 = vsel %vm3691_vm5, %v3689_v33, 0.0  ;;  %v3792_v13 = vrot.slane %v8275_v7, 1  ;;  %v3793_v14 = vrot.slane %v8279_v55, 1  ;;  %v3486_v37 = vsel %vm426_vm1, %v3096_v47, %v3419_v11  ;;  %v4073_v11 = vld [vmem:[%s8848_s4 + $0x140] sm:$0xff]  ;;  %v4076_v47 = vld [vmem:[%s8848_s4 + $0x158] sm:$0xff] }
 0x985   : > { %v8284_v18 = vrot.slane %v3698_v42, 7  ;;  %v4033_v33 = vrot.slane %v7457_v15, 2  ;;  %v4034_v42 = vrot.slane %v8034_v28, 2 }
 0x986   : > { %v3421_v60 = vpop.permute.xlu0 %3420  ;;  %v8289_v0 = vsel %vm3773_vm0, %v3792_v13, %v3793_v14  ;;  %v4074_v13 = vld [vmem:[%s8848_s4 + $0x148] sm:$0xff]  ;;  %v4075_v14 = vld [vmem:[%s8848_s4 + $0x150] sm:$0xff] }
 0x987   : > { %v3487_v51 = vsel %vm426_vm1, %v3103_v24, %v3421_v60  ;;  %5509 = vmatprep.mubr.f32.mxu1 %v8289_v0  ;;  %v8295_v53 = vsel %vm426_vm1, 0.0, %v8284_v18  ;;  %v8299_v46 = vsel %vm426_vm1, %v8284_v18, 0.0  ;;  %v3423_v36 = vpop.permute.xlu1 %3422  ;;  %v6524_v15 = vpack.c.bf16 %v4074_v13, %v4073_v11  ;;  %v4077_v60 = vld [vmem:[%s8848_s4 + $0x160] sm:$0xff]  ;;  %v4204_v11 = vld [vmem:[%s8848_s4 + $0x1d0] sm:$0xff]  ;;  %v4205_v13 = vld [vmem:[%s8848_s4 + $0x1d8] sm:$0xff] }
 0x988   : > { %v3795_v43 = vrot.slane %v8295_v53, 1  ;;  %v3796_v6 = vrot.slane %v8299_v46, 1  ;;  %v3641_v61 = vcombine.low %v3486_v37, %v3487_v51  ;;  %v3488_v48 = vsel %vm426_vm1, %v3104_v22, %v3423_v36  ;;  %v4078_v51 = vld [vmem:[%s8848_s4 + $0x168] sm:$0xff]  ;;  %v4194_v22 = vld [vmem:[%s8848_s4 + $0x180] sm:$0xff] }
 0x989   : > { %v8367_v28 = vsel %vm4032_vm6, %v4033_v33, %v4034_v42  ;;  %v6528_v24 = vpack.c.bf16 %v4076_v47, %v4075_v14  ;;  %v6532_v36 = vpack.c.bf16 %v4078_v51, %v4077_v60  ;;  %v4055_v33 = vrot.slane %v8299_v46, 2  ;;  %v4202_v42 = vld [vmem:[%s8848_s4 + $0x1c0] sm:$0xff]  ;;  %v4207_v47 = vld [vmem:[%s8848_s4 + $0x1e8] sm:$0xff]  ;;  %v4208_v60 = vld [vmem:[%s8848_s4 + $0x1f0] sm:$0xff] }
 0x98a   : > { %v3425_v25 = vpop.permute.xlu0 %3424  ;;  %v8310_v2 = vsel %vm3773_vm0, %v3795_v43, %v3796_v6  ;;  %v3649_v3 = vrot.slane %v3641_v61, %v7460_v16  ;;  %v4079_v43 = vld [vmem:[%s8848_s4 + $0x170] sm:$0xff]  ;;  %v4080_v6 = vld [vmem:[%s8848_s4 + $0x178] sm:$0xff]  ;;  %v4206_v14 = vld [vmem:[%s8848_s4 + $0x1e0] sm:$0xff] }
 0x98b   : > { %v3489_v39 = vsel %vm426_vm1, %v3105_v26, %v3425_v25  ;;  %5510 = vmatmul.mubr.f32.gmra.mrb[10].mxu1 %v8310_v2  ;;  %v6536_v37 = vpack.c.bf16 %v4080_v6, %v4079_v43  ;;  %v4195_v26 = vld [vmem:[%s8848_s4 + $0x188] sm:$0xff]  ;;  %v4196_v25 = vld [vmem:[%s8848_s4 + $0x190] sm:$0xff] }
 0x98c   : > { %v3642_v57 = vcombine.low %v3488_v48, %v3489_v39  ;;  %5544 = vmatprep.mubr.msk.f32.mxu1 %vm8305_vm7, %v7453_v35  ;;  %v6540_v61 = vpack.c.bf16 %v4195_v26, %v4194_v22  ;;  %v4040_v48 = vrot.slane %v8223_v34, 2  ;;  %v6544_v39 = vpack.c.bf16 %v4197_v17, %v4196_v25  ;;  %v4330_v43 = vld [vmem:[%s8848_s4 + $0x208] sm:$0xff]  ;;  %v4332_v22 = vld [vmem:[%s8848_s4 + $0x218] sm:$0xff] }
 0x98d   : > { %v4045_v34 = vrot.slane %v8248_v29, 2  ;;  %v4201_v29 = vld [vmem:[%s8848_s4 + $0x1b8] sm:$0xff]  ;;  %v4334_v25 = vld [vmem:[%s8848_s4 + $0x228] sm:$0xff] }
 0x98e   : > { %v3656_v19 = vrot.slane %v3642_v57, %v7460_v16  ;;  %v6516_v16 = vpack.c.bf16 %v4070_v38, %v4069_v20  ;;  %v4042_v57 = vrot.slane %v8205_v9, 2  ;;  %v8415_v41 = vsel %vm4032_vm6, %v4039_v40, %v4040_v48  ;;  %v4335_v40 = vld [vmem:[%s8848_s4 + $0x230] sm:$0xff]  ;;  %v4336_v48 = vld [vmem:[%s8848_s4 + $0x238] sm:$0xff] }
 0x98f   : > { %5545 = vmatmul.mubr.msk.f32.vlgmr.msra.gmra.mrb[4].mxu1 %vm8305_vm7, %v8119_v32  ;;  %v4046_v20 = vrot.slane %v8252_v56, 2  ;;  %v4048_v38 = vrot.slane %v8227_v44, 2 }
 0x990   : > { %6511 = vmatpush3.bf16.msra.mxu1 %v8191_v8  ;;  %5547 = vmatprep.mubr.msk.f32.mxu1 %vm8305_vm7, %v8212_v59  ;;  %v3657_v21 = vcombine.low %v3649_v3, %v3656_v19  ;;  %v6520_v8 = vpack.c.bf16 %v4072_v4, %v4071_v1  ;;  %v4198_v3 = vld [vmem:[%s8848_s4 + $0x1a0] sm:$0xff]  ;;  %v4199_v19 = vld [vmem:[%s8848_s4 + $0x1a8] sm:$0xff]  ;;  %v4051_v1 = vrot.slane %v8275_v7, 2  ;;  %v4052_v4 = vrot.slane %v8279_v55, 2 }
 0x991   : > { %6513 = vmatprep.subr.bf16.mxu1 %v6512_v58  ;;  %v6548_v9 = vpack.c.bf16 %v4199_v19, %v4198_v3  ;;  %v8433_v56 = vsel %vm4032_vm6, %v4045_v34, %v4046_v20  ;;  %v4203_v7 = vld [vmem:[%s8848_s4 + $0x1c8] sm:$0xff]  ;;  %v4339_v19 = vld [vmem:[%s8848_s4 + $0x250] sm:$0xff]  ;;  %v4340_v34 = vld [vmem:[%s8848_s4 + $0x258] sm:$0xff] }
 0x992   : > { %3672 = vrot.lane.b32.xlu1 %v3657_v21, %s7164_s8  ;;  %v4049_v21 = vrot.slane %v8234_v45, 2  ;;  %v8451_v55 = vsel %vm4032_vm6, %v4051_v1, %v4052_v4  ;;  %v6592_v20 = vpack.c.bf16 %v4340_v34, %v4339_v19  ;;  %v4462_v4 = vld [vmem:[%s8848_s4 + $0x280] sm:$0xff]  ;;  %v4592_v34 = vld [vmem:[%s8848_s4 + $0x308] sm:$0xff] }
 0x993   : > { %5548 = vmatmul.mubr.msk.f32.gmra.mrb[6].mxu1 %vm8305_vm7, %v8197_v5  ;;  %v4591_v19 = vld [vmem:[%s8848_s4 + $0x300] sm:$0xff] }
 0x994   : > { %6515 = vmatpush3.bf16.msra.mxu1 %v6512_v58  ;;  %5550 = vmatprep.mubr.msk.f32.mxu1 %vm8305_vm7, %v8237_v49  ;;  %v4043_v58 = vrot.slane %v8209_v31, 2  ;;  %v8439_v45 = vsel %vm4032_vm6, %v4048_v38, %v4049_v21  ;;  %v4342_v38 = vld [vmem:[%s8848_s4 + $0x268] sm:$0xff] }
 0x995   : > { %6517 = vmatprep.subr.bf16.mxu1 %v6516_v16 }
 0x996   : > { %v8421_v31 = vsel %vm4032_vm6, %v4042_v57, %v4043_v58  ;;  %v4337_v57 = vld [vmem:[%s8848_s4 + $0x240] sm:$0xff]  ;;  %v4338_v58 = vld [vmem:[%s8848_s4 + $0x248] sm:$0xff] }
 0x997   : > { %5551 = vmatmul.mubr.msk.f32.gmra.mrb[8].mxu1 %vm8305_vm7, %v8200_v30  ;;  %v6588_v3 = vpack.c.bf16 %v4338_v58, %v4337_v57  ;;  %v4476_v58 = vld [vmem:[%s8848_s4 + $0x2f0] sm:$0xff] }
 0x998   : > { %6519 = vmatpush3.bf16.msra.mxu1 %v6516_v16  ;;  %5553 = vmatprep.mubr.msk.f32.mxu1 %vm8305_vm7, %v8270_v62  ;;  %v4200_v16 = vld [vmem:[%s8848_s4 + $0x1b0] sm:$0xff] }
 0x999   : > { %6521 = vmatprep.subr.bf16.mxu1 %v6520_v8  ;;  %v6552_v44 = vpack.c.bf16 %v4201_v29, %v4200_v16  ;;  %v4343_v16 = vld [vmem:[%s8848_s4 + $0x270] sm:$0xff]  ;;  %v4344_v29 = vld [vmem:[%s8848_s4 + $0x278] sm:$0xff] }
 0x99a   : > { %v6600_v1 = vpack.c.bf16 %v4344_v29, %v4343_v16  ;;  %v4595_v16 = vld [vmem:[%s8848_s4 + $0x320] sm:$0xff]  ;;  %v4596_v29 = vld [vmem:[%s8848_s4 + $0x328] sm:$0xff] }
 0x99b   : > { %5554 = vmatmul.mubr.msk.f32.gmra.mrb[10].mxu1 %vm8305_vm7, %v8284_v18 }
 0x99c   : > { %6523 = vmatpush3.bf16.msra.mxu1 %v6520_v8  ;;  %5588 = vmatprep.mubr.f32.mxu1 %v8367_v28  ;;  %v4054_v8 = vrot.slane %v8295_v53, 2  ;;  %v6556_v53 = vpack.c.bf16 %v4203_v7, %v4202_v42 }
 0x99d   : > { %6525 = vmatprep.subr.bf16.mxu1 %v6524_v15 }
 0x99e   : > { %v8455_v46 = vsel %vm4032_vm6, %v4054_v8, %v4055_v33 }
 0x9a0   : > { %6527 = vmatpush3.bf16.msra.mxu1 %v6524_v15  ;;  %v6560_v15 = vpack.c.bf16 %v4205_v13, %v4204_v11  ;;  %v4464_v11 = vld [vmem:[%s8848_s4 + $0x290] sm:$0xff]  ;;  %v4465_v13 = vld [vmem:[%s8848_s4 + $0x298] sm:$0xff] }
 0x9a1   : > { %6529 = vmatprep.subr.bf16.mxu1 %v6528_v24 }
 0x9a4   : > { %6531 = vmatpush3.bf16.msra.mxu1 %v6528_v24  ;;  %v6564_v24 = vpack.c.bf16 %v4207_v47, %v4206_v14  ;;  %v4466_v14 = vld [vmem:[%s8848_s4 + $0x2a0] sm:$0xff]  ;;  %v4467_v47 = vld [vmem:[%s8848_s4 + $0x2a8] sm:$0xff] }
 0x9a5   : > { %6533 = vmatprep.subr.bf16.mxu1 %v6532_v36 }
 0x9a8   : > { %6535 = vmatpush3.bf16.msra.mxu1 %v6532_v36  ;;  %v4329_v36 = vld [vmem:[%s8848_s4 + $0x200] sm:$0xff] }
 0x9a9   : > { %6537 = vmatprep.subr.bf16.mxu1 %v6536_v37  ;;  %v6572_v6 = vpack.c.bf16 %v4330_v43, %v4329_v36 }
 0x9ac   : > { %6539 = vmatpush3.bf16.msra.mxu1 %v6536_v37  ;;  %v4331_v37 = vld [vmem:[%s8848_s4 + $0x210] sm:$0xff] }
 0x9ad   : > { %6541 = vmatprep.subr.bf16.mxu1 %v6540_v61  ;;  %v6576_v26 = vpack.c.bf16 %v4332_v22, %v4331_v37  ;;  %v4470_v37 = vld [vmem:[%s8848_s4 + $0x2c0] sm:$0xff]  ;;  %v4471_v22 = vld [vmem:[%s8848_s4 + $0x2c8] sm:$0xff] }
 0x9af   : > { %5589 = vmatmul.mubr.f32.vlgmr.msra.gmra.mrb[4].mxu1 %v8152_v63 }
 0x9b0   : > { %5591 = vmatprep.mubr.f32.mxu1 %v8415_v41  ;;  %6543 = vmatpush3.bf16.msra.mxu1 %v6540_v61  ;;  %v4333_v61 = vld [vmem:[%s8848_s4 + $0x220] sm:$0xff] }
 0x9b1   : > { %6545 = vmatprep.subr.bf16.mxu1 %v6544_v39  ;;  %v6580_v17 = vpack.c.bf16 %v4334_v25, %v4333_v61  ;;  %v4472_v25 = vld [vmem:[%s8848_s4 + $0x2d0] sm:$0xff] }
 0x9b3   : > { %5592 = vmatmul.mubr.f32.gmra.mrb[6].mxu1 %v8421_v31 }
 0x9b4   : > { %5594 = vmatprep.mubr.f32.mxu1 %v8433_v56  ;;  %6547 = vmatpush3.bf16.msra.mxu1 %v6544_v39  ;;  %v6584_v39 = vpack.c.bf16 %v4336_v48, %v4335_v40  ;;  %v4474_v48 = vld [vmem:[%s8848_s4 + $0x2e0] sm:$0xff] }
 0x9b5   : > { %6549 = vmatprep.subr.bf16.mxu1 %v6548_v9 }
 0x9b7   : > { %5595 = vmatmul.mubr.f32.gmra.mrb[8].mxu1 %v8439_v45 }
 0x9b8   : > { %5597 = vmatprep.mubr.f32.mxu1 %v8451_v55  ;;  %6551 = vmatpush3.bf16.msra.mxu1 %v6548_v9  ;;  %v4341_v9 = vld [vmem:[%s8848_s4 + $0x260] sm:$0xff] }
 0x9b9   : > { %6553 = vmatprep.subr.bf16.mxu1 %v6552_v44  ;;  %v6596_v21 = vpack.c.bf16 %v4342_v38, %v4341_v9  ;;  %v4593_v9 = vld [vmem:[%s8848_s4 + $0x310] sm:$0xff]  ;;  %v4594_v38 = vld [vmem:[%s8848_s4 + $0x318] sm:$0xff] }
 0x9bb   : > { %5598 = vmatmul.mubr.f32.gmra.mrb[10].mxu1 %v8455_v46 }
 0x9bc   : > { %6555 = vmatpush3.bf16.msra.mxu1 %v6552_v44  ;;  %5632 = vmatprep.mubr.msk.f32.mxu1 %vm8305_vm7, %v8119_v32  ;;  %v4209_v32 = vld [vmem:[%s8848_s4 + $0x1f8] sm:$0xff]  ;;  %v4463_v44 = vld [vmem:[%s8848_s4 + $0x288] sm:$0xff] }
 0x9bd   : > { %6557 = vmatprep.subr.bf16.mxu1 %v6556_v53  ;;  %v6568_v51 = vpack.c.bf16 %v4209_v32, %v4208_v60  ;;  %v6604_v8 = vpack.c.bf16 %v4463_v44, %v4462_v4  ;;  %v4469_v60 = vld [vmem:[%s8848_s4 + $0x2b8] sm:$0xff]  ;;  %v4597_v4 = vld [vmem:[%s8848_s4 + $0x330] sm:$0xff] }
 0x9be   : > { %v4598_v44 = vld [vmem:[%s8848_s4 + $0x338] sm:$0xff] }
 0x9c0   : > { %6559 = vmatpush3.bf16.msra.mxu1 %v6556_v53 }
 0x9c1   : > { %6561 = vmatprep.subr.bf16.mxu1 %v6560_v15 }
 0x9c4   : > { %6563 = vmatpush3.bf16.msra.mxu1 %v6560_v15  ;;  %v6608_v15 = vpack.c.bf16 %v4465_v13, %v4464_v11  ;;  %v4600_v11 = vld [vmem:[%s8848_s4 + $0x348] sm:$0xff] }
 0x9c5   : > { %6565 = vmatprep.subr.bf16.mxu1 %v6564_v24 }
 0x9c8   : > { %6567 = vmatpush3.bf16.msra.mxu1 %v6564_v24  ;;  %v6612_v24 = vpack.c.bf16 %v4467_v47, %v4466_v14  ;;  %v4601_v14 = vld [vmem:[%s8848_s4 + $0x350] sm:$0xff]  ;;  %v4602_v47 = vld [vmem:[%s8848_s4 + $0x358] sm:$0xff] }
 0x9c9   : > { %6569 = vmatprep.subr.bf16.mxu1 %v6568_v51 }
 0x9cc   : > { %6571 = vmatpush3.bf16.msra.mxu1 %v6568_v51 }
 0x9cd   : > { %6573 = vmatprep.subr.bf16.mxu1 %v6572_v6 }
 0x9cf   : > { %5633 = vmatmul.mubr.msk.f32.vlgmr.msra.gmra.mrb[4].mxu1 %vm8305_vm7, %v8212_v59 }
 0x9d0   : > { %5635 = vmatprep.mubr.msk.f32.mxu1 %vm8305_vm7, %v8197_v5  ;;  %6575 = vmatpush3.bf16.msra.mxu1 %v6572_v6 }
 0x9d1   : > { %6577 = vmatprep.subr.bf16.mxu1 %v6576_v26 }
 0x9d3   : > { %5636 = vmatmul.mubr.msk.f32.gmra.mrb[6].mxu1 %vm8305_vm7, %v8237_v49 }
 0x9d4   : > { %5638 = vmatprep.mubr.msk.f32.mxu1 %vm8305_vm7, %v8200_v30  ;;  %6579 = vmatpush3.bf16.msra.mxu1 %v6576_v26  ;;  %v6620_v26 = vpack.c.bf16 %v4471_v22, %v4470_v37  ;;  %v4722_v22 = vld [vmem:[%s8848_s4 + $0x390] sm:$0xff] }
 0x9d5   : > { %6581 = vmatprep.subr.bf16.mxu1 %v6580_v17 }
 0x9d7   : > { %5639 = vmatmul.mubr.msk.f32.gmra.mrb[8].mxu1 %vm8305_vm7, %v8270_v62 }
 0x9d8   : > { %5641 = vmatprep.mubr.msk.f32.mxu1 %vm8305_vm7, %v8284_v18  ;;  %6583 = vmatpush3.bf16.msra.mxu1 %v6580_v17  ;;  %v4473_v17 = vld [vmem:[%s8848_s4 + $0x2d8] sm:$0xff] }
 0x9d9   : > { %6585 = vmatprep.subr.bf16.mxu1 %v6584_v39  ;;  %v6624_v40 = vpack.c.bf16 %v4473_v17, %v4472_v25  ;;  %v4724_v17 = vld [vmem:[%s8848_s4 + $0x3a0] sm:$0xff] }
 0x9dc   : > { %6587 = vmatpush3.bf16.msra.mxu1 %v6584_v39  ;;  %v4475_v39 = vld [vmem:[%s8848_s4 + $0x2e8] sm:$0xff] }
 0x9dd   : > { %6589 = vmatprep.subr.bf16.mxu1 %v6588_v3  ;;  %v6628_v57 = vpack.c.bf16 %v4475_v39, %v4474_v48  ;;  %v4726_v39 = vld [vmem:[%s8848_s4 + $0x3b0] sm:$0xff] }
 0x9e0   : > { %6591 = vmatpush3.bf16.msra.mxu1 %v6588_v3 }
 0x9e1   : > { %6593 = vmatprep.subr.bf16.mxu1 %v6592_v20 }
 0x9e4   : > { %6595 = vmatpush3.bf16.msra.mxu1 %v6592_v20  ;;  %v6636_v20 = vpack.c.bf16 %v4592_v34, %v4591_v19  ;;  %v4849_v34 = vld [vmem:[%s8848_s4 + $0x400] sm:$0xff] }
 0x9e5   : > { %6597 = vmatprep.subr.bf16.mxu1 %v6596_v21 }
 0x9e8   : > { %6599 = vmatpush3.bf16.msra.mxu1 %v6596_v21  ;;  %v6640_v21 = vpack.c.bf16 %v4594_v38, %v4593_v9  ;;  %v4851_v38 = vld [vmem:[%s8848_s4 + $0x410] sm:$0xff] }
 0x9e9   : > { %6601 = vmatprep.subr.bf16.mxu1 %v6600_v1 }
 0x9ec   : > { %6603 = vmatpush3.bf16.msra.mxu1 %v6600_v1  ;;  %v6644_v1 = vpack.c.bf16 %v4596_v29, %v4595_v16  ;;  %v4853_v29 = vld [vmem:[%s8848_s4 + $0x420] sm:$0xff] }
 0x9ed   : > { %6605 = vmatprep.subr.bf16.mxu1 %v6604_v8 }
 0xa04   : > { %v3673_v33 = vpop.permute.xlu1 %3672 }
 0xa05   : > { %v3690_v42 = vsel %vm3682_vm4, 0.0, %v3673_v33 }
 0xa06   : > { %v3699_v7 = vsel %vm3691_vm5, %v3690_v42, 0.0 }
 0xa07   : > { %v8553_v53 = vrot.slane %v3699_v7, 7  ;;  %v4599_v7 = vld [vmem:[%s8848_s4 + $0x340] sm:$0xff] }
 0xa08   : > { %v6652_v13 = vpack.c.bf16 %v4600_v11, %v4599_v7  ;;  %v4862_v7 = vld [vmem:[%s8848_s4 + $0x468] sm:$0xff] }
 0xa09   : > { %5642 = vmatmul.mubr.msk.f32.gmra.mrb[10].mxu1 %vm8305_vm7, %v8553_v53  ;;  %v8582_v32 = vsel %vm426_vm1, 0.0, %v8553_v53  ;;  %v8586_v51 = vsel %vm426_vm1, %v8553_v53, 0.0  ;;  %vm5049_vm1 = vcmask 523264  }
 0xa0a   : > { %5676 = vmatprep.mubr.f32.mxu1 %v8138_v27  ;;  %v4468_v27 = vld [vmem:[%s8848_s4 + $0x2b0] sm:$0xff]  ;;  %v4325_v43 = vrot.slane %v8582_v32, 1  ;;  %v4326_v6 = vrot.slane %v8586_v51, 1  ;;  %v4458_v33 = vrot.slane %v8582_v32, 2  ;;  %v4459_v42 = vrot.slane %v8586_v51, 2 }
 0xa0b   : > { %v6616_v36 = vpack.c.bf16 %v4469_v60, %v4468_v27  ;;  %v4603_v27 = vld [vmem:[%s8848_s4 + $0x360] sm:$0xff]  ;;  %v4604_v60 = vld [vmem:[%s8848_s4 + $0x368] sm:$0xff]  ;;  %v4605_v51 = vld [vmem:[%s8848_s4 + $0x370] sm:$0xff] }
 0xa0c   : > { %v8600_v61 = vsel %vm3773_vm0, %v4325_v43, %v4326_v6  ;;  %v6660_v32 = vpack.c.bf16 %v4604_v60, %v4603_v27  ;;  %v4720_v43 = vld [vmem:[%s8848_s4 + $0x380] sm:$0xff]  ;;  %v4721_v6 = vld [vmem:[%s8848_s4 + $0x388] sm:$0xff] }
 0xa0d   : > { %5677 = vmatmul.mubr.f32.vlgmr.msra.gmra.mrb[4].mxu1 %v8240_v50  ;;  %v6668_v37 = vpack.c.bf16 %v4721_v6, %v4720_v43 }
 0xa0e   : > { %6607 = vmatpush3.bf16.msra.mxu1 %v6604_v8  ;;  %5679 = vmatprep.mubr.f32.mxu1 %v8243_v54  ;;  %v6648_v8 = vpack.c.bf16 %v4598_v44, %v4597_v4  ;;  %v4855_v44 = vld [vmem:[%s8848_s4 + $0x430] sm:$0xff] }
 0xa0f   : > { %6609 = vmatprep.subr.bf16.mxu1 %v6608_v15 }
 0xa11   : > { %5680 = vmatmul.mubr.f32.gmra.mrb[6].mxu1 %v8261_v12 }
 0xa12   : > { %6611 = vmatpush3.bf16.msra.mxu1 %v6608_v15  ;;  %5682 = vmatprep.mubr.f32.mxu1 %v8266_v10  ;;  %v8661_v15 = vsel %vm4032_vm6, %v4458_v33, %v4459_v42  ;;  %v4858_v33 = vld [vmem:[%s8848_s4 + $0x448] sm:$0xff]  ;;  %v4860_v42 = vld [vmem:[%s8848_s4 + $0x458] sm:$0xff] }
 0xa13   : > { %6613 = vmatprep.subr.bf16.mxu1 %v6612_v24 }
 0xa15   : > { %5683 = vmatmul.mubr.f32.gmra.mrb[8].mxu1 %v8289_v0 }
 0xa16   : > { %6615 = vmatpush3.bf16.msra.mxu1 %v6612_v24  ;;  %5685 = vmatprep.mubr.f32.mxu1 %v8310_v2  ;;  %v6656_v24 = vpack.c.bf16 %v4602_v47, %v4601_v14  ;;  %v5240_v14 = vld [vmem:[#allocation9 + $0x6] ss:$0 sm:$0xff] }
 0xa17   : > { %6617 = vmatprep.subr.bf16.mxu1 %v6616_v36 }
 0xa19   : > { %5686 = vmatmul.mubr.f32.gmra.mrb[10].mxu1 %v8600_v61 }
 0xa1a   : > { %6619 = vmatpush3.bf16.msra.mxu1 %v6616_v36  ;;  %5720 = vmatprep.mubr.f32.mxu1 %v8152_v63  ;;  %v4477_v63 = vld [vmem:[%s8848_s4 + $0x2f8] sm:$0xff] }
 0xa1b   : > { %6621 = vmatprep.subr.bf16.mxu1 %v6620_v26  ;;  %v6632_v3 = vpack.c.bf16 %v4477_v63, %v4476_v58  ;;  %v4729_v58 = vld [vmem:[%s8848_s4 + $0x3c8] sm:$0xff]  ;;  %v4731_v63 = vld [vmem:[%s8848_s4 + $0x3d8] sm:$0xff] }
 0xa1e   : > { %6623 = vmatpush3.bf16.msra.mxu1 %v6620_v26  ;;  %v4723_v26 = vld [vmem:[%s8848_s4 + $0x398] sm:$0xff] }
 0xa1f   : > { %6625 = vmatprep.subr.bf16.mxu1 %v6624_v40  ;;  %v6672_v25 = vpack.c.bf16 %v4723_v26, %v4722_v22 }
 0xa22   : > { %6627 = vmatpush3.bf16.msra.mxu1 %v6624_v40  ;;  %v4725_v40 = vld [vmem:[%s8848_s4 + $0x3a8] sm:$0xff] }
 0xa23   : > { %6629 = vmatprep.subr.bf16.mxu1 %v6628_v57  ;;  %v6676_v48 = vpack.c.bf16 %v4725_v40, %v4724_v17 }
 0xa26   : > { %6631 = vmatpush3.bf16.msra.mxu1 %v6628_v57  ;;  %v4727_v57 = vld [vmem:[%s8848_s4 + $0x3b8] sm:$0xff] }
 0xa27   : > { %6633 = vmatprep.subr.bf16.mxu1 %v6632_v3 }
 0xa2a   : > { %6635 = vmatpush3.bf16.msra.mxu1 %v6632_v3  ;;  %v4733_v3 = vld [vmem:[%s8848_s4 + $0x3e8] sm:$0xff] }
 0xa2b   : > { %6637 = vmatprep.subr.bf16.mxu1 %v6636_v20 }
 0xa2d   : > { %5721 = vmatmul.mubr.f32.vlgmr.msra.gmra.mrb[4].mxu1 %v8415_v41 }
 0xa2e   : > { %5723 = vmatprep.mubr.f32.mxu1 %v8421_v31  ;;  %6639 = vmatpush3.bf16.msra.mxu1 %v6636_v20  ;;  %v4850_v20 = vld [vmem:[%s8848_s4 + $0x408] sm:$0xff] }
 0xa2f   : > { %6641 = vmatprep.subr.bf16.mxu1 %v6640_v21  ;;  %v6700_v9 = vpack.c.bf16 %v4850_v20, %v4849_v34 }
 0xa31   : > { %5724 = vmatmul.mubr.f32.gmra.mrb[6].mxu1 %v8433_v56 }
 0xa32   : > { %5726 = vmatprep.mubr.f32.mxu1 %v8439_v45  ;;  %6643 = vmatpush3.bf16.msra.mxu1 %v6640_v21  ;;  %v4852_v21 = vld [vmem:[%s8848_s4 + $0x418] sm:$0xff] }
 0xa33   : > { %6645 = vmatprep.subr.bf16.mxu1 %v6644_v1  ;;  %v6704_v16 = vpack.c.bf16 %v4852_v21, %v4851_v38 }
 0xa35   : > { %5727 = vmatmul.mubr.f32.gmra.mrb[8].mxu1 %v8451_v55 }
 0xa36   : > { %5729 = vmatprep.mubr.f32.mxu1 %v8455_v46  ;;  %6647 = vmatpush3.bf16.msra.mxu1 %v6644_v1  ;;  %v4854_v1 = vld [vmem:[%s8848_s4 + $0x428] sm:$0xff] }
 0xa37   : > { %6649 = vmatprep.subr.bf16.mxu1 %v6648_v8  ;;  %v6708_v4 = vpack.c.bf16 %v4854_v1, %v4853_v29 }
 0xa39   : > { %5730 = vmatmul.mubr.f32.gmra.mrb[10].mxu1 %v8661_v15 }
 0xa3a   : > { %6651 = vmatpush3.bf16.msra.mxu1 %v6648_v8  ;;  %5764 = vmatprep.mubr.msk.f32.mxu1 %vm8305_vm7, %v8212_v59  ;;  %v4606_v59 = vld [vmem:[%s8848_s4 + $0x378] sm:$0xff] }
 0xa3b   : > { %6653 = vmatprep.subr.bf16.mxu1 %v6652_v13  ;;  %v6664_v36 = vpack.c.bf16 %v4606_v59, %v4605_v51  ;;  %v4856_v8 = vld [vmem:[%s8848_s4 + $0x438] sm:$0xff] }
 0xa3e   : > { %6655 = vmatpush3.bf16.msra.mxu1 %v6652_v13 }
 0xa3f   : > { %6657 = vmatprep.subr.bf16.mxu1 %v6656_v24 }
 0xa42   : > { %6659 = vmatpush3.bf16.msra.mxu1 %v6656_v24 }
 0xa43   : > { %6661 = vmatprep.subr.bf16.mxu1 %v6660_v32 }
 0xa46   : > { %6663 = vmatpush3.bf16.msra.mxu1 %v6660_v32 }
 0xa47   : > { %6665 = vmatprep.subr.bf16.mxu1 %v6664_v36 }
 0xa4a   : > { %6667 = vmatpush3.bf16.msra.mxu1 %v6664_v36 }
 0xa4b   : > { %6669 = vmatprep.subr.bf16.mxu1 %v6668_v37 }
 0xa4d   : > { %5765 = vmatmul.mubr.msk.f32.vlgmr.msra.gmra.mrb[4].mxu1 %vm8305_vm7, %v8197_v5  ;;  %v6680_v5 = vpack.c.bf16 %v4727_v57, %v4726_v39 }
 0xa4e   : > { %5767 = vmatprep.mubr.msk.f32.mxu1 %vm8305_vm7, %v8237_v49  ;;  %6671 = vmatpush3.bf16.msra.mxu1 %v6668_v37  ;;  %v4728_v49 = vld [vmem:[%s8848_s4 + $0x3c0] sm:$0xff] }
 0xa4f   : > { %6673 = vmatprep.subr.bf16.mxu1 %v6672_v25 }
 0xa51   : > { %5768 = vmatmul.mubr.msk.f32.gmra.mrb[6].mxu1 %vm8305_vm7, %v8200_v30  ;;  %v6684_v30 = vpack.c.bf16 %v4729_v58, %v4728_v49 }
 0xa52   : > { %5770 = vmatprep.mubr.msk.f32.mxu1 %vm8305_vm7, %v8270_v62  ;;  %6675 = vmatpush3.bf16.msra.mxu1 %v6672_v25  ;;  %v4730_v62 = vld [vmem:[%s8848_s4 + $0x3d0] sm:$0xff] }
 0xa53   : > { %6677 = vmatprep.subr.bf16.mxu1 %v6676_v48 }
 0xa55   : > { %5771 = vmatmul.mubr.msk.f32.gmra.mrb[8].mxu1 %vm8305_vm7, %v8284_v18  ;;  %v6688_v18 = vpack.c.bf16 %v4731_v63, %v4730_v62 }
 0xa56   : > { %5773 = vmatprep.mubr.msk.f32.mxu1 %vm8305_vm7, %v8553_v53  ;;  %6679 = vmatpush3.bf16.msra.mxu1 %v6676_v48  ;;  %v4732_v53 = vld [vmem:[%s8848_s4 + $0x3e0] sm:$0xff] }
 0xa57   : > { %6681 = vmatprep.subr.bf16.mxu1 %v6680_v5  ;;  %v6692_v19 = vpack.c.bf16 %v4733_v3, %v4732_v53 }
 0xa59   : > { %5774 = vmatmul.mubr.msk.f32.gmra.mrb[10].mxu1 %vm8305_vm7, %v7453_v35  ;;  %v4734_v35 = vld [vmem:[%s8848_s4 + $0x3f0] sm:$0xff] }
 0xa5a   : > { %6683 = vmatpush3.bf16.msra.mxu1 %v6680_v5  ;;  %5808 = vmatprep.mubr.f32.mxu1 %v8240_v50  ;;  %v4735_v50 = vld [vmem:[%s8848_s4 + $0x3f8] sm:$0xff] }
 0xa5b   : > { %6685 = vmatprep.subr.bf16.mxu1 %v6684_v30  ;;  %v6696_v23 = vpack.c.bf16 %v4735_v50, %v4734_v35 }
 0xa5e   : > { %6687 = vmatpush3.bf16.msra.mxu1 %v6684_v30 }
 0xa5f   : > { %6689 = vmatprep.subr.bf16.mxu1 %v6688_v18 }
 0xa62   : > { %6691 = vmatpush3.bf16.msra.mxu1 %v6688_v18 }
 0xa63   : > { %6693 = vmatprep.subr.bf16.mxu1 %v6692_v19 }
 0xa66   : > { %6695 = vmatpush3.bf16.msra.mxu1 %v6692_v19 }
 0xa67   : > { %6697 = vmatprep.subr.bf16.mxu1 %v6696_v23 }
 0xa6a   : > { %6699 = vmatpush3.bf16.msra.mxu1 %v6696_v23 }
 0xa6b   : > { %6701 = vmatprep.subr.bf16.mxu1 %v6700_v9 }
 0xa6d   : > { %5809 = vmatmul.mubr.f32.vlgmr.msra.gmra.mrb[4].mxu1 %v8243_v54  ;;  %v6712_v54 = vpack.c.bf16 %v4856_v8, %v4855_v44 }
 0xa6e   : > { %5811 = vmatprep.mubr.f32.mxu1 %v8261_v12  ;;  %6703 = vmatpush3.bf16.msra.mxu1 %v6700_v9  ;;  %v4857_v12 = vld [vmem:[%s8848_s4 + $0x440] sm:$0xff] }
 0xa6f   : > { %6705 = vmatprep.subr.bf16.mxu1 %v6704_v16 }
 0xa71   : > { %5812 = vmatmul.mubr.f32.gmra.mrb[6].mxu1 %v8266_v10  ;;  %v6716_v10 = vpack.c.bf16 %v4858_v33, %v4857_v12 }
 0xa72   : > { %5814 = vmatprep.mubr.f32.mxu1 %v8289_v0  ;;  %6707 = vmatpush3.bf16.msra.mxu1 %v6704_v16  ;;  %v4859_v0 = vld [vmem:[%s8848_s4 + $0x450] sm:$0xff] }
 0xa73   : > { %6709 = vmatprep.subr.bf16.mxu1 %v6708_v4 }
 0xa75   : > { %5815 = vmatmul.mubr.f32.gmra.mrb[8].mxu1 %v8310_v2  ;;  %v6720_v2 = vpack.c.bf16 %v4860_v42, %v4859_v0 }
 0xa76   : > { %5817 = vmatprep.mubr.f32.mxu1 %v8600_v61  ;;  %6711 = vmatpush3.bf16.msra.mxu1 %v6708_v4  ;;  %v4861_v61 = vld [vmem:[%s8848_s4 + $0x460] sm:$0xff] }
 0xa77   : > { %6713 = vmatprep.subr.bf16.mxu1 %v6712_v54  ;;  %v6724_v11 = vpack.c.bf16 %v4862_v7, %v4861_v61 }
 0xa79   : > { %5818 = vmatmul.mubr.f32.gmra.mrb[10].mxu1 %v8047_v52  ;;  %v4863_v52 = vld [vmem:[%s8848_s4 + $0x470] sm:$0xff] }
 0xa7a   : > { %6715 = vmatpush3.bf16.msra.mxu1 %v6712_v54  ;;  %5852 = vmatprep.mubr.f32.mxu1 %v8415_v41  ;;  %v4864_v41 = vld [vmem:[%s8848_s4 + $0x478] sm:$0xff] }
 0xa7b   : > { %6717 = vmatprep.subr.bf16.mxu1 %v6716_v10  ;;  %v6728_v13 = vpack.c.bf16 %v4864_v41, %v4863_v52 }
 0xa7e   : > { %6719 = vmatpush3.bf16.msra.mxu1 %v6716_v10 }
 0xa7f   : > { %6721 = vmatprep.subr.bf16.mxu1 %v6720_v2 }
 0xa82   : > { %6723 = vmatpush3.bf16.msra.mxu1 %v6720_v2 }
 0xa83   : > { %6725 = vmatprep.subr.bf16.mxu1 %v6724_v11 }
 0xa86   : > { %6727 = vmatpush3.bf16.msra.mxu1 %v6724_v11 }
 0xa87   : > { %6729 = vmatprep.subr.bf16.mxu1 %v6728_v13 }
 0xa8a   : > { %6731 = vmatpush3.bf16.msra.mxu1 %v6728_v13 }
 0xa8d   : > { %5853 = vmatmul.mubr.f32.vlgmr.msra.gmra.mrb[4].mxu1 %v8421_v31 }
 0xa8e   : > { %5855 = vmatprep.mubr.f32.mxu1 %v8433_v56 }
 0xa91   : > { %5856 = vmatmul.mubr.f32.gmra.mrb[6].mxu1 %v8439_v45 }
 0xa92   : > { %5858 = vmatprep.mubr.f32.mxu1 %v8451_v55 }
 0xa95   : > { %5859 = vmatmul.mubr.f32.gmra.mrb[8].mxu1 %v8455_v46 }
 0xa96   : > { %5861 = vmatprep.mubr.f32.mxu1 %v8661_v15 }
 0xa99   : > { %5862 = vmatmul.mubr.f32.gmra.mrb[10].mxu1 %v8367_v28 }
 0xb60   : > { %v5854_v47 = vpop.f32.mrb[4].mxu1 }
 0xb61   : > { %v4986_v24 = vadd.f32 %v5854_v47, %v5240_v14  ;;  %v4931_v27 = vpop.f32.mrb[5].mxu1 }
 0xb62   : > { %v4985_v60 = vadd.f32 %v5240_v14, %v4931_v27 }
 0xb63   : > { %v4994_v32 = vmax.f32 %v4986_v24, 0.0 }
 0xb64   : > { %v4993_v51 = vmax.f32 %v4985_v60, 0.0  ;;  %v5857_v31 = vpop.f32.mrb[6].mxu1 }
 0xb65   : > { %v5242_v59 = vmul.f32 -1.442695, %v4994_v32  ;;  %v4988_v56 = vadd.f32 %v5857_v31, %v5240_v14  ;;  %v4941_v36 = vpop.f32.mrb[7].mxu1 }
 0xb66   : > { %v5241_v45 = vmul.f32 -1.442695, %v4993_v51  ;;  %v4987_v43 = vadd.f32 %v5240_v14, %v4941_v36 }
 0xb67   : > { %6933 = vpow2.f32 %v5242_v59  ;;  %v4996_v55 = vmax.f32 %v4988_v56, 0.0 }
 0xb68   : > { %6935 = vpow2.f32 %v5241_v45  ;;  %v4995_v46 = vmax.f32 %v4987_v43, 0.0  ;;  %v5860_v15 = vpop.f32.mrb[8].mxu1 }
 0xb69   : > { %v5244_v6 = vmul.f32 -1.442695, %v4996_v55  ;;  %v4990_v28 = vadd.f32 %v5860_v15, %v5240_v14  ;;  %v4951_v37 = vpop.f32.mrb[9].mxu1 }
 0xb6a   : > { %v5243_v22 = vmul.f32 -1.442695, %v4995_v46  ;;  %v4989_v26 = vadd.f32 %v5240_v14, %v4951_v37 }
 0xb6b   : > { %6937 = vpow2.f32 %v5244_v6  ;;  %v4998_v25 = vmax.f32 %v4990_v28, 0.0 }
 0xb6c   : > { %6939 = vpow2.f32 %v5243_v22  ;;  %v4997_v17 = vmax.f32 %v4989_v26, 0.0  ;;  %v5863_v40 = vpop.f32.mrb[10].mxu1 }
 0xb6d   : > { %v5246_v48 = vmul.f32 -1.442695, %v4998_v25  ;;  %v4992_v39 = vadd.f32 %v5863_v40, %v5240_v14  ;;  %v4961_v57 = vpop.f32.mrb[11].mxu1 }
 0xb6e   : > { %v5245_v5 = vmul.f32 -1.442695, %v4997_v17  ;;  %v4991_v49 = vadd.f32 %v5240_v14, %v4961_v57 }
 0xb6f   : > { %6941 = vpow2.f32 %v5246_v48  ;;  %v5000_v58 = vmax.f32 %v4992_v39, 0.0 }
 0xb70   : > { %6943 = vpow2.f32 %v5245_v5  ;;  %v4999_v30 = vmax.f32 %v4991_v49, 0.0 }
 0xb71   : > { %v6934_v62 = vpop.eup %6933  ;;  %v5248_v63 = vmul.f32 -1.442695, %v5000_v58 }
 0xb72   : > { %v6936_v18 = vpop.eup %6935  ;;  %v5026_v53 = vadd.f32 1.0, %v6934_v62  ;;  %v5247_v3 = vmul.f32 -1.442695, %v4999_v30 }
 0xb73   : > { %v5025_v19 = vadd.f32 1.0, %v6936_v18  ;;  %6945 = vpow2.f32 %v5248_v63 }
 0xb74   : > { %6947 = vrcp.f32 %v5026_v53 }
 0xb75   : > { %v6938_v35 = vpop.eup %6937  ;;  %6949 = vrcp.f32 %v5025_v19 }
 0xb76   : > { %v6940_v50 = vpop.eup %6939  ;;  %v5028_v23 = vadd.f32 1.0, %v6938_v35  ;;  %6951 = vpow2.f32 %v5247_v3 }
 0xb77   : > { %v5027_v34 = vadd.f32 1.0, %v6940_v50 }
 0xb78   : > { %6953 = vrcp.f32 %v5028_v23 }
 0xb79   : > { %v6942_v20 = vpop.eup %6941  ;;  %6955 = vrcp.f32 %v5027_v34 }
 0xb7a   : > { %v6944_v9 = vpop.eup %6943  ;;  %v5030_v38 = vadd.f32 1.0, %v6942_v20 }
 0xb7b   : > { %v5029_v21 = vadd.f32 1.0, %v6944_v9 }
 0xb7c   : > { %6957 = vrcp.f32 %v5030_v38 }
 0xb7d   : > { %v6946_v16 = vpop.eup %6945  ;;  %6959 = vrcp.f32 %v5029_v21 }
 0xb7e   : > { %v6948_v29 = vpop.eup %6947  ;;  %v5032_v1 = vadd.f32 1.0, %v6946_v16 }
 0xb7f   : > { %v6950_v4 = vpop.eup %6949  ;;  %5051 = vst.msk [vmem:[%s321_s30 + $0x8] sm:$0xff] %vm5049_vm1, %v6948_v29 }
 0xb80   : > { %v6952_v44 = vpop.eup %6951  ;;  %5050 = vst.msk [vmem:[%s321_s30] sm:$0xff] %vm5049_vm1, %v6950_v4  ;;  %6961 = vrcp.f32 %v5032_v1 }
 0xb81   : > { %v5031_v8 = vadd.f32 1.0, %v6952_v44 }
 0xb82   : > { %v6954_v54 = vpop.eup %6953 }
 0xb83   : > { %v6956_v12 = vpop.eup %6955  ;;  %5053 = vst.msk [vmem:[%s321_s30 + $0x18] sm:$0xff] %vm5049_vm1, %v6954_v54  ;;  %6963 = vrcp.f32 %v5031_v8 }
 0xb84   : > { %5052 = vst.msk [vmem:[%s321_s30 + $0x10] sm:$0xff] %vm5049_vm1, %v6956_v12 }
 0xb86   : > { %v6958_v33 = vpop.eup %6957 }
 0xb87   : > { %v6960_v10 = vpop.eup %6959  ;;  %5055 = vst.msk [vmem:[%s321_s30 + $0x28] sm:$0xff] %vm5049_vm1, %v6958_v33 }
 0xb88   : > { %5054 = vst.msk [vmem:[%s321_s30 + $0x20] sm:$0xff] %vm5049_vm1, %v6960_v10 }
 0xb8a   : > { %v6962_v0 = vpop.eup %6961 }
 0xb8b   : > { %5057 = vst.msk [vmem:[%s321_s30 + $0x38] sm:$0xff] %vm5049_vm1, %v6962_v0 }
 0xb8d   : > { %v6964_v42 = vpop.eup %6963 }
 0xb8e   : > { %5056 = vst.msk [vmem:[%s321_s30 + $0x30] sm:$0xff] %vm5049_vm1, %v6964_v42 }
 0xb8f PF: > { %p18_p0 = scmp.ge.s32.totalorder %s7347_s15, 4   ;;  %s8872_s21 = smov %s7141_s22 }
 0xb90   : > { %s8873_s22 = smov %s7145_s23  ;;  %s8874_s23 = smov %s7359_s14 }
 0xb91   : > { %s8875_s24 = smov %s7347_s15  ;;  %20 = sbr.rel (!%p18_p0) target bundleno = 5 (0x5), region = 100 }
 0xb98   :  { %5079 = vsyncpa [#allocation3], 1 }
 0xb99   :  { %5081 = vsyncpa [#allocation3 + $0x1], 1 }
 0xb9a   :  { %5082 = vsyncpa [#allocation5], 1 }
 0xb9b   :  { %5083 = vsyncpa [#allocation8], 1 }

</bundles_post_ra>
